<compile_context>
chip_gen: v6e
topology: v6e:2x2x1
jax: 0.10.0
libtpu: 0.0.40
codegen_flags: <defaults>
</compile_context>

<pallas_src>
import functools

import numpy as np

import jax
import jax.numpy as jnp
from jax.experimental import pallas as pl
from jax.experimental.pallas import tpu as pltpu


_LATENT_LAYER = 3          # layer index whose output is the latent branch


# ----------------------------------------------------------------------------
# Host-side lowering of each layer to  Y = act( sum_i L_i @ X @ R_i + B )
# ----------------------------------------------------------------------------
def _conv_consts(w_oihw, b, hi, wi, s):
    """nn.Conv2d (padding=0).  w_oihw: (Cout, Cin, kh, kw) torch layout."""
    w = np.transpose(np.asarray(w_oihw, np.float32), (2, 3, 1, 0))  # (kh,kw,Cin,Cout)
    kh, kw, cin, cout = w.shape
    ho = (hi - kh) // s + 1
    wo = (wi - kw) // s + 1
    L = np.zeros((kh, ho, hi), np.float32)
    R = np.zeros((kh, wi * cin, wo * cout), np.float32)
    for i in range(kh):
        for r in range(ho):
            L[i, r, r * s + i] = 1.0                    # gather input row r*s+i
        for j in range(kw):
            for c in range(wo):
                src = c * s + j
                R[i, src * cin:(src + 1) * cin, c * cout:(c + 1) * cout] = w[i, j]
    B = np.tile(np.asarray(b, np.float32), (ho, wo))     # B[r, c*cout+co] = b[co]
    return L, R, B, ho, wo, cout


def _tconv_consts(w_iohw, b, hi, wi, s):
    """nn.ConvTranspose2d (padding=0, output_padding=0).  w: (Cin,Cout,kh,kw)."""
    w = np.asarray(w_iohw, np.float32)
    cin, cout, kh, kw = w.shape
    ho = (hi - 1) * s + kh
    wo = (wi - 1) * s + kw
    L = np.zeros((kh, ho, hi), np.float32)
    R = np.zeros((kh, wi * cin, wo * cout), np.float32)
    for i in range(kh):
        for r in range(hi):
            L[i, r * s + i, r] = 1.0                     # scatter input row r -> r*s+i
        for j in range(kw):
            for c in range(wi):
                dst = c * s + j
                R[i, c * cin:(c + 1) * cin, dst * cout:(dst + 1) * cout] = w[:, :, i, j]
    B = np.tile(np.asarray(b, np.float32), (ho, wo))
    return L, R, B, ho, wo, cout


def _latent_consts(hc, wc, cc):
    """latent[c*hc*wc + h*wc + w] = X[h, w*cc + c]  (== torch NCHW .view(-1, 16))."""
    L = np.zeros((hc, 1, hc), np.float32)
    R = np.zeros((hc, wc * cc, cc * hc * wc), np.float32)
    for h in range(hc):
        L[h, 0, h] = 1.0
        for w in range(wc):
            for c in range(cc):
                R[h, w * cc + c, c * hc * wc + h * wc + w] = 1.0
    B = np.zeros((1, cc * hc * wc), np.float32)
    return L, R, B


def build_net_constants(params, n, h_in, w_in):
    """Lower all Net layers; returns ([(L, R, B, act)], (H_out, W_out, C_out))."""
    layers = []

    def add(L, R, B, act):
        # Activations are batch-stacked along rows, so L becomes block-diagonal
        # over the batch and the bias map is tiled per batch element.
        layers.append((np.kron(np.eye(n, dtype=np.float32), L).astype(np.float32),
                       np.asarray(R, np.float32),
                       np.tile(np.asarray(B, np.float32), (n, 1)),
                       act))

    h, w = h_in, w_in
    wt, b = params["conv1"];  L, R, B, h, w, c = _conv_consts(wt, b, h, w, 1);  add(L, R, B, "relu")
    wt, b = params["conv2"];  L, R, B, h, w, c = _conv_consts(wt, b, h, w, 2);  add(L, R, B, "relu")
    wt, b = params["conv3"];  L, R, B, h, w, c = _conv_consts(wt, b, h, w, 5);  add(L, R, B, "relu")
    L, R, B = _latent_consts(h, w, c);                                          add(L, R, B, "none")
    wt, b = params["tconv1"]; L, R, B, h, w, c = _tconv_consts(wt, b, h, w, 4); add(L, R, B, "none")
    wt, b = params["tconv2"]; L, R, B, h, w, c = _tconv_consts(wt, b, h, w, 3); add(L, R, B, "none")
    wt, b = params["tconv3"]; L, R, B, h, w, c = _tconv_consts(wt, b, h, w, 1); add(L, R, B, "none")
    wt, b = params["tconv4"]; L, R, B, h, w, c = _tconv_consts(wt, b, h, w, 1); add(L, R, B, "sigmoid")
    return layers, (h, w, c)


# ----------------------------------------------------------------------------
# The single fused Pallas kernel: straight-line chain of 2-D matmuls.
# ----------------------------------------------------------------------------
def _net_fused_kernel(*refs, acts, latent_index):
    n_layers = len(acts)
    x_ref = refs[0]
    layer_refs = refs[1:1 + 3 * n_layers]
    recon_ref = refs[1 + 3 * n_layers]
    latent_out_ref = refs[2 + 3 * n_layers]

    def apply_layer(x, l_ref, r_ref, b_ref, act):
        k, h_out, h_in = l_ref.shape
        _, wc_in, wc_out = r_ref.shape
        acc = b_ref[...]                                 # start from the bias map
        # Static choice of matmul association (fewer MACs); both are exact.
        left_first = (h_out * h_in * wc_in + h_out * wc_in * wc_out
                      <= h_in * wc_in * wc_out + h_out * h_in * wc_out)
        for i in range(k):
            if left_first:
                t = jnp.dot(l_ref[i], x, preferred_element_type=jnp.float32)
                acc = acc + jnp.dot(t, r_ref[i], preferred_element_type=jnp.float32)
            else:
                t = jnp.dot(x, r_ref[i], preferred_element_type=jnp.float32)
                acc = acc + jnp.dot(l_ref[i], t, preferred_element_type=jnp.float32)
        if act == "relu":
            acc = jnp.maximum(acc, 0.0)
        elif act == "sigmoid":
            acc = jax.nn.sigmoid(acc)
        return acc

    h = x_ref[...]                                       # (N*H_in, W_in*C_in)
    for li in range(n_layers):
        l_ref, r_ref, b_ref = layer_refs[3 * li:3 * li + 3]
        y = apply_layer(h, l_ref, r_ref, b_ref, acts[li])
        if li == latent_index:
            latent_out_ref[...] = y                      # latent branch (N, 16)
        else:
            h = y
    recon_ref[...] = h                                   # (N*32, 32)


def make_net_forward(layers, out_hwc):
    acts = tuple(a for (_, _, _, a) in layers)

    rows_in = layers[0][0].shape[2]                      # N * H_in
    cols_in = layers[0][1].shape[1]                      # W_in * C_in
    rows_out = layers[-1][0].shape[1]                    # N * H_out
    cols_out = layers[-1][1].shape[2]                    # W_out * C_out
    lat_rows = layers[_LATENT_LAYER][0].shape[1]         # N
    lat_cols = layers[_LATENT_LAYER][1].shape[2]         # 16

    const_arrays = []
    for (L, R, B, _) in layers:
        const_arrays += [jnp.asarray(L), jnp.asarray(R), jnp.asarray(B)]

    def full_spec(shape):
        zeros = (0,) * len(shape)
        return pl.BlockSpec(tuple(shape), lambda zeros=zeros: zeros)

    in_specs = [full_spec((rows_in, cols_in))] + [full_spec(a.shape) for a in const_arrays]
    out_specs = (full_spec((rows_out, cols_out)), full_spec((lat_rows, lat_cols)))
    out_shape = (jax.ShapeDtypeStruct((rows_out, cols_out), jnp.float32),
                 jax.ShapeDtypeStruct((lat_rows, lat_cols), jnp.float32))

    flops = 0
    for (L, R, _, _) in layers:
        k, ho, hi = L.shape
        _, wcin, wcout = R.shape
        flops += 2 * k * min(ho * hi * wcin + ho * wcin * wcout,
                             hi * wcin * wcout + ho * hi * wcout)
    bytes_accessed = 4 * (rows_in * cols_in + sum(int(a.size) for a in const_arrays)
                          + rows_out * cols_out + lat_rows * lat_cols)
    cost = pl.CostEstimate(flops=int(flops),
                           transcendentals=int(rows_out * cols_out),
                           bytes_accessed=int(bytes_accessed))

    fused = pl.pallas_call(
        functools.partial(_net_fused_kernel, acts=acts, latent_index=_LATENT_LAYER),
        out_shape=out_shape,
        in_specs=in_specs,
        out_specs=out_specs,
        compiler_params=pltpu.CompilerParams(vmem_limit_bytes=32 * 1024 * 1024),
        cost_estimate=cost,
    )

    h_out, w_out, c_out = out_hwc

    @jax.jit
    def net_forward(x_nchw, consts):
        n, cin, hin, win = x_nchw.shape
        # NCHW -> NHWC -> batch-stacked 2-D activation (N*H, W*C).
        x2d = jnp.transpose(x_nchw, (0, 2, 3, 1)).reshape(n * hin, win * cin)
        x2d = x2d.astype(jnp.float32)
        recon2d, latent = fused(x2d, *consts)
        recon = jnp.transpose(recon2d.reshape(n, h_out, w_out, c_out), (0, 3, 1, 2))
        return recon, latent

    return net_forward, const_arrays


# ----------------------------------------------------------------------------
# Deterministic parameter init (PyTorch layouts / shapes from Net.__init__)
# ----------------------------------------------------------------------------
def init_params(key):
    def conv_wb(k, cout, cin, kh, kw):
        k1, k2 = jax.random.split(k)
        bound = 1.0 / float(np.sqrt(cin * kh * kw))
        w = jax.random.uniform(k1, (cout, cin, kh, kw), jnp.float32, -bound, bound)
        b = jax.random.uniform(k2, (cout,), jnp.float32, -bound, bound)
        return np.asarray(w), np.asarray(b)

    def tconv_wb(k, cin, cout, kh, kw):
        k1, k2 = jax.random.split(k)
        bound = 1.0 / float(np.sqrt(cout * kh * kw))
        w = jax.random.uniform(k1, (cin, cout, kh, kw), jnp.float32, -bound, bound)
        b = jax.random.uniform(k2, (cout,), jnp.float32, -bound, bound)
        return np.asarray(w), np.asarray(b)

    ks = jax.random.split(key, 7)
    return {
        "conv1": conv_wb(ks[0], 5, 1, 3, 3),
        "conv2": conv_wb(ks[1], 16, 5, 5, 5),
        "conv3": conv_wb(ks[2], 4, 16, 5, 5),
        "tconv1": tconv_wb(ks[3], 4, 16, 5, 5),
        "tconv2": tconv_wb(ks[4], 16, 5, 5, 5),
        "tconv3": tconv_wb(ks[5], 5, 1, 3, 3),
        "tconv4": tconv_wb(ks[6], 1, 1, 2, 2),
    }


# ----------------------------------------------------------------------------
# Pure-JAX reference of Net.forward (for the numerical check only)
# ----------------------------------------------------------------------------
def _ref_forward(x_nchw, params):
    def conv(x, w_oihw, b, s):
        w = jnp.transpose(jnp.asarray(w_oihw), (2, 3, 1, 0))            # HWIO
        y = jax.lax.conv_general_dilated(
            x, w, window_strides=(s, s), padding="VALID",
            dimension_numbers=("NHWC", "HWIO", "NHWC"),
            precision=jax.lax.Precision.HIGHEST)
        return y + jnp.asarray(b)

    def tconv(x, w_iohw, b, s):
        w_iohw = jnp.asarray(w_iohw)
        kh, kw = int(w_iohw.shape[2]), int(w_iohw.shape[3])
        w = jnp.transpose(w_iohw, (2, 3, 0, 1))[::-1, ::-1, :, :]       # HWIO, flipped
        y = jax.lax.conv_general_dilated(
            x, w, window_strides=(1, 1),
            padding=[(kh - 1, kh - 1), (kw - 1, kw - 1)],
            lhs_dilation=(s, s),
            dimension_numbers=("NHWC", "HWIO", "NHWC"),
            precision=jax.lax.Precision.HIGHEST)
        return y + jnp.asarray(b)

    x = jnp.transpose(x_nchw, (0, 2, 3, 1)).astype(jnp.float32)
    x = jax.nn.relu(conv(x, *params["conv1"], 1))
    x = jax.nn.relu(conv(x, *params["conv2"], 2))
    x = jax.nn.relu(conv(x, *params["conv3"], 5))
    latent = jnp.transpose(x, (0, 3, 1, 2)).reshape(x.shape[0], -1)
    x = tconv(x, *params["tconv1"], 4)
    x = tconv(x, *params["tconv2"], 3)
    x = tconv(x, *params["tconv3"], 1)
    x = tconv(x, *params["tconv4"], 1)
    x = jax.nn.sigmoid(x)
    return jnp.transpose(x, (0, 3, 1, 2)), latent


if __name__ == "__main__":
    # 25x25 input -> conv3 output (N, 4, 2, 2) -> latent (N, 16), recon 32x32,
    # matching the .view(-1, 16) in the reference module.
    N, H_IN, W_IN = 2, 25, 25
    key = jax.random.PRNGKey(0)
    k_param, k_in = jax.random.split(key)

    params = init_params(k_param)
    layers, out_hwc = build_net_constants(params, N, H_IN, W_IN)
    net_forward, consts = make_net_forward(layers, out_hwc)

    x = jax.random.normal(k_in, (N, 1, H_IN, W_IN), jnp.float32)   # NCHW like torch

    recon, latent = net_forward(x, consts)
    jax.block_until_ready(recon)
    jax.block_until_ready(latent)

    assert recon.shape == (N, 1, 32, 32), recon.shape
    assert latent.shape == (N, 16), latent.shape
    assert bool(jnp.all(jnp.isfinite(recon))) and bool(jnp.all(jnp.isfinite(latent)))

    # Numerical check against a pure-JAX (lax.conv) reference of Net.forward.
    recon_want, latent_want = _ref_forward(x, params)
    err_r = float(jnp.max(jnp.abs(recon - recon_want)))
    err_l = float(jnp.max(jnp.abs(latent - latent_want)))
    assert err_r < 5e-3 and err_l < 5e-3, (err_r, err_l)

    print("KERNEL_OK")
</pallas_src>

<mosaic_0001>
module attributes {stable_mosaic.version = 11 : i64} {
  func.func @_net_fused_kernel(%arg0: memref<50x25xf32, #tpu.memory_space<vmem>>, %arg1: memref<3x46x50xf32, #tpu.memory_space<vmem>>, %arg2: memref<3x25x115xf32, #tpu.memory_space<vmem>>, %arg3: memref<46x115xf32, #tpu.memory_space<vmem>>, %arg4: memref<5x20x46xf32, #tpu.memory_space<vmem>>, %arg5: memref<5x115x160xf32, #tpu.memory_space<vmem>>, %arg6: memref<20x160xf32, #tpu.memory_space<vmem>>, %arg7: memref<5x4x20xf32, #tpu.memory_space<vmem>>, %arg8: memref<5x160x8xf32, #tpu.memory_space<vmem>>, %arg9: memref<4x8xf32, #tpu.memory_space<vmem>>, %arg10: memref<2x2x4xf32, #tpu.memory_space<vmem>>, %arg11: memref<2x8x16xf32, #tpu.memory_space<vmem>>, %arg12: memref<2x16xf32, #tpu.memory_space<vmem>>, %arg13: memref<5x18x4xf32, #tpu.memory_space<vmem>>, %arg14: memref<5x8x144xf32, #tpu.memory_space<vmem>>, %arg15: memref<18x144xf32, #tpu.memory_space<vmem>>, %arg16: memref<5x58x18xf32, #tpu.memory_space<vmem>>, %arg17: memref<5x144x145xf32, #tpu.memory_space<vmem>>, %arg18: memref<58x145xf32, #tpu.memory_space<vmem>>, %arg19: memref<3x62x58xf32, #tpu.memory_space<vmem>>, %arg20: memref<3x145x31xf32, #tpu.memory_space<vmem>>, %arg21: memref<62x31xf32, #tpu.memory_space<vmem>>, %arg22: memref<2x64x62xf32, #tpu.memory_space<vmem>>, %arg23: memref<2x31x32xf32, #tpu.memory_space<vmem>>, %arg24: memref<64x32xf32, #tpu.memory_space<vmem>>, %arg25: memref<64x32xf32, #tpu.memory_space<vmem>>, %arg26: memref<2x16xf32, #tpu.memory_space<vmem>>) attributes {dimension_semantics = [], scalar_prefetch = 0 : i64, scratch_operands = 0 : i64, tpu.core_type = #tpu.core_type<tc>} {
    %c0 = arith.constant 0 : index
    %c0_0 = arith.constant 0 : index
    %0 = vector.load %arg0[%c0, %c0_0] : memref<50x25xf32, #tpu.memory_space<vmem>>, vector<50x25xf32>
    %c0_1 = arith.constant 0 : index
    %c0_2 = arith.constant 0 : index
    %1 = vector.load %arg3[%c0_1, %c0_2] : memref<46x115xf32, #tpu.memory_space<vmem>>, vector<46x115xf32>
    %c0_3 = arith.constant 0 : index
    %c0_4 = arith.constant 0 : index
    %c0_5 = arith.constant 0 : index
    %2 = vector.load %arg1[%c0_3, %c0_4, %c0_5] : memref<3x46x50xf32, #tpu.memory_space<vmem>>, vector<1x46x50xf32>
    %3 = vector.shape_cast %2 : vector<1x46x50xf32> to vector<46x50xf32>
    %cst = arith.constant dense<0.000000e+00> : vector<46x25xf32>
    %4 = tpu.matmul %3, %0, %cst {dimension_numbers = #tpu.dot_dimension_numbers<[1], [0], [0], [1], [0, 0, 1, 1], [], []>} : vector<46x50xf32>, vector<50x25xf32>, vector<46x25xf32> -> vector<46x25xf32>
    %c0_6 = arith.constant 0 : index
    %c0_7 = arith.constant 0 : index
    %c0_8 = arith.constant 0 : index
    %5 = vector.load %arg2[%c0_6, %c0_7, %c0_8] : memref<3x25x115xf32, #tpu.memory_space<vmem>>, vector<1x25x115xf32>
    %6 = vector.shape_cast %5 : vector<1x25x115xf32> to vector<25x115xf32>
    %cst_9 = arith.constant dense<0.000000e+00> : vector<46x115xf32>
    %7 = tpu.matmul %4, %6, %cst_9 {dimension_numbers = #tpu.dot_dimension_numbers<[1], [0], [0], [1], [0, 0, 1, 1], [], []>} : vector<46x25xf32>, vector<25x115xf32>, vector<46x115xf32> -> vector<46x115xf32>
    %8 = arith.addf %1, %7 : vector<46x115xf32>
    %c1 = arith.constant 1 : index
    %c0_10 = arith.constant 0 : index
    %c0_11 = arith.constant 0 : index
    %9 = vector.load %arg1[%c1, %c0_10, %c0_11] : memref<3x46x50xf32, #tpu.memory_space<vmem>>, vector<1x46x50xf32>
    %10 = vector.shape_cast %9 : vector<1x46x50xf32> to vector<46x50xf32>
    %cst_12 = arith.constant dense<0.000000e+00> : vector<46x25xf32>
    %11 = tpu.matmul %10, %0, %cst_12 {dimension_numbers = #tpu.dot_dimension_numbers<[1], [0], [0], [1], [0, 0, 1, 1], [], []>} : vector<46x50xf32>, vector<50x25xf32>, vector<46x25xf32> -> vector<46x25xf32>
    %c1_13 = arith.constant 1 : index
    %c0_14 = arith.constant 0 : index
    %c0_15 = arith.constant 0 : index
    %12 = vector.load %arg2[%c1_13, %c0_14, %c0_15] : memref<3x25x115xf32, #tpu.memory_space<vmem>>, vector<1x25x115xf32>
    %13 = vector.shape_cast %12 : vector<1x25x115xf32> to vector<25x115xf32>
    %cst_16 = arith.constant dense<0.000000e+00> : vector<46x115xf32>
    %14 = tpu.matmul %11, %13, %cst_16 {dimension_numbers = #tpu.dot_dimension_numbers<[1], [0], [0], [1], [0, 0, 1, 1], [], []>} : vector<46x25xf32>, vector<25x115xf32>, vector<46x115xf32> -> vector<46x115xf32>
    %15 = arith.addf %8, %14 : vector<46x115xf32>
    %c2 = arith.constant 2 : index
    %c0_17 = arith.constant 0 : index
    %c0_18 = arith.constant 0 : index
    %16 = vector.load %arg1[%c2, %c0_17, %c0_18] : memref<3x46x50xf32, #tpu.memory_space<vmem>>, vector<1x46x50xf32>
    %17 = vector.shape_cast %16 : vector<1x46x50xf32> to vector<46x50xf32>
    %cst_19 = arith.constant dense<0.000000e+00> : vector<46x25xf32>
    %18 = tpu.matmul %17, %0, %cst_19 {dimension_numbers = #tpu.dot_dimension_numbers<[1], [0], [0], [1], [0, 0, 1, 1], [], []>} : vector<46x50xf32>, vector<50x25xf32>, vector<46x25xf32> -> vector<46x25xf32>
    %c2_20 = arith.constant 2 : index
    %c0_21 = arith.constant 0 : index
    %c0_22 = arith.constant 0 : index
    %19 = vector.load %arg2[%c2_20, %c0_21, %c0_22] : memref<3x25x115xf32, #tpu.memory_space<vmem>>, vector<1x25x115xf32>
    %20 = vector.shape_cast %19 : vector<1x25x115xf32> to vector<25x115xf32>
    %cst_23 = arith.constant dense<0.000000e+00> : vector<46x115xf32>
    %21 = tpu.matmul %18, %20, %cst_23 {dimension_numbers = #tpu.dot_dimension_numbers<[1], [0], [0], [1], [0, 0, 1, 1], [], []>} : vector<46x25xf32>, vector<25x115xf32>, vector<46x115xf32> -> vector<46x115xf32>
    %22 = arith.addf %15, %21 : vector<46x115xf32>
    %cst_24 = arith.constant 0.000000e+00 : f32
    %23 = vector.broadcast %cst_24 : f32 to vector<46x115xf32>
    %24 = arith.maximumf %22, %23 : vector<46x115xf32>
    %c0_25 = arith.constant 0 : index
    %c0_26 = arith.constant 0 : index
    %25 = vector.load %arg6[%c0_25, %c0_26] : memref<20x160xf32, #tpu.memory_space<vmem>>, vector<20x160xf32>
    %c0_27 = arith.constant 0 : index
    %c0_28 = arith.constant 0 : index
    %c0_29 = arith.constant 0 : index
    %26 = vector.load %arg4[%c0_27, %c0_28, %c0_29] : memref<5x20x46xf32, #tpu.memory_space<vmem>>, vector<1x20x46xf32>
    %27 = vector.shape_cast %26 : vector<1x20x46xf32> to vector<20x46xf32>
    %cst_30 = arith.constant dense<0.000000e+00> : vector<20x115xf32>
    %28 = tpu.matmul %27, %24, %cst_30 {dimension_numbers = #tpu.dot_dimension_numbers<[1], [0], [0], [1], [0, 0, 1, 1], [], []>} : vector<20x46xf32>, vector<46x115xf32>, vector<20x115xf32> -> vector<20x115xf32>
    %c0_31 = arith.constant 0 : index
    %c0_32 = arith.constant 0 : index
    %c0_33 = arith.constant 0 : index
    %29 = vector.load %arg5[%c0_31, %c0_32, %c0_33] : memref<5x115x160xf32, #tpu.memory_space<vmem>>, vector<1x115x160xf32>
    %30 = vector.shape_cast %29 : vector<1x115x160xf32> to vector<115x160xf32>
    %cst_34 = arith.constant dense<0.000000e+00> : vector<20x160xf32>
    %31 = tpu.matmul %28, %30, %cst_34 {dimension_numbers = #tpu.dot_dimension_numbers<[1], [0], [0], [1], [0, 0, 1, 1], [], []>} : vector<20x115xf32>, vector<115x160xf32>, vector<20x160xf32> -> vector<20x160xf32>
    %32 = arith.addf %25, %31 : vector<20x160xf32>
    %c1_35 = arith.constant 1 : index
    %c0_36 = arith.constant 0 : index
    %c0_37 = arith.constant 0 : index
    %33 = vector.load %arg4[%c1_35, %c0_36, %c0_37] : memref<5x20x46xf32, #tpu.memory_space<vmem>>, vector<1x20x46xf32>
    %34 = vector.shape_cast %33 : vector<1x20x46xf32> to vector<20x46xf32>
    %cst_38 = arith.constant dense<0.000000e+00> : vector<20x115xf32>
    %35 = tpu.matmul %34, %24, %cst_38 {dimension_numbers = #tpu.dot_dimension_numbers<[1], [0], [0], [1], [0, 0, 1, 1], [], []>} : vector<20x46xf32>, vector<46x115xf32>, vector<20x115xf32> -> vector<20x115xf32>
    %c1_39 = arith.constant 1 : index
    %c0_40 = arith.constant 0 : index
    %c0_41 = arith.constant 0 : index
    %36 = vector.load %arg5[%c1_39, %c0_40, %c0_41] : memref<5x115x160xf32, #tpu.memory_space<vmem>>, vector<1x115x160xf32>
    %37 = vector.shape_cast %36 : vector<1x115x160xf32> to vector<115x160xf32>
    %cst_42 = arith.constant dense<0.000000e+00> : vector<20x160xf32>
    %38 = tpu.matmul %35, %37, %cst_42 {dimension_numbers = #tpu.dot_dimension_numbers<[1], [0], [0], [1], [0, 0, 1, 1], [], []>} : vector<20x115xf32>, vector<115x160xf32>, vector<20x160xf32> -> vector<20x160xf32>
    %39 = arith.addf %32, %38 : vector<20x160xf32>
    %c2_43 = arith.constant 2 : index
    %c0_44 = arith.constant 0 : index
    %c0_45 = arith.constant 0 : index
    %40 = vector.load %arg4[%c2_43, %c0_44, %c0_45] : memref<5x20x46xf32, #tpu.memory_space<vmem>>, vector<1x20x46xf32>
    %41 = vector.shape_cast %40 : vector<1x20x46xf32> to vector<20x46xf32>
    %cst_46 = arith.constant dense<0.000000e+00> : vector<20x115xf32>
    %42 = tpu.matmul %41, %24, %cst_46 {dimension_numbers = #tpu.dot_dimension_numbers<[1], [0], [0], [1], [0, 0, 1, 1], [], []>} : vector<20x46xf32>, vector<46x115xf32>, vector<20x115xf32> -> vector<20x115xf32>
    %c2_47 = arith.constant 2 : index
    %c0_48 = arith.constant 0 : index
    %c0_49 = arith.constant 0 : index
    %43 = vector.load %arg5[%c2_47, %c0_48, %c0_49] : memref<5x115x160xf32, #tpu.memory_space<vmem>>, vector<1x115x160xf32>
    %44 = vector.shape_cast %43 : vector<1x115x160xf32> to vector<115x160xf32>
    %cst_50 = arith.constant dense<0.000000e+00> : vector<20x160xf32>
    %45 = tpu.matmul %42, %44, %cst_50 {dimension_numbers = #tpu.dot_dimension_numbers<[1], [0], [0], [1], [0, 0, 1, 1], [], []>} : vector<20x115xf32>, vector<115x160xf32>, vector<20x160xf32> -> vector<20x160xf32>
    %46 = arith.addf %39, %45 : vector<20x160xf32>
    %c3 = arith.constant 3 : index
    %c0_51 = arith.constant 0 : index
    %c0_52 = arith.constant 0 : index
    %47 = vector.load %arg4[%c3, %c0_51, %c0_52] : memref<5x20x46xf32, #tpu.memory_space<vmem>>, vector<1x20x46xf32>
    %48 = vector.shape_cast %47 : vector<1x20x46xf32> to vector<20x46xf32>
    %cst_53 = arith.constant dense<0.000000e+00> : vector<20x115xf32>
    %49 = tpu.matmul %48, %24, %cst_53 {dimension_numbers = #tpu.dot_dimension_numbers<[1], [0], [0], [1], [0, 0, 1, 1], [], []>} : vector<20x46xf32>, vector<46x115xf32>, vector<20x115xf32> -> vector<20x115xf32>
    %c3_54 = arith.constant 3 : index
    %c0_55 = arith.constant 0 : index
    %c0_56 = arith.constant 0 : index
    %50 = vector.load %arg5[%c3_54, %c0_55, %c0_56] : memref<5x115x160xf32, #tpu.memory_space<vmem>>, vector<1x115x160xf32>
    %51 = vector.shape_cast %50 : vector<1x115x160xf32> to vector<115x160xf32>
    %cst_57 = arith.constant dense<0.000000e+00> : vector<20x160xf32>
    %52 = tpu.matmul %49, %51, %cst_57 {dimension_numbers = #tpu.dot_dimension_numbers<[1], [0], [0], [1], [0, 0, 1, 1], [], []>} : vector<20x115xf32>, vector<115x160xf32>, vector<20x160xf32> -> vector<20x160xf32>
    %53 = arith.addf %46, %52 : vector<20x160xf32>
    %c4 = arith.constant 4 : index
    %c0_58 = arith.constant 0 : index
    %c0_59 = arith.constant 0 : index
    %54 = vector.load %arg4[%c4, %c0_58, %c0_59] : memref<5x20x46xf32, #tpu.memory_space<vmem>>, vector<1x20x46xf32>
    %55 = vector.shape_cast %54 : vector<1x20x46xf32> to vector<20x46xf32>
    %cst_60 = arith.constant dense<0.000000e+00> : vector<20x115xf32>
    %56 = tpu.matmul %55, %24, %cst_60 {dimension_numbers = #tpu.dot_dimension_numbers<[1], [0], [0], [1], [0, 0, 1, 1], [], []>} : vector<20x46xf32>, vector<46x115xf32>, vector<20x115xf32> -> vector<20x115xf32>
    %c4_61 = arith.constant 4 : index
    %c0_62 = arith.constant 0 : index
    %c0_63 = arith.constant 0 : index
    %57 = vector.load %arg5[%c4_61, %c0_62, %c0_63] : memref<5x115x160xf32, #tpu.memory_space<vmem>>, vector<1x115x160xf32>
    %58 = vector.shape_cast %57 : vector<1x115x160xf32> to vector<115x160xf32>
    %cst_64 = arith.constant dense<0.000000e+00> : vector<20x160xf32>
    %59 = tpu.matmul %56, %58, %cst_64 {dimension_numbers = #tpu.dot_dimension_numbers<[1], [0], [0], [1], [0, 0, 1, 1], [], []>} : vector<20x115xf32>, vector<115x160xf32>, vector<20x160xf32> -> vector<20x160xf32>
    %60 = arith.addf %53, %59 : vector<20x160xf32>
    %cst_65 = arith.constant 0.000000e+00 : f32
    %61 = vector.broadcast %cst_65 : f32 to vector<20x160xf32>
    %62 = arith.maximumf %60, %61 : vector<20x160xf32>
    %c0_66 = arith.constant 0 : index
    %c0_67 = arith.constant 0 : index
    %63 = vector.load %arg9[%c0_66, %c0_67] : memref<4x8xf32, #tpu.memory_space<vmem>>, vector<4x8xf32>
    %c0_68 = arith.constant 0 : index
    %c0_69 = arith.constant 0 : index
    %c0_70 = arith.constant 0 : index
    %64 = vector.load %arg7[%c0_68, %c0_69, %c0_70] : memref<5x4x20xf32, #tpu.memory_space<vmem>>, vector<1x4x20xf32>
    %65 = vector.shape_cast %64 : vector<1x4x20xf32> to vector<4x20xf32>
    %cst_71 = arith.constant dense<0.000000e+00> : vector<4x160xf32>
    %66 = tpu.matmul %65, %62, %cst_71 {dimension_numbers = #tpu.dot_dimension_numbers<[1], [0], [0], [1], [0, 0, 1, 1], [], []>} : vector<4x20xf32>, vector<20x160xf32>, vector<4x160xf32> -> vector<4x160xf32>
    %c0_72 = arith.constant 0 : index
    %c0_73 = arith.constant 0 : index
    %c0_74 = arith.constant 0 : index
    %67 = vector.load %arg8[%c0_72, %c0_73, %c0_74] : memref<5x160x8xf32, #tpu.memory_space<vmem>>, vector<1x160x8xf32>
    %68 = vector.shape_cast %67 : vector<1x160x8xf32> to vector<160x8xf32>
    %cst_75 = arith.constant dense<0.000000e+00> : vector<4x8xf32>
    %69 = tpu.matmul %66, %68, %cst_75 {dimension_numbers = #tpu.dot_dimension_numbers<[1], [0], [0], [1], [0, 0, 1, 1], [], []>} : vector<4x160xf32>, vector<160x8xf32>, vector<4x8xf32> -> vector<4x8xf32>
    %70 = arith.addf %63, %69 : vector<4x8xf32>
    %c1_76 = arith.constant 1 : index
    %c0_77 = arith.constant 0 : index
    %c0_78 = arith.constant 0 : index
    %71 = vector.load %arg7[%c1_76, %c0_77, %c0_78] : memref<5x4x20xf32, #tpu.memory_space<vmem>>, vector<1x4x20xf32>
    %72 = vector.shape_cast %71 : vector<1x4x20xf32> to vector<4x20xf32>
    %cst_79 = arith.constant dense<0.000000e+00> : vector<4x160xf32>
    %73 = tpu.matmul %72, %62, %cst_79 {dimension_numbers = #tpu.dot_dimension_numbers<[1], [0], [0], [1], [0, 0, 1, 1], [], []>} : vector<4x20xf32>, vector<20x160xf32>, vector<4x160xf32> -> vector<4x160xf32>
    %c1_80 = arith.constant 1 : index
    %c0_81 = arith.constant 0 : index
    %c0_82 = arith.constant 0 : index
    %74 = vector.load %arg8[%c1_80, %c0_81, %c0_82] : memref<5x160x8xf32, #tpu.memory_space<vmem>>, vector<1x160x8xf32>
    %75 = vector.shape_cast %74 : vector<1x160x8xf32> to vector<160x8xf32>
    %cst_83 = arith.constant dense<0.000000e+00> : vector<4x8xf32>
    %76 = tpu.matmul %73, %75, %cst_83 {dimension_numbers = #tpu.dot_dimension_numbers<[1], [0], [0], [1], [0, 0, 1, 1], [], []>} : vector<4x160xf32>, vector<160x8xf32>, vector<4x8xf32> -> vector<4x8xf32>
    %77 = arith.addf %70, %76 : vector<4x8xf32>
    %c2_84 = arith.constant 2 : index
    %c0_85 = arith.constant 0 : index
    %c0_86 = arith.constant 0 : index
    %78 = vector.load %arg7[%c2_84, %c0_85, %c0_86] : memref<5x4x20xf32, #tpu.memory_space<vmem>>, vector<1x4x20xf32>
    %79 = vector.shape_cast %78 : vector<1x4x20xf32> to vector<4x20xf32>
    %cst_87 = arith.constant dense<0.000000e+00> : vector<4x160xf32>
    %80 = tpu.matmul %79, %62, %cst_87 {dimension_numbers = #tpu.dot_dimension_numbers<[1], [0], [0], [1], [0, 0, 1, 1], [], []>} : vector<4x20xf32>, vector<20x160xf32>, vector<4x160xf32> -> vector<4x160xf32>
    %c2_88 = arith.constant 2 : index
    %c0_89 = arith.constant 0 : index
    %c0_90 = arith.constant 0 : index
    %81 = vector.load %arg8[%c2_88, %c0_89, %c0_90] : memref<5x160x8xf32, #tpu.memory_space<vmem>>, vector<1x160x8xf32>
    %82 = vector.shape_cast %81 : vector<1x160x8xf32> to vector<160x8xf32>
    %cst_91 = arith.constant dense<0.000000e+00> : vector<4x8xf32>
    %83 = tpu.matmul %80, %82, %cst_91 {dimension_numbers = #tpu.dot_dimension_numbers<[1], [0], [0], [1], [0, 0, 1, 1], [], []>} : vector<4x160xf32>, vector<160x8xf32>, vector<4x8xf32> -> vector<4x8xf32>
    %84 = arith.addf %77, %83 : vector<4x8xf32>
    %c3_92 = arith.constant 3 : index
    %c0_93 = arith.constant 0 : index
    %c0_94 = arith.constant 0 : index
    %85 = vector.load %arg7[%c3_92, %c0_93, %c0_94] : memref<5x4x20xf32, #tpu.memory_space<vmem>>, vector<1x4x20xf32>
    %86 = vector.shape_cast %85 : vector<1x4x20xf32> to vector<4x20xf32>
    %cst_95 = arith.constant dense<0.000000e+00> : vector<4x160xf32>
    %87 = tpu.matmul %86, %62, %cst_95 {dimension_numbers = #tpu.dot_dimension_numbers<[1], [0], [0], [1], [0, 0, 1, 1], [], []>} : vector<4x20xf32>, vector<20x160xf32>, vector<4x160xf32> -> vector<4x160xf32>
    %c3_96 = arith.constant 3 : index
    %c0_97 = arith.constant 0 : index
    %c0_98 = arith.constant 0 : index
    %88 = vector.load %arg8[%c3_96, %c0_97, %c0_98] : memref<5x160x8xf32, #tpu.memory_space<vmem>>, vector<1x160x8xf32>
    %89 = vector.shape_cast %88 : vector<1x160x8xf32> to vector<160x8xf32>
    %cst_99 = arith.constant dense<0.000000e+00> : vector<4x8xf32>
    %90 = tpu.matmul %87, %89, %cst_99 {dimension_numbers = #tpu.dot_dimension_numbers<[1], [0], [0], [1], [0, 0, 1, 1], [], []>} : vector<4x160xf32>, vector<160x8xf32>, vector<4x8xf32> -> vector<4x8xf32>
    %91 = arith.addf %84, %90 : vector<4x8xf32>
    %c4_100 = arith.constant 4 : index
    %c0_101 = arith.constant 0 : index
    %c0_102 = arith.constant 0 : index
    %92 = vector.load %arg7[%c4_100, %c0_101, %c0_102] : memref<5x4x20xf32, #tpu.memory_space<vmem>>, vector<1x4x20xf32>
    %93 = vector.shape_cast %92 : vector<1x4x20xf32> to vector<4x20xf32>
    %cst_103 = arith.constant dense<0.000000e+00> : vector<4x160xf32>
    %94 = tpu.matmul %93, %62, %cst_103 {dimension_numbers = #tpu.dot_dimension_numbers<[1], [0], [0], [1], [0, 0, 1, 1], [], []>} : vector<4x20xf32>, vector<20x160xf32>, vector<4x160xf32> -> vector<4x160xf32>
    %c4_104 = arith.constant 4 : index
    %c0_105 = arith.constant 0 : index
    %c0_106 = arith.constant 0 : index
    %95 = vector.load %arg8[%c4_104, %c0_105, %c0_106] : memref<5x160x8xf32, #tpu.memory_space<vmem>>, vector<1x160x8xf32>
    %96 = vector.shape_cast %95 : vector<1x160x8xf32> to vector<160x8xf32>
    %cst_107 = arith.constant dense<0.000000e+00> : vector<4x8xf32>
    %97 = tpu.matmul %94, %96, %cst_107 {dimension_numbers = #tpu.dot_dimension_numbers<[1], [0], [0], [1], [0, 0, 1, 1], [], []>} : vector<4x160xf32>, vector<160x8xf32>, vector<4x8xf32> -> vector<4x8xf32>
    %98 = arith.addf %91, %97 : vector<4x8xf32>
    %cst_108 = arith.constant 0.000000e+00 : f32
    %99 = vector.broadcast %cst_108 : f32 to vector<4x8xf32>
    %100 = arith.maximumf %98, %99 : vector<4x8xf32>
    %c0_109 = arith.constant 0 : index
    %c0_110 = arith.constant 0 : index
    %101 = vector.load %arg12[%c0_109, %c0_110] : memref<2x16xf32, #tpu.memory_space<vmem>>, vector<2x16xf32>
    %c0_111 = arith.constant 0 : index
    %c0_112 = arith.constant 0 : index
    %c0_113 = arith.constant 0 : index
    %102 = vector.load %arg10[%c0_111, %c0_112, %c0_113] : memref<2x2x4xf32, #tpu.memory_space<vmem>>, vector<1x2x4xf32>
    %103 = vector.shape_cast %102 : vector<1x2x4xf32> to vector<2x4xf32>
    %cst_114 = arith.constant dense<0.000000e+00> : vector<2x8xf32>
    %104 = tpu.matmul %103, %100, %cst_114 {dimension_numbers = #tpu.dot_dimension_numbers<[1], [0], [0], [1], [0, 0, 1, 1], [], []>} : vector<2x4xf32>, vector<4x8xf32>, vector<2x8xf32> -> vector<2x8xf32>
    %c0_115 = arith.constant 0 : index
    %c0_116 = arith.constant 0 : index
    %c0_117 = arith.constant 0 : index
    %105 = vector.load %arg11[%c0_115, %c0_116, %c0_117] : memref<2x8x16xf32, #tpu.memory_space<vmem>>, vector<1x8x16xf32>
    %106 = vector.shape_cast %105 : vector<1x8x16xf32> to vector<8x16xf32>
    %cst_118 = arith.constant dense<0.000000e+00> : vector<2x16xf32>
    %107 = tpu.matmul %104, %106, %cst_118 {dimension_numbers = #tpu.dot_dimension_numbers<[1], [0], [0], [1], [0, 0, 1, 1], [], []>} : vector<2x8xf32>, vector<8x16xf32>, vector<2x16xf32> -> vector<2x16xf32>
    %108 = arith.addf %101, %107 : vector<2x16xf32>
    %c1_119 = arith.constant 1 : index
    %c0_120 = arith.constant 0 : index
    %c0_121 = arith.constant 0 : index
    %109 = vector.load %arg10[%c1_119, %c0_120, %c0_121] : memref<2x2x4xf32, #tpu.memory_space<vmem>>, vector<1x2x4xf32>
    %110 = vector.shape_cast %109 : vector<1x2x4xf32> to vector<2x4xf32>
    %cst_122 = arith.constant dense<0.000000e+00> : vector<2x8xf32>
    %111 = tpu.matmul %110, %100, %cst_122 {dimension_numbers = #tpu.dot_dimension_numbers<[1], [0], [0], [1], [0, 0, 1, 1], [], []>} : vector<2x4xf32>, vector<4x8xf32>, vector<2x8xf32> -> vector<2x8xf32>
    %c1_123 = arith.constant 1 : index
    %c0_124 = arith.constant 0 : index
    %c0_125 = arith.constant 0 : index
    %112 = vector.load %arg11[%c1_123, %c0_124, %c0_125] : memref<2x8x16xf32, #tpu.memory_space<vmem>>, vector<1x8x16xf32>
    %113 = vector.shape_cast %112 : vector<1x8x16xf32> to vector<8x16xf32>
    %cst_126 = arith.constant dense<0.000000e+00> : vector<2x16xf32>
    %114 = tpu.matmul %111, %113, %cst_126 {dimension_numbers = #tpu.dot_dimension_numbers<[1], [0], [0], [1], [0, 0, 1, 1], [], []>} : vector<2x8xf32>, vector<8x16xf32>, vector<2x16xf32> -> vector<2x16xf32>
    %115 = arith.addf %108, %114 : vector<2x16xf32>
    %c0_127 = arith.constant 0 : index
    %c0_128 = arith.constant 0 : index
    %116 = vector.load %arg26[%c0_127, %c0_128] : memref<2x16xf32, #tpu.memory_space<vmem>>, vector<2x16xf32>
    tpu.vector_store %arg26[%c0_127, %c0_128], %115 {strides = array<i32>} : memref<2x16xf32, #tpu.memory_space<vmem>>, vector<2x16xf32>,
    %c0_129 = arith.constant 0 : index
    %c0_130 = arith.constant 0 : index
    %117 = vector.load %arg15[%c0_129, %c0_130] : memref<18x144xf32, #tpu.memory_space<vmem>>, vector<18x144xf32>
    %c0_131 = arith.constant 0 : index
    %c0_132 = arith.constant 0 : index
    %c0_133 = arith.constant 0 : index
    %118 = vector.load %arg14[%c0_131, %c0_132, %c0_133] : memref<5x8x144xf32, #tpu.memory_space<vmem>>, vector<1x8x144xf32>
    %119 = vector.shape_cast %118 : vector<1x8x144xf32> to vector<8x144xf32>
    %cst_134 = arith.constant dense<0.000000e+00> : vector<4x144xf32>
    %120 = tpu.matmul %100, %119, %cst_134 {dimension_numbers = #tpu.dot_dimension_numbers<[1], [0], [0], [1], [0, 0, 1, 1], [], []>} : vector<4x8xf32>, vector<8x144xf32>, vector<4x144xf32> -> vector<4x144xf32>
    %c0_135 = arith.constant 0 : index
    %c0_136 = arith.constant 0 : index
    %c0_137 = arith.constant 0 : index
    %121 = vector.load %arg13[%c0_135, %c0_136, %c0_137] : memref<5x18x4xf32, #tpu.memory_space<vmem>>, vector<1x18x4xf32>
    %122 = vector.shape_cast %121 : vector<1x18x4xf32> to vector<18x4xf32>
    %cst_138 = arith.constant dense<0.000000e+00> : vector<18x144xf32>
    %123 = tpu.matmul %122, %120, %cst_138 {dimension_numbers = #tpu.dot_dimension_numbers<[1], [0], [0], [1], [0, 0, 1, 1], [], []>} : vector<18x4xf32>, vector<4x144xf32>, vector<18x144xf32> -> vector<18x144xf32>
    %124 = arith.addf %117, %123 : vector<18x144xf32>
    %c1_139 = arith.constant 1 : index
    %c0_140 = arith.constant 0 : index
    %c0_141 = arith.constant 0 : index
    %125 = vector.load %arg14[%c1_139, %c0_140, %c0_141] : memref<5x8x144xf32, #tpu.memory_space<vmem>>, vector<1x8x144xf32>
    %126 = vector.shape_cast %125 : vector<1x8x144xf32> to vector<8x144xf32>
    %cst_142 = arith.constant dense<0.000000e+00> : vector<4x144xf32>
    %127 = tpu.matmul %100, %126, %cst_142 {dimension_numbers = #tpu.dot_dimension_numbers<[1], [0], [0], [1], [0, 0, 1, 1], [], []>} : vector<4x8xf32>, vector<8x144xf32>, vector<4x144xf32> -> vector<4x144xf32>
    %c1_143 = arith.constant 1 : index
    %c0_144 = arith.constant 0 : index
    %c0_145 = arith.constant 0 : index
    %128 = vector.load %arg13[%c1_143, %c0_144, %c0_145] : memref<5x18x4xf32, #tpu.memory_space<vmem>>, vector<1x18x4xf32>
    %129 = vector.shape_cast %128 : vector<1x18x4xf32> to vector<18x4xf32>
    %cst_146 = arith.constant dense<0.000000e+00> : vector<18x144xf32>
    %130 = tpu.matmul %129, %127, %cst_146 {dimension_numbers = #tpu.dot_dimension_numbers<[1], [0], [0], [1], [0, 0, 1, 1], [], []>} : vector<18x4xf32>, vector<4x144xf32>, vector<18x144xf32> -> vector<18x144xf32>
    %131 = arith.addf %124, %130 : vector<18x144xf32>
    %c2_147 = arith.constant 2 : index
    %c0_148 = arith.constant 0 : index
    %c0_149 = arith.constant 0 : index
    %132 = vector.load %arg14[%c2_147, %c0_148, %c0_149] : memref<5x8x144xf32, #tpu.memory_space<vmem>>, vector<1x8x144xf32>
    %133 = vector.shape_cast %132 : vector<1x8x144xf32> to vector<8x144xf32>
    %cst_150 = arith.constant dense<0.000000e+00> : vector<4x144xf32>
    %134 = tpu.matmul %100, %133, %cst_150 {dimension_numbers = #tpu.dot_dimension_numbers<[1], [0], [0], [1], [0, 0, 1, 1], [], []>} : vector<4x8xf32>, vector<8x144xf32>, vector<4x144xf32> -> vector<4x144xf32>
    %c2_151 = arith.constant 2 : index
    %c0_152 = arith.constant 0 : index
    %c0_153 = arith.constant 0 : index
    %135 = vector.load %arg13[%c2_151, %c0_152, %c0_153] : memref<5x18x4xf32, #tpu.memory_space<vmem>>, vector<1x18x4xf32>
    %136 = vector.shape_cast %135 : vector<1x18x4xf32> to vector<18x4xf32>
    %cst_154 = arith.constant dense<0.000000e+00> : vector<18x144xf32>
    %137 = tpu.matmul %136, %134, %cst_154 {dimension_numbers = #tpu.dot_dimension_numbers<[1], [0], [0], [1], [0, 0, 1, 1], [], []>} : vector<18x4xf32>, vector<4x144xf32>, vector<18x144xf32> -> vector<18x144xf32>
    %138 = arith.addf %131, %137 : vector<18x144xf32>
    %c3_155 = arith.constant 3 : index
    %c0_156 = arith.constant 0 : index
    %c0_157 = arith.constant 0 : index
    %139 = vector.load %arg14[%c3_155, %c0_156, %c0_157] : memref<5x8x144xf32, #tpu.memory_space<vmem>>, vector<1x8x144xf32>
    %140 = vector.shape_cast %139 : vector<1x8x144xf32> to vector<8x144xf32>
    %cst_158 = arith.constant dense<0.000000e+00> : vector<4x144xf32>
    %141 = tpu.matmul %100, %140, %cst_158 {dimension_numbers = #tpu.dot_dimension_numbers<[1], [0], [0], [1], [0, 0, 1, 1], [], []>} : vector<4x8xf32>, vector<8x144xf32>, vector<4x144xf32> -> vector<4x144xf32>
    %c3_159 = arith.constant 3 : index
    %c0_160 = arith.constant 0 : index
    %c0_161 = arith.constant 0 : index
    %142 = vector.load %arg13[%c3_159, %c0_160, %c0_161] : memref<5x18x4xf32, #tpu.memory_space<vmem>>, vector<1x18x4xf32>
    %143 = vector.shape_cast %142 : vector<1x18x4xf32> to vector<18x4xf32>
    %cst_162 = arith.constant dense<0.000000e+00> : vector<18x144xf32>
    %144 = tpu.matmul %143, %141, %cst_162 {dimension_numbers = #tpu.dot_dimension_numbers<[1], [0], [0], [1], [0, 0, 1, 1], [], []>} : vector<18x4xf32>, vector<4x144xf32>, vector<18x144xf32> -> vector<18x144xf32>
    %145 = arith.addf %138, %144 : vector<18x144xf32>
    %c4_163 = arith.constant 4 : index
    %c0_164 = arith.constant 0 : index
    %c0_165 = arith.constant 0 : index
    %146 = vector.load %arg14[%c4_163, %c0_164, %c0_165] : memref<5x8x144xf32, #tpu.memory_space<vmem>>, vector<1x8x144xf32>
    %147 = vector.shape_cast %146 : vector<1x8x144xf32> to vector<8x144xf32>
    %cst_166 = arith.constant dense<0.000000e+00> : vector<4x144xf32>
    %148 = tpu.matmul %100, %147, %cst_166 {dimension_numbers = #tpu.dot_dimension_numbers<[1], [0], [0], [1], [0, 0, 1, 1], [], []>} : vector<4x8xf32>, vector<8x144xf32>, vector<4x144xf32> -> vector<4x144xf32>
    %c4_167 = arith.constant 4 : index
    %c0_168 = arith.constant 0 : index
    %c0_169 = arith.constant 0 : index
    %149 = vector.load %arg13[%c4_167, %c0_168, %c0_169] : memref<5x18x4xf32, #tpu.memory_space<vmem>>, vector<1x18x4xf32>
    %150 = vector.shape_cast %149 : vector<1x18x4xf32> to vector<18x4xf32>
    %cst_170 = arith.constant dense<0.000000e+00> : vector<18x144xf32>
    %151 = tpu.matmul %150, %148, %cst_170 {dimension_numbers = #tpu.dot_dimension_numbers<[1], [0], [0], [1], [0, 0, 1, 1], [], []>} : vector<18x4xf32>, vector<4x144xf32>, vector<18x144xf32> -> vector<18x144xf32>
    %152 = arith.addf %145, %151 : vector<18x144xf32>
    %c0_171 = arith.constant 0 : index
    %c0_172 = arith.constant 0 : index
    %153 = vector.load %arg18[%c0_171, %c0_172] : memref<58x145xf32, #tpu.memory_space<vmem>>, vector<58x145xf32>
    %c0_173 = arith.constant 0 : index
    %c0_174 = arith.constant 0 : index
    %c0_175 = arith.constant 0 : index
    %154 = vector.load %arg17[%c0_173, %c0_174, %c0_175] : memref<5x144x145xf32, #tpu.memory_space<vmem>>, vector<1x144x145xf32>
    %155 = vector.shape_cast %154 : vector<1x144x145xf32> to vector<144x145xf32>
    %cst_176 = arith.constant dense<0.000000e+00> : vector<18x145xf32>
    %156 = tpu.matmul %152, %155, %cst_176 {dimension_numbers = #tpu.dot_dimension_numbers<[1], [0], [0], [1], [0, 0, 1, 1], [], []>} : vector<18x144xf32>, vector<144x145xf32>, vector<18x145xf32> -> vector<18x145xf32>
    %c0_177 = arith.constant 0 : index
    %c0_178 = arith.constant 0 : index
    %c0_179 = arith.constant 0 : index
    %157 = vector.load %arg16[%c0_177, %c0_178, %c0_179] : memref<5x58x18xf32, #tpu.memory_space<vmem>>, vector<1x58x18xf32>
    %158 = vector.shape_cast %157 : vector<1x58x18xf32> to vector<58x18xf32>
    %cst_180 = arith.constant dense<0.000000e+00> : vector<58x145xf32>
    %159 = tpu.matmul %158, %156, %cst_180 {dimension_numbers = #tpu.dot_dimension_numbers<[1], [0], [0], [1], [0, 0, 1, 1], [], []>} : vector<58x18xf32>, vector<18x145xf32>, vector<58x145xf32> -> vector<58x145xf32>
    %160 = arith.addf %153, %159 : vector<58x145xf32>
    %c1_181 = arith.constant 1 : index
    %c0_182 = arith.constant 0 : index
    %c0_183 = arith.constant 0 : index
    %161 = vector.load %arg17[%c1_181, %c0_182, %c0_183] : memref<5x144x145xf32, #tpu.memory_space<vmem>>, vector<1x144x145xf32>
    %162 = vector.shape_cast %161 : vector<1x144x145xf32> to vector<144x145xf32>
    %cst_184 = arith.constant dense<0.000000e+00> : vector<18x145xf32>
    %163 = tpu.matmul %152, %162, %cst_184 {dimension_numbers = #tpu.dot_dimension_numbers<[1], [0], [0], [1], [0, 0, 1, 1], [], []>} : vector<18x144xf32>, vector<144x145xf32>, vector<18x145xf32> -> vector<18x145xf32>
    %c1_185 = arith.constant 1 : index
    %c0_186 = arith.constant 0 : index
    %c0_187 = arith.constant 0 : index
    %164 = vector.load %arg16[%c1_185, %c0_186, %c0_187] : memref<5x58x18xf32, #tpu.memory_space<vmem>>, vector<1x58x18xf32>
    %165 = vector.shape_cast %164 : vector<1x58x18xf32> to vector<58x18xf32>
    %cst_188 = arith.constant dense<0.000000e+00> : vector<58x145xf32>
    %166 = tpu.matmul %165, %163, %cst_188 {dimension_numbers = #tpu.dot_dimension_numbers<[1], [0], [0], [1], [0, 0, 1, 1], [], []>} : vector<58x18xf32>, vector<18x145xf32>, vector<58x145xf32> -> vector<58x145xf32>
    %167 = arith.addf %160, %166 : vector<58x145xf32>
    %c2_189 = arith.constant 2 : index
    %c0_190 = arith.constant 0 : index
    %c0_191 = arith.constant 0 : index
    %168 = vector.load %arg17[%c2_189, %c0_190, %c0_191] : memref<5x144x145xf32, #tpu.memory_space<vmem>>, vector<1x144x145xf32>
    %169 = vector.shape_cast %168 : vector<1x144x145xf32> to vector<144x145xf32>
    %cst_192 = arith.constant dense<0.000000e+00> : vector<18x145xf32>
    %170 = tpu.matmul %152, %169, %cst_192 {dimension_numbers = #tpu.dot_dimension_numbers<[1], [0], [0], [1], [0, 0, 1, 1], [], []>} : vector<18x144xf32>, vector<144x145xf32>, vector<18x145xf32> -> vector<18x145xf32>
    %c2_193 = arith.constant 2 : index
    %c0_194 = arith.constant 0 : index
    %c0_195 = arith.constant 0 : index
    %171 = vector.load %arg16[%c2_193, %c0_194, %c0_195] : memref<5x58x18xf32, #tpu.memory_space<vmem>>, vector<1x58x18xf32>
    %172 = vector.shape_cast %171 : vector<1x58x18xf32> to vector<58x18xf32>
    %cst_196 = arith.constant dense<0.000000e+00> : vector<58x145xf32>
    %173 = tpu.matmul %172, %170, %cst_196 {dimension_numbers = #tpu.dot_dimension_numbers<[1], [0], [0], [1], [0, 0, 1, 1], [], []>} : vector<58x18xf32>, vector<18x145xf32>, vector<58x145xf32> -> vector<58x145xf32>
    %174 = arith.addf %167, %173 : vector<58x145xf32>
    %c3_197 = arith.constant 3 : index
    %c0_198 = arith.constant 0 : index
    %c0_199 = arith.constant 0 : index
    %175 = vector.load %arg17[%c3_197, %c0_198, %c0_199] : memref<5x144x145xf32, #tpu.memory_space<vmem>>, vector<1x144x145xf32>
    %176 = vector.shape_cast %175 : vector<1x144x145xf32> to vector<144x145xf32>
    %cst_200 = arith.constant dense<0.000000e+00> : vector<18x145xf32>
    %177 = tpu.matmul %152, %176, %cst_200 {dimension_numbers = #tpu.dot_dimension_numbers<[1], [0], [0], [1], [0, 0, 1, 1], [], []>} : vector<18x144xf32>, vector<144x145xf32>, vector<18x145xf32> -> vector<18x145xf32>
    %c3_201 = arith.constant 3 : index
    %c0_202 = arith.constant 0 : index
    %c0_203 = arith.constant 0 : index
    %178 = vector.load %arg16[%c3_201, %c0_202, %c0_203] : memref<5x58x18xf32, #tpu.memory_space<vmem>>, vector<1x58x18xf32>
    %179 = vector.shape_cast %178 : vector<1x58x18xf32> to vector<58x18xf32>
    %cst_204 = arith.constant dense<0.000000e+00> : vector<58x145xf32>
    %180 = tpu.matmul %179, %177, %cst_204 {dimension_numbers = #tpu.dot_dimension_numbers<[1], [0], [0], [1], [0, 0, 1, 1], [], []>} : vector<58x18xf32>, vector<18x145xf32>, vector<58x145xf32> -> vector<58x145xf32>
    %181 = arith.addf %174, %180 : vector<58x145xf32>
    %c4_205 = arith.constant 4 : index
    %c0_206 = arith.constant 0 : index
    %c0_207 = arith.constant 0 : index
    %182 = vector.load %arg17[%c4_205, %c0_206, %c0_207] : memref<5x144x145xf32, #tpu.memory_space<vmem>>, vector<1x144x145xf32>
    %183 = vector.shape_cast %182 : vector<1x144x145xf32> to vector<144x145xf32>
    %cst_208 = arith.constant dense<0.000000e+00> : vector<18x145xf32>
    %184 = tpu.matmul %152, %183, %cst_208 {dimension_numbers = #tpu.dot_dimension_numbers<[1], [0], [0], [1], [0, 0, 1, 1], [], []>} : vector<18x144xf32>, vector<144x145xf32>, vector<18x145xf32> -> vector<18x145xf32>
    %c4_209 = arith.constant 4 : index
    %c0_210 = arith.constant 0 : index
    %c0_211 = arith.constant 0 : index
    %185 = vector.load %arg16[%c4_209, %c0_210, %c0_211] : memref<5x58x18xf32, #tpu.memory_space<vmem>>, vector<1x58x18xf32>
    %186 = vector.shape_cast %185 : vector<1x58x18xf32> to vector<58x18xf32>
    %cst_212 = arith.constant dense<0.000000e+00> : vector<58x145xf32>
    %187 = tpu.matmul %186, %184, %cst_212 {dimension_numbers = #tpu.dot_dimension_numbers<[1], [0], [0], [1], [0, 0, 1, 1], [], []>} : vector<58x18xf32>, vector<18x145xf32>, vector<58x145xf32> -> vector<58x145xf32>
    %188 = arith.addf %181, %187 : vector<58x145xf32>
    %c0_213 = arith.constant 0 : index
    %c0_214 = arith.constant 0 : index
    %189 = vector.load %arg21[%c0_213, %c0_214] : memref<62x31xf32, #tpu.memory_space<vmem>>, vector<62x31xf32>
    %c0_215 = arith.constant 0 : index
    %c0_216 = arith.constant 0 : index
    %c0_217 = arith.constant 0 : index
    %190 = vector.load %arg20[%c0_215, %c0_216, %c0_217] : memref<3x145x31xf32, #tpu.memory_space<vmem>>, vector<1x145x31xf32>
    %191 = vector.shape_cast %190 : vector<1x145x31xf32> to vector<145x31xf32>
    %cst_218 = arith.constant dense<0.000000e+00> : vector<58x31xf32>
    %192 = tpu.matmul %188, %191, %cst_218 {dimension_numbers = #tpu.dot_dimension_numbers<[1], [0], [0], [1], [0, 0, 1, 1], [], []>} : vector<58x145xf32>, vector<145x31xf32>, vector<58x31xf32> -> vector<58x31xf32>
    %c0_219 = arith.constant 0 : index
    %c0_220 = arith.constant 0 : index
    %c0_221 = arith.constant 0 : index
    %193 = vector.load %arg19[%c0_219, %c0_220, %c0_221] : memref<3x62x58xf32, #tpu.memory_space<vmem>>, vector<1x62x58xf32>
    %194 = vector.shape_cast %193 : vector<1x62x58xf32> to vector<62x58xf32>
    %cst_222 = arith.constant dense<0.000000e+00> : vector<62x31xf32>
    %195 = tpu.matmul %194, %192, %cst_222 {dimension_numbers = #tpu.dot_dimension_numbers<[1], [0], [0], [1], [0, 0, 1, 1], [], []>} : vector<62x58xf32>, vector<58x31xf32>, vector<62x31xf32> -> vector<62x31xf32>
    %196 = arith.addf %189, %195 : vector<62x31xf32>
    %c1_223 = arith.constant 1 : index
    %c0_224 = arith.constant 0 : index
    %c0_225 = arith.constant 0 : index
    %197 = vector.load %arg20[%c1_223, %c0_224, %c0_225] : memref<3x145x31xf32, #tpu.memory_space<vmem>>, vector<1x145x31xf32>
    %198 = vector.shape_cast %197 : vector<1x145x31xf32> to vector<145x31xf32>
    %cst_226 = arith.constant dense<0.000000e+00> : vector<58x31xf32>
    %199 = tpu.matmul %188, %198, %cst_226 {dimension_numbers = #tpu.dot_dimension_numbers<[1], [0], [0], [1], [0, 0, 1, 1], [], []>} : vector<58x145xf32>, vector<145x31xf32>, vector<58x31xf32> -> vector<58x31xf32>
    %c1_227 = arith.constant 1 : index
    %c0_228 = arith.constant 0 : index
    %c0_229 = arith.constant 0 : index
    %200 = vector.load %arg19[%c1_227, %c0_228, %c0_229] : memref<3x62x58xf32, #tpu.memory_space<vmem>>, vector<1x62x58xf32>
    %201 = vector.shape_cast %200 : vector<1x62x58xf32> to vector<62x58xf32>
    %cst_230 = arith.constant dense<0.000000e+00> : vector<62x31xf32>
    %202 = tpu.matmul %201, %199, %cst_230 {dimension_numbers = #tpu.dot_dimension_numbers<[1], [0], [0], [1], [0, 0, 1, 1], [], []>} : vector<62x58xf32>, vector<58x31xf32>, vector<62x31xf32> -> vector<62x31xf32>
    %203 = arith.addf %196, %202 : vector<62x31xf32>
    %c2_231 = arith.constant 2 : index
    %c0_232 = arith.constant 0 : index
    %c0_233 = arith.constant 0 : index
    %204 = vector.load %arg20[%c2_231, %c0_232, %c0_233] : memref<3x145x31xf32, #tpu.memory_space<vmem>>, vector<1x145x31xf32>
    %205 = vector.shape_cast %204 : vector<1x145x31xf32> to vector<145x31xf32>
    %cst_234 = arith.constant dense<0.000000e+00> : vector<58x31xf32>
    %206 = tpu.matmul %188, %205, %cst_234 {dimension_numbers = #tpu.dot_dimension_numbers<[1], [0], [0], [1], [0, 0, 1, 1], [], []>} : vector<58x145xf32>, vector<145x31xf32>, vector<58x31xf32> -> vector<58x31xf32>
    %c2_235 = arith.constant 2 : index
    %c0_236 = arith.constant 0 : index
    %c0_237 = arith.constant 0 : index
    %207 = vector.load %arg19[%c2_235, %c0_236, %c0_237] : memref<3x62x58xf32, #tpu.memory_space<vmem>>, vector<1x62x58xf32>
    %208 = vector.shape_cast %207 : vector<1x62x58xf32> to vector<62x58xf32>
    %cst_238 = arith.constant dense<0.000000e+00> : vector<62x31xf32>
    %209 = tpu.matmul %208, %206, %cst_238 {dimension_numbers = #tpu.dot_dimension_numbers<[1], [0], [0], [1], [0, 0, 1, 1], [], []>} : vector<62x58xf32>, vector<58x31xf32>, vector<62x31xf32> -> vector<62x31xf32>
    %210 = arith.addf %203, %209 : vector<62x31xf32>
    %c0_239 = arith.constant 0 : index
    %c0_240 = arith.constant 0 : index
    %211 = vector.load %arg24[%c0_239, %c0_240] : memref<64x32xf32, #tpu.memory_space<vmem>>, vector<64x32xf32>
    %c0_241 = arith.constant 0 : index
    %c0_242 = arith.constant 0 : index
    %c0_243 = arith.constant 0 : index
    %212 = vector.load %arg22[%c0_241, %c0_242, %c0_243] : memref<2x64x62xf32, #tpu.memory_space<vmem>>, vector<1x64x62xf32>
    %213 = vector.shape_cast %212 : vector<1x64x62xf32> to vector<64x62xf32>
    %cst_244 = arith.constant dense<0.000000e+00> : vector<64x31xf32>
    %214 = tpu.matmul %213, %210, %cst_244 {dimension_numbers = #tpu.dot_dimension_numbers<[1], [0], [0], [1], [0, 0, 1, 1], [], []>} : vector<64x62xf32>, vector<62x31xf32>, vector<64x31xf32> -> vector<64x31xf32>
    %c0_245 = arith.constant 0 : index
    %c0_246 = arith.constant 0 : index
    %c0_247 = arith.constant 0 : index
    %215 = vector.load %arg23[%c0_245, %c0_246, %c0_247] : memref<2x31x32xf32, #tpu.memory_space<vmem>>, vector<1x31x32xf32>
    %216 = vector.shape_cast %215 : vector<1x31x32xf32> to vector<31x32xf32>
    %cst_248 = arith.constant dense<0.000000e+00> : vector<64x32xf32>
    %217 = tpu.matmul %214, %216, %cst_248 {dimension_numbers = #tpu.dot_dimension_numbers<[1], [0], [0], [1], [0, 0, 1, 1], [], []>} : vector<64x31xf32>, vector<31x32xf32>, vector<64x32xf32> -> vector<64x32xf32>
    %218 = arith.addf %211, %217 : vector<64x32xf32>
    %c1_249 = arith.constant 1 : index
    %c0_250 = arith.constant 0 : index
    %c0_251 = arith.constant 0 : index
    %219 = vector.load %arg22[%c1_249, %c0_250, %c0_251] : memref<2x64x62xf32, #tpu.memory_space<vmem>>, vector<1x64x62xf32>
    %220 = vector.shape_cast %219 : vector<1x64x62xf32> to vector<64x62xf32>
    %cst_252 = arith.constant dense<0.000000e+00> : vector<64x31xf32>
    %221 = tpu.matmul %220, %210, %cst_252 {dimension_numbers = #tpu.dot_dimension_numbers<[1], [0], [0], [1], [0, 0, 1, 1], [], []>} : vector<64x62xf32>, vector<62x31xf32>, vector<64x31xf32> -> vector<64x31xf32>
    %c1_253 = arith.constant 1 : index
    %c0_254 = arith.constant 0 : index
    %c0_255 = arith.constant 0 : index
    %222 = vector.load %arg23[%c1_253, %c0_254, %c0_255] : memref<2x31x32xf32, #tpu.memory_space<vmem>>, vector<1x31x32xf32>
    %223 = vector.shape_cast %222 : vector<1x31x32xf32> to vector<31x32xf32>
    %cst_256 = arith.constant dense<0.000000e+00> : vector<64x32xf32>
    %224 = tpu.matmul %221, %223, %cst_256 {dimension_numbers = #tpu.dot_dimension_numbers<[1], [0], [0], [1], [0, 0, 1, 1], [], []>} : vector<64x31xf32>, vector<31x32xf32>, vector<64x32xf32> -> vector<64x32xf32>
    %225 = arith.addf %218, %224 : vector<64x32xf32>
    %226 = arith.negf %225 : vector<64x32xf32>
    %227 = math.exp %226 : vector<64x32xf32>
    %cst_257 = arith.constant 1.000000e+00 : f32
    %228 = vector.broadcast %cst_257 : f32 to vector<64x32xf32>
    %229 = arith.addf %228, %227 : vector<64x32xf32>
    %230 = arith.divf %228, %229 : vector<64x32xf32>
    %c0_258 = arith.constant 0 : index
    %c0_259 = arith.constant 0 : index
    %231 = vector.load %arg25[%c0_258, %c0_259] : memref<64x32xf32, #tpu.memory_space<vmem>>, vector<64x32xf32>
    tpu.vector_store %arg25[%c0_258, %c0_259], %230 {strides = array<i32>} : memref<64x32xf32, #tpu.memory_space<vmem>>, vector<64x32xf32>,
    return
  }
}

</mosaic_0001>

<bundles_post_ra>
// kernel: net_forward.1
= control target key start
LH: loop header
LB: loop body
LE: loop exit
PB: predicated region body
PF: predicated region fallthrough
CT: control target
= control target key end

     0   :  { %s12140_s0 = inlined_call_operand.vmem [shape: f32[50,25], index: 0, kind: input, shape index: {}]   ;;  %s12141_s1 = inlined_call_operand.vmem [shape: f32[3,46,50], index: 1, kind: input, shape index: {}]   ;;  %s12142_s2 = inlined_call_operand.vmem [shape: f32[3,25,115], index: 2, kind: input, shape index: {}]   ;;  %s12143_s3 = inlined_call_operand.vmem [shape: f32[46,115], index: 3, kind: input, shape index: {}]   ;;  %s12144_s4 = inlined_call_operand.vmem [shape: f32[5,20,46], index: 4, kind: input, shape index: {}]   ;;  %s12145_s5 = inlined_call_operand.vmem [shape: f32[5,115,160], index: 5, kind: input, shape index: {}]   ;;  %s12146_s6 = inlined_call_operand.vmem [shape: f32[20,160], index: 6, kind: input, shape index: {}]   ;;  %s12147_s7 = inlined_call_operand.vmem [shape: f32[5,4,20], index: 7, kind: input, shape index: {}]   ;;  %s12148_s8 = inlined_call_operand.vmem [shape: f32[5,160,8], index: 8, kind: input, shape index: {}]   ;;  %s12149_s9 = inlined_call_operand.vmem [shape: f32[4,8], index: 9, kind: input, shape index: {}]   ;;  %s12150_s10 = inlined_call_operand.vmem [shape: f32[2,2,4], index: 10, kind: input, shape index: {}]   ;;  %s12151_s11 = inlined_call_operand.vmem [shape: f32[2,8,16], index: 11, kind: input, shape index: {}]   ;;  %s12152_s12 = inlined_call_operand.vmem [shape: f32[2,16], index: 12, kind: input, shape index: {}]   ;;  %s12153_s13 = inlined_call_operand.vmem [shape: f32[5,18,4], index: 13, kind: input, shape index: {}]   ;;  %s12154_s14 = inlined_call_operand.vmem [shape: f32[5,8,144], index: 14, kind: input, shape index: {}]   ;;  %s12155_s15 = inlined_call_operand.vmem [shape: f32[18,144], index: 15, kind: input, shape index: {}]   ;;  %s12156_s16 = inlined_call_operand.vmem [shape: f32[5,58,18], index: 16, kind: input, shape index: {}]   ;;  %s12157_s17 = inlined_call_operand.vmem [shape: f32[5,144,145], index: 17, kind: input, shape index: {}]   ;;  %s12158_s18 = inlined_call_operand.vmem [shape: f32[58,145], index: 18, kind: input, shape index: {}]   ;;  %s12159_s19 = inlined_call_operand.vmem [shape: f32[3,62,58], index: 19, kind: input, shape index: {}]   ;;  %s12160_s20 = inlined_call_operand.vmem [shape: f32[3,145,31], index: 20, kind: input, shape index: {}]   ;;  %s12161_s21 = inlined_call_operand.vmem [shape: f32[62,31], index: 21, kind: input, shape index: {}]   ;;  %s12162_s22 = inlined_call_operand.vmem [shape: f32[2,64,62], index: 22, kind: input, shape index: {}]   ;;  %s12163_s23 = inlined_call_operand.vmem [shape: f32[2,31,32], index: 23, kind: input, shape index: {}]   ;;  %s12164_s24 = inlined_call_operand.vmem [shape: f32[64,32], index: 24, kind: input, shape index: {}]   ;;  %s12165_s25 = inlined_call_operand.hbm [shape: f32[64,32], index: 25, kind: output, shape index: {0}]   ;;  %s12166_s26 = inlined_call_operand.hbm [shape: f32[2,16], index: 26, kind: output, shape index: {1}]  }
   0x1   :  { %12177 = sst [smem:[#allocation8_spill]] %s12140_s0 }
   0x2   :  { %12178 = sst [smem:[#allocation9_spill]] %s12141_s1 }
   0x3   :  { %12179 = sst [smem:[#allocation10_spill]] %s12142_s2 }
   0x4   :  { %12180 = sst [smem:[#allocation11_spill]] %s12143_s3 }
   0x5   :  { %12181 = sst [smem:[#allocation12_spill]] %s12144_s4 }
   0x6   :  { %12182 = sst [smem:[#allocation13_spill]] %s12145_s5 }
   0x7   :  { %12183 = sst [smem:[#allocation14_spill]] %s12146_s6 }
   0x8   :  { %12184 = sst [smem:[#allocation15_spill]] %s12147_s7 }
   0x9   :  { %12185 = sst [smem:[#allocation16_spill]] %s12148_s8 }
   0xa   :  { %12186 = sst [smem:[#allocation17_spill]] %s12149_s9 }
   0xb   :  { %12187 = sst [smem:[#allocation18_spill]] %s12150_s10 }
   0xc   :  { %32 = vsyncpa [#allocation3], 0  ;;  %s12188_s7 = sld [smem:[#allocation8_spill]]  ;;  %vm122_vm0 = vcmask 1041408   ;;  %vm103_vm1 = vcmask 408576   ;;  %vm244_vm2 = vcmask 1040384  }
   0xd   :  { %s12189_s30 = sld [smem:[#allocation9_spill]] }
   0xe   :  { %s12190_s1 = sld [smem:[#allocation10_spill]] }
  0x12   :  { %v8769_v0 = vld [vmem:[%s12188_s7 + $0x30] sm:$0x3]  ;;  %v8774_v1 = vld [vmem:[%s12188_s7 + $0x28] sm:$0xff]  ;;  %v8783_v2 = vld [vmem:[%s12188_s7 + $0x20] sm:$0xff] }
  0x13   :  { %8118 = vmatprep.subr.msk.mxu0 %vm122_vm0, %v8769_v0  ;;  %v97_v3 = vld [vmem:[%s12189_s30] sm:$0xff]  ;;  %v8794_v4 = vld [vmem:[%s12188_s7 + $0x18] sm:$0xff] }
  0x14   :  { %8119 = vmatpush3.msk.msra.mxu0 %vm122_vm0, %v8769_v0  ;;  %8132 = vmatprep.mubr.msk.f32.mxu0 %vm103_vm1, %v97_v3  ;;  %v224_v5 = vld [vmem:[%s12190_s1 + $0x18] sm:$0x1]  ;;  %v223_v6 = vld [vmem:[%s12190_s1 + $0x10] sm:$0xff] }
  0x15   :  { %8120 = vmatprep.subr.mxu0 %v8774_v1  ;;  %8141 = vmatprep.subr.msk.mxu1 %vm244_vm2, %v224_v5 }
  0x16   :  { %8121 = vmatpush3.msra.mxu0 %v8774_v1 }
  0x17   :  { %8122 = vmatprep.subr.mxu0 %v8783_v2 }
  0x18   :  { %33 = vsyncpa [#allocation5], 0  ;;  %8123 = vmatpush3.msra.mxu0 %v8783_v2  ;;  %v8808_v7 = vld [vmem:[%s12188_s7 + $0x10] sm:$0xff]  ;;  %8142 = vmatpush3.msk.msra.mxu1 %vm244_vm2, %v224_v5  ;;  %v222_v8 = vld [vmem:[%s12190_s1 + $0x8] sm:$0xff]  ;;  %vm225_vm3 = vcmask 203776   ;;  %v8625_v61 = vmov 0.0  }
  0x19   :  { %8124 = vmatprep.subr.mxu0 %v8794_v4  ;;  %8143 = vmatprep.subr.mxu1 %v223_v6  ;;  %v8819_v9 = vld [vmem:[%s12188_s7 + $0x8] sm:$0xff]  ;;  %v8826_v10 = vld [vmem:[%s12188_s7] sm:$0xff]  ;;  %v99_v12 = vld [vmem:[%s12189_s30 + $0x10] sm:$0xff]  ;;  %vm8626_vm4 = vmmov 0   ;;  %s12191_s10 = sld [smem:[#allocation13_spill]]  ;;  %vm992_vm5 = vcmask 1042432  }
  0x1a   :  { %8125 = vmatpush3.msra.mxu0 %v8794_v4  ;;  %8144 = vmatpush3.msra.mxu1 %v223_v6  ;;  %v98_v11 = vld [vmem:[%s12189_s30 + $0x8] sm:$0xff]  ;;  %v100_v13 = vld [vmem:[%s12189_s30 + $0x18] sm:$0xff]  ;;  %v101_v14 = vld [vmem:[%s12189_s30 + $0x20] sm:$0xff]  ;;  %s12192_s7 = sld [smem:[#allocation11_spill]]  ;;  %vm868_vm6 = vcmask 1045504   ;;  %vm858_vm7 = vcmask 375808  }
  0x1b   :  { %8126 = vmatprep.subr.mxu0 %v8808_v7  ;;  %8145 = vmatprep.subr.mxu1 %v222_v8  ;;  %v102_v15 = vld [vmem:[%s12189_s30 + $0x28] sm:$0x3f]  ;;  %v221_v16 = vld [vmem:[%s12190_s1] sm:$0xff]  ;;  %v7100_v23 = vld [vmem:[%s12189_s30 + $0x30] sm:$0xff]  ;;  %s12193_s3 = sld [smem:[#allocation12_spill]]  ;;  %vm982_vm8 = vcmask 941056  }
  0x1c   :  { %8127 = vmatpush3.msra.mxu0 %v8808_v7  ;;  %8146 = vmatpush3.msra.mxu1 %v222_v8  ;;  %v7101_v24 = vld [vmem:[%s12189_s30 + $0x38] sm:$0xff]  ;;  %v7102_v25 = vld [vmem:[%s12189_s30 + $0x40] sm:$0xff]  ;;  %v7103_v26 = vld [vmem:[%s12189_s30 + $0x48] sm:$0xff]  ;;  %s12194_s5 = sld [smem:[#allocation14_spill]]  ;;  %vm2012_vm9 = vcmask 1043456   ;;  %vm2008_vm10 = vcmask 162816  }
  0x1d   :  { %8128 = vmatprep.subr.mxu0 %v8819_v9  ;;  %8147 = vmatprep.subr.mxu1 %v221_v16  ;;  %v7104_v27 = vld [vmem:[%s12189_s30 + $0x50] sm:$0xff]  ;;  %v7105_v28 = vld [vmem:[%s12189_s30 + $0x58] sm:$0x3f]  ;;  %v7124_v29 = vld [vmem:[%s12189_s30 + $0x60] sm:$0xff]  ;;  %s12195_s0 = sld [smem:[#allocation16_spill]]  ;;  %vm2110_vm11 = vcmask 261120  }
  0x1e   :  { %8129 = vmatpush3.msra.mxu0 %v8819_v9  ;;  %8148 = vmatpush3.msra.mxu1 %v221_v16  ;;  %v7125_v30 = vld [vmem:[%s12189_s30 + $0x68] sm:$0xff]  ;;  %v7126_v31 = vld [vmem:[%s12189_s30 + $0x70] sm:$0xff]  ;;  %v7127_v32 = vld [vmem:[%s12189_s30 + $0x78] sm:$0xff]  ;;  %s12198_s28 = sld [smem:[#allocation18_spill]]  ;;  %vm2872_vm12 = vcmask 31744   ;;  %vm2950_vm13 = vcmask 64512  }
  0x1f   :  { %8130 = vmatprep.subr.mxu0 %v8826_v10  ;;  %8158 = vmatprep.subr.msk.mxu1 %vm122_vm0, %v8769_v0  ;;  %v7128_v33 = vld [vmem:[%s12189_s30 + $0x80] sm:$0xff]  ;;  %v7129_v34 = vld [vmem:[%s12189_s30 + $0x88] sm:$0x3f]  ;;  %v7116_v35 = vld [vmem:[%s12190_s1 + $0x38] sm:$0x1]  ;;  %s12196_s30 = sld [smem:[#allocation15_spill]] }
  0x20   :  { %8131 = vmatpush3.msra.mxu0 %v8826_v10  ;;  %v7115_v36 = vld [vmem:[%s12190_s1 + $0x30] sm:$0xff]  ;;  %v7114_v37 = vld [vmem:[%s12190_s1 + $0x28] sm:$0xff]  ;;  %v7113_v38 = vld [vmem:[%s12190_s1 + $0x20] sm:$0xff]  ;;  %vm3176_vm14 = vcmask 123904   ;;  %vm4146_vm15 = vcmask 130048  }
  0x21   :  { %8133 = vmatmul.mubr.msk.f32.vlgmr.msra.gmra.mxu0 %vm103_vm1, %v98_v11  ;;  %8181 = vmatprep.subr.msk.mxu0 %vm244_vm2, %v7116_v35  ;;  %v7140_v39 = vld [vmem:[%s12190_s1 + $0x58] sm:$0x1]  ;;  %v7139_v48 = vld [vmem:[%s12190_s1 + $0x50] sm:$0xff]  ;;  %v7138_v50 = vld [vmem:[%s12190_s1 + $0x48] sm:$0xff] }
  0x22   :  { %8135 = vmatprep.mubr.msk.f32.mxu0 %vm103_vm1, %v99_v12  ;;  %8182 = vmatpush3.msk.msra.mxu0 %vm244_vm2, %v7116_v35  ;;  %v7137_v52 = vld [vmem:[%s12190_s1 + $0x40] sm:$0xff]  ;;  %v981_v62 = vld [vmem:[%s12191_s10 + $0xe8] sm:$0x7]  ;;  %v974_v5 = vld [vmem:[%s12191_s10 + $0xb0] sm:$0xff] }
  0x23   :  { %8183 = vmatprep.subr.mxu0 %v7115_v36  ;;  %v980_v63 = vld [vmem:[%s12191_s10 + $0xe0] sm:$0x7]  ;;  %v973_v6 = vld [vmem:[%s12191_s10 + $0xa8] sm:$0xff]  ;;  %v971_v8 = vld [vmem:[%s12191_s10 + $0x98] sm:$0xff] }
  0x24   :  { %8184 = vmatpush3.msra.mxu0 %v7115_v36  ;;  %v976_v3 = vld [vmem:[%s12191_s10 + $0xc0] sm:$0xff]  ;;  %v967_v12 = vld [vmem:[%s12191_s10 + $0x78] sm:$0xff]  ;;  %v96_v35 = vld [vmem:[%s12192_s7 + $0x28] sm:$0x3f] }
  0x25   :  { %8136 = vmatmul.mubr.msk.f32.gmra.mxu0 %vm103_vm1, %v100_v13  ;;  %8185 = vmatprep.subr.mxu0 %v7114_v37  ;;  %v968_v11 = vld [vmem:[%s12191_s10 + $0x80] sm:$0xff]  ;;  %v966_v13 = vld [vmem:[%s12191_s10 + $0x70] sm:$0xff]  ;;  %v963_v16 = vld [vmem:[%s12191_s10 + $0x58] sm:$0xff] }
  0x26   :  { %8138 = vmatprep.mubr.msk.f32.mxu0 %vm103_vm1, %v101_v14  ;;  %8186 = vmatpush3.msra.mxu0 %v7114_v37  ;;  %v965_v14 = vld [vmem:[%s12191_s10 + $0x68] sm:$0xff]  ;;  %v94_v37 = vld [vmem:[%s12192_s7 + $0x18] sm:$0xff] }
  0x27   :  { %8187 = vmatprep.subr.mxu0 %v7113_v38 }
  0x28   :  { %8188 = vmatpush3.msra.mxu0 %v7113_v38  ;;  %v95_v38 = vld [vmem:[%s12192_s7 + $0x20] sm:$0xff] }
  0x29   :  { %8139 = vmatmul.mubr.msk.f32.gmra.mxu0 %vm103_vm1, %v102_v15  ;;  %8221 = vmatprep.subr.msk.mxu0 %vm244_vm2, %v7140_v39  ;;  %v964_v15 = vld [vmem:[%s12191_s10 + $0x60] sm:$0xff] }
  0xe1   :  { %v8134_v17 = vpop.f32.mrf.mxu0 }
  0xe3   :  { %v192_v18 = vpop.f32.mrf.mxu0 }
  0xe4   :  { %8149 = vmatprep.mubr.msk.f32.mxu1 %vm225_vm3, %v192_v18  ;;  %v961_v18 = vld [vmem:[%s12191_s10 + $0x48] sm:$0xff] }
  0xe5   :  { %v8137_v19 = vpop.f32.mrf.mxu0  ;;  %8150 = vmatmul.mubr.msk.f32.vlgmr.msra.gmra.mxu1 %vm225_vm3, %v8134_v17  ;;  %v962_v17 = vld [vmem:[%s12191_s10 + $0x50] sm:$0xff] }
  0xe6   :  { %8159 = vmatpush3.msk.msra.mxu1 %vm122_vm0, %v8769_v0 }
  0xe7   :  { %8160 = vmatprep.subr.mxu1 %v8774_v1  ;;  %v202_v20 = vpop.f32.mrf.mxu0 }
  0xe8   :  { %8161 = vmatpush3.msra.mxu1 %v8774_v1  ;;  %8152 = vmatprep.mubr.msk.f32.mxu1 %vm225_vm3, %v202_v20  ;;  %v959_v20 = vld [vmem:[%s12191_s10 + $0x38] sm:$0xff] }
  0xe9   :  { %8162 = vmatprep.subr.mxu1 %v8783_v2  ;;  %v8140_v21 = vpop.f32.mrf.mxu0  ;;  %8153 = vmatmul.mubr.msk.f32.gmra.mxu1 %vm225_vm3, %v8137_v19  ;;  %v960_v19 = vld [vmem:[%s12191_s10 + $0x40] sm:$0xff] }
  0xea   :  { %8163 = vmatpush3.msra.mxu1 %v8783_v2 }
  0xeb   :  { %8164 = vmatprep.subr.mxu1 %v8794_v4  ;;  %v212_v22 = vpop.f32.mrf.mxu0 }
  0xec   :  { %8165 = vmatpush3.msra.mxu1 %v8794_v4  ;;  %8155 = vmatprep.mubr.msk.f32.mxu1 %vm225_vm3, %v212_v22  ;;  %v957_v22 = vld [vmem:[%s12191_s10 + $0x28] sm:$0xff] }
  0xed   :  { %8166 = vmatprep.subr.mxu1 %v8808_v7  ;;  %8156 = vmatmul.mubr.msk.f32.gmra.mxu1 %vm225_vm3, %v8140_v21  ;;  %v958_v21 = vld [vmem:[%s12191_s10 + $0x30] sm:$0xff] }
  0xee   :  { %8167 = vmatpush3.msra.mxu1 %v8808_v7  ;;  %8172 = vmatprep.mubr.msk.f32.mxu1 %vm103_vm1, %v7100_v23  ;;  %v956_v23 = vld [vmem:[%s12191_s10 + $0x20] sm:$0xff] }
  0xef   :  { %8168 = vmatprep.subr.mxu1 %v8819_v9 }
  0xf0   :  { %8169 = vmatpush3.msra.mxu1 %v8819_v9 }
  0xf1   :  { %8170 = vmatprep.subr.mxu1 %v8826_v10 }
  0xf2   :  { %8171 = vmatpush3.msra.mxu1 %v8826_v10 }
  0xf3   :  { %8173 = vmatmul.mubr.msk.f32.vlgmr.msra.gmra.mxu1 %vm103_vm1, %v7101_v24  ;;  %8198 = vmatprep.subr.msk.mxu1 %vm122_vm0, %v8769_v0  ;;  %v955_v24 = vld [vmem:[%s12191_s10 + $0x18] sm:$0xff] }
  0xf4   :  { %8199 = vmatpush3.msk.msra.mxu1 %vm122_vm0, %v8769_v0  ;;  %8175 = vmatprep.mubr.msk.f32.mxu1 %vm103_vm1, %v7102_v25  ;;  %v979_v0 = vld [vmem:[%s12191_s10 + $0xd8] sm:$0xff]  ;;  %v954_v25 = vld [vmem:[%s12191_s10 + $0x10] sm:$0xff] }
  0xf5   :  { %8200 = vmatprep.subr.mxu1 %v8774_v1 }
  0xf6   :  { %8201 = vmatpush3.msra.mxu1 %v8774_v1  ;;  %v978_v1 = vld [vmem:[%s12191_s10 + $0xd0] sm:$0xff] }
  0xf7   :  { %8176 = vmatmul.mubr.msk.f32.gmra.mxu1 %vm103_vm1, %v7103_v26  ;;  %8202 = vmatprep.subr.mxu1 %v8783_v2  ;;  %v953_v26 = vld [vmem:[%s12191_s10 + $0x8] sm:$0xff] }
  0xf8   :  { %8203 = vmatpush3.msra.mxu1 %v8783_v2  ;;  %8178 = vmatprep.mubr.msk.f32.mxu1 %vm103_vm1, %v7104_v27  ;;  %v977_v2 = vld [vmem:[%s12191_s10 + $0xc8] sm:$0xff]  ;;  %v952_v27 = vld [vmem:[%s12191_s10] sm:$0xff] }
  0xf9   :  { %8204 = vmatprep.subr.mxu1 %v8794_v4 }
  0xfa   :  { %8205 = vmatpush3.msra.mxu1 %v8794_v4  ;;  %v975_v4 = vld [vmem:[%s12191_s10 + $0xb8] sm:$0xff] }
  0xfb   :  { %8179 = vmatmul.mubr.msk.f32.gmra.mxu1 %vm103_vm1, %v7105_v28  ;;  %8206 = vmatprep.subr.mxu1 %v8808_v7 }
  0xfc   :  { %8207 = vmatpush3.msra.mxu1 %v8808_v7  ;;  %8212 = vmatprep.mubr.msk.f32.mxu1 %vm103_vm1, %v7124_v29  ;;  %v972_v7 = vld [vmem:[%s12191_s10 + $0xa0] sm:$0xff] }
  0xfd   :  { %8208 = vmatprep.subr.mxu1 %v8819_v9 }
  0xfe   :  { %8209 = vmatpush3.msra.mxu1 %v8819_v9  ;;  %v970_v9 = vld [vmem:[%s12191_s10 + $0x90] sm:$0xff] }
  0xff   :  { %8210 = vmatprep.subr.mxu1 %v8826_v10 }
 0x100   :  { %8211 = vmatpush3.msra.mxu1 %v8826_v10  ;;  %v969_v10 = vld [vmem:[%s12191_s10 + $0x88] sm:$0xff] }
 0x101   :  { %8213 = vmatmul.mubr.msk.f32.vlgmr.msra.gmra.mxu1 %vm103_vm1, %v7125_v30  ;;  %8238 = vmatprep.subr.mxu1 %v8625_v61 }
 0x102   :  { %8215 = vmatprep.mubr.msk.f32.mxu1 %vm103_vm1, %v7126_v31 }
 0x105   :  { %8216 = vmatmul.mubr.msk.f32.gmra.mxu1 %vm103_vm1, %v7127_v32 }
 0x106   :  { %8218 = vmatprep.mubr.msk.f32.mxu1 %vm103_vm1, %v7128_v33 }
 0x109   :  { %8219 = vmatmul.mubr.msk.f32.gmra.mxu1 %vm103_vm1, %v7129_v34  ;;  %vm4247_vm1 = vcmask 146432  }
 0x10a   :  { %8250 = vmatprep.mubr.msk.f32.mxu1 %vm8626_vm4, %v8625_v61 }
 0x1a5   :  { %v8959_v40 = vpop.f32.mrf.mxu1 }
 0x1a7   :  { %v8961_v41 = vpop.f32.mrf.mxu1 }
 0x1a9   :  { %v8963_v42 = vpop.f32.mrf.mxu1 }
 0x1ab   :  { %v8965_v43 = vpop.f32.mrf.mxu1 }
 0x1ad   :  { %v8967_v44 = vpop.f32.mrf.mxu1 }
 0x1af   :  { %v8969_v45 = vpop.f32.mrf.mxu1 }
 0x1b3   :  { %v8174_v46 = vpop.f32.mrf.mxu1 }
 0x1b5   :  { %v440_v47 = vpop.f32.mrf.mxu1 }
 0x1b6   :  { %8189 = vmatprep.mubr.msk.f32.mxu0 %vm225_vm3, %v440_v47  ;;  %v93_v47 = vld [vmem:[%s12192_s7 + $0x10] sm:$0xff] }
 0x1b7   :  { %v8177_v49 = vpop.f32.mrf.mxu1  ;;  %8190 = vmatmul.mubr.msk.f32.vlgmr.msra.gmra.mxu0 %vm225_vm3, %v8174_v46  ;;  %v348_v46 = vadd.f32 %v8967_v44, %v96_v35  ;;  %v7171_v35 = vld [vmem:[%s12191_s10 + $0x128] sm:$0xff] }
 0x1b8   :  { %8222 = vmatpush3.msk.msra.mxu0 %vm244_vm2, %v7140_v39 }
 0x1b9   :  { %v450_v51 = vpop.f32.mrf.mxu1  ;;  %8223 = vmatprep.subr.mxu0 %v7139_v48 }
 0x1ba   :  { %8192 = vmatprep.mubr.msk.f32.mxu0 %vm225_vm3, %v450_v51  ;;  %8224 = vmatpush3.msra.mxu0 %v7139_v48  ;;  %v347_v51 = vadd.f32 %v8969_v45, %v95_v38  ;;  %v7168_v38 = vld [vmem:[%s12191_s10 + $0x110] sm:$0xff] }
 0x1bb   :  { %v8180_v53 = vpop.f32.mrf.mxu1  ;;  %8193 = vmatmul.mubr.msk.f32.gmra.mxu0 %vm225_vm3, %v8177_v49  ;;  %8225 = vmatprep.subr.mxu0 %v7138_v50  ;;  %v92_v49 = vld [vmem:[%s12192_s7 + $0x8] sm:$0xff] }
 0x1bc   :  { %8226 = vmatpush3.msra.mxu0 %v7138_v50  ;;  %v346_v50 = vadd.f32 %v8963_v42, %v94_v37  ;;  %v7169_v37 = vld [vmem:[%s12191_s10 + $0x118] sm:$0xff] }
 0x1bd   :  { %v460_v54 = vpop.f32.mrf.mxu1  ;;  %8227 = vmatprep.subr.mxu0 %v7137_v52 }
 0x1be   :  { %8195 = vmatprep.mubr.msk.f32.mxu0 %vm225_vm3, %v460_v54  ;;  %8228 = vmatpush3.msra.mxu0 %v7137_v52  ;;  %v345_v54 = vadd.f32 %v8965_v43, %v93_v47  ;;  %v7165_v47 = vld [vmem:[%s12191_s10 + $0xf8] sm:$0xff] }
 0x1bf   :  { %8196 = vmatmul.mubr.msk.f32.gmra.mxu0 %vm225_vm3, %v8180_v53  ;;  %7152 = vmatprep.subr.msk.mxu0 %vm992_vm5, %v981_v62 }
 0x1c1   :  { %v8214_v55 = vpop.f32.mrf.mxu1 }
 0x1c3   :  { %v687_v56 = vpop.f32.mrf.mxu1 }
 0x1c4   :  { %8229 = vmatprep.mubr.msk.f32.mxu0 %vm225_vm3, %v687_v56 }
 0x1c5   :  { %v8217_v57 = vpop.f32.mrf.mxu1  ;;  %8230 = vmatmul.mubr.msk.f32.vlgmr.msra.gmra.mxu0 %vm225_vm3, %v8214_v55 }
 0x1c6   :  { %7153 = vmatpush1.msk.msra.mxu0 %vm992_vm5, %v980_v63 }
 0x1c7   :  { %v697_v58 = vpop.f32.mrf.mxu1  ;;  %1003 = vmatprep.subr.mxu0 %v979_v0 }
 0x1c8   :  { %8232 = vmatprep.mubr.msk.f32.mxu0 %vm225_vm3, %v697_v58  ;;  %1004 = vmatpush1.msra.mxu0 %v978_v1  ;;  %v91_v58 = vld [vmem:[%s12192_s7] sm:$0xff] }
 0x1c9   :  { %v8220_v59 = vpop.f32.mrf.mxu1  ;;  %8233 = vmatmul.mubr.msk.f32.gmra.mxu0 %vm225_vm3, %v8217_v57  ;;  %1005 = vmatprep.subr.mxu0 %v977_v2  ;;  %v344_v57 = vadd.f32 %v8959_v40, %v92_v49  ;;  %v343_v63 = vadd.f32 %v8961_v41, %v91_v58  ;;  %v7200_v58 = vld [vmem:[%s12193_s3 + $0x38] sm:$0xff] }
 0x1ca   :  { %1006 = vmatpush1.msra.mxu0 %v976_v3 }
 0x1cb   :  { %v707_v60 = vpop.f32.mrf.mxu1  ;;  %1007 = vmatprep.subr.mxu0 %v975_v4 }
 0x1cc   :  { %8235 = vmatprep.mubr.msk.f32.mxu0 %vm225_vm3, %v707_v60  ;;  %1008 = vmatpush1.msra.mxu0 %v974_v5 }
 0x1cd   :  { %8236 = vmatmul.mubr.msk.f32.gmra.mxu0 %vm225_vm3, %v8220_v59  ;;  %1009 = vmatprep.subr.mxu0 %v973_v6  ;;  %vm5586_vm3 = vcmask 138240  }
 0x1ce   :  { %1063 = vmatprep.mubr.f32.mxu0 %v8625_v61  ;;  %1010 = vmatpush1.msra.mxu0 %v972_v7  ;;  %v855_v7 = vld [vmem:[%s12193_s3] sm:$0xff] }
 0x1cf   :  { %1011 = vmatprep.subr.mxu0 %v971_v8  ;;  %v856_v8 = vld [vmem:[%s12193_s3 + $0x8] sm:$0xff] }
 0x1d0   :  { %1012 = vmatpush1.msra.mxu0 %v970_v9  ;;  %v857_v9 = vld [vmem:[%s12193_s3 + $0x10] sm:$0xf] }
 0x1d1   :  { %1013 = vmatprep.subr.mxu0 %v969_v10  ;;  %v7157_v10 = vld [vmem:[%s12193_s3 + $0x18] sm:$0xff] }
 0x1d2   :  { %1014 = vmatpush1.msra.mxu0 %v968_v11  ;;  %v7193_v11 = vld [vmem:[%s12191_s10 + $0x1d8] sm:$0x7] }
 0x1d3   :  { %1015 = vmatprep.subr.mxu0 %v967_v12  ;;  %v7192_v12 = vld [vmem:[%s12191_s10 + $0x1d0] sm:$0x7] }
 0x1d4   :  { %1016 = vmatpush1.msra.mxu0 %v966_v13  ;;  %v7191_v13 = vld [vmem:[%s12191_s10 + $0x1c8] sm:$0xff] }
 0x1d5   :  { %1017 = vmatprep.subr.mxu0 %v965_v14  ;;  %v7190_v14 = vld [vmem:[%s12191_s10 + $0x1c0] sm:$0xff] }
 0x1d6   :  { %1018 = vmatpush1.msra.mxu0 %v964_v15  ;;  %v7158_v15 = vld [vmem:[%s12193_s3 + $0x20] sm:$0xff] }
 0x1d7   :  { %1019 = vmatprep.subr.mxu0 %v963_v16  ;;  %v7189_v16 = vld [vmem:[%s12191_s10 + $0x1b8] sm:$0xff] }
 0x1d8   :  { %1020 = vmatpush1.msra.mxu0 %v962_v17  ;;  %v7188_v17 = vld [vmem:[%s12191_s10 + $0x1b0] sm:$0xff] }
 0x1d9   :  { %1021 = vmatprep.subr.mxu0 %v961_v18  ;;  %v7187_v18 = vld [vmem:[%s12191_s10 + $0x1a8] sm:$0xff] }
 0x1da   :  { %1022 = vmatpush1.msra.mxu0 %v960_v19  ;;  %v7186_v19 = vld [vmem:[%s12191_s10 + $0x1a0] sm:$0xff] }
 0x1db   :  { %1023 = vmatprep.subr.mxu0 %v959_v20  ;;  %v7159_v20 = vld [vmem:[%s12193_s3 + $0x28] sm:$0xf] }
 0x1dc   :  { %1024 = vmatpush1.msra.mxu0 %v958_v21  ;;  %v7185_v21 = vld [vmem:[%s12191_s10 + $0x198] sm:$0xff] }
 0x1dd   :  { %1025 = vmatprep.subr.mxu0 %v957_v22  ;;  %v7184_v22 = vld [vmem:[%s12191_s10 + $0x190] sm:$0xff] }
 0x1de   :  { %1026 = vmatpush1.msra.mxu0 %v956_v23  ;;  %v7183_v23 = vld [vmem:[%s12191_s10 + $0x188] sm:$0xff] }
 0x1df   :  { %1027 = vmatprep.subr.mxu0 %v955_v24  ;;  %v7182_v24 = vld [vmem:[%s12191_s10 + $0x180] sm:$0xff] }
 0x1e0   :  { %1028 = vmatpush1.msra.mxu0 %v954_v25  ;;  %v7181_v25 = vld [vmem:[%s12191_s10 + $0x178] sm:$0xff] }
 0x1e1   :  { %1029 = vmatprep.subr.mxu0 %v953_v26  ;;  %v7180_v26 = vld [vmem:[%s12191_s10 + $0x170] sm:$0xff] }
 0x1e2   :  { %1030 = vmatpush1.msra.mxu0 %v952_v27  ;;  %v7179_v27 = vld [vmem:[%s12191_s10 + $0x168] sm:$0xff] }
 0x1e3   :  { %8280 = vmatprep.subr.mxu0 %v8625_v61 }
 0x277   :  { %v8191_v28 = vpop.f32.mrf.mxu0 }
 0x278   :  { %v591_v0 = vadd.f32 %v8191_v28, %v344_v57  ;;  %v7178_v28 = vld [vmem:[%s12191_s10 + $0x160] sm:$0xff] }
 0x279   :  { %v561_v29 = vpop.f32.mrf.mxu0 }
 0x27a   :  { %v590_v40 = vadd.f32 %v561_v29, %v343_v63  ;;  %v7177_v29 = vld [vmem:[%s12191_s10 + $0x158] sm:$0xff]  ;;  %v7234_v63 = vld [vmem:[%s12191_s10 + $0x2c0] sm:$0x7] }
 0x27b   :  { %v8194_v30 = vpop.f32.mrf.mxu0 }
 0x27c   :  { %v593_v55 = vadd.f32 %v8194_v30, %v346_v50  ;;  %v7176_v30 = vld [vmem:[%s12191_s10 + $0x150] sm:$0xff] }
 0x27d   :  { %v571_v31 = vpop.f32.mrf.mxu0 }
 0x27e   :  { %v592_v60 = vadd.f32 %v571_v31, %v345_v54  ;;  %v7175_v31 = vld [vmem:[%s12191_s10 + $0x148] sm:$0xff] }
 0x27f   :  { %v8197_v32 = vpop.f32.mrf.mxu0 }
 0x280   :  { %v595_v52 = vadd.f32 %v8197_v32, %v348_v46  ;;  %v7174_v32 = vld [vmem:[%s12191_s10 + $0x140] sm:$0xff] }
 0x281   :  { %v581_v33 = vpop.f32.mrf.mxu0  ;;  %v7166_v46 = vld [vmem:[%s12191_s10 + $0x100] sm:$0xff] }
 0x282   :  { %v594_v56 = vadd.f32 %v581_v33, %v347_v51  ;;  %v7173_v33 = vld [vmem:[%s12191_s10 + $0x138] sm:$0xff] }
 0x285   :  { %v8231_v34 = vpop.f32.mrf.mxu0 }
 0x286   :  { %v838_v2 = vadd.f32 %v8231_v34, %v591_v0  ;;  %v7172_v34 = vld [vmem:[%s12191_s10 + $0x130] sm:$0xff]  ;;  %v7241_v0 = vld [vmem:[%s12193_s3 + $0x48] sm:$0xff] }
 0x287   :  { %v808_v36 = vpop.f32.mrf.mxu0 }
 0x288   :  { %v837_v4 = vadd.f32 %v808_v36, %v590_v40  ;;  %v9129_v41 = vmax.f32 %v838_v2, 0.0  ;;  %v7170_v36 = vld [vmem:[%s12191_s10 + $0x120] sm:$0xff]  ;;  %v7232_v2 = vld [vmem:[%s12191_s10 + $0x2b0] sm:$0xff] }
 0x289   :  { %v8234_v39 = vpop.f32.mrf.mxu0 }
 0x28a   :  { %v840_v62 = vadd.f32 %v8234_v39, %v593_v55  ;;  %v9133_v6 = vmax.f32 %v837_v4, 0.0  ;;  %v7167_v39 = vld [vmem:[%s12191_s10 + $0x108] sm:$0xff]  ;;  %v7199_v55 = vld [vmem:[%s12193_s3 + $0x30] sm:$0xff] }
 0x28b   :  { %v818_v48 = vpop.f32.mrf.mxu0  ;;  %v7231_v4 = vld [vmem:[%s12191_s10 + $0x2a8] sm:$0xff] }
 0x28c   :  { %v839_v43 = vadd.f32 %v818_v48, %v592_v60  ;;  %v9121_v3 = vmax.f32 %v840_v62, 0.0  ;;  %v7164_v48 = vld [vmem:[%s12191_s10 + $0xf0] sm:$0xff]  ;;  %v7201_v62 = vld [vmem:[%s12193_s3 + $0x40] sm:$0xf] }
 0x28d   :  { %v8237_v53 = vpop.f32.mrf.mxu0 }
 0x28e   :  { %v842_v44 = vadd.f32 %v8237_v53, %v595_v52  ;;  %v9125_v5 = vmax.f32 %v839_v43, 0.0  ;;  %v7233_v43 = vld [vmem:[%s12191_s10 + $0x2b8] sm:$0xff] }
 0x28f   :  { %v828_v59 = vpop.f32.mrf.mxu0 }
 0x290   :  { %v9113_v42 = vmax.f32 %v842_v44, 0.0  ;;  %v841_v45 = vadd.f32 %v828_v59, %v594_v56  ;;  %v7235_v44 = vld [vmem:[%s12191_s10 + $0x2c8] sm:$0x7] }
 0x292   :  { %v9116_v1 = vmax.f32 %v841_v45, 0.0  ;;  %8239 = vmatpush3.msk.msra.mxu1 %vm868_vm6, %v9113_v42 }
 0x293   :  { %8240 = vmatprep.subr.mxu1 %v8625_v61 }
 0x294   :  { %8241 = vmatpush3.msra.mxu1 %v9116_v1 }
 0x295   :  { %8242 = vmatprep.subr.mxu1 %v8625_v61 }
 0x296   :  { %8243 = vmatpush3.msra.mxu1 %v9121_v3 }
 0x297   :  { %8244 = vmatprep.subr.mxu1 %v8625_v61 }
 0x298   :  { %8245 = vmatpush3.msra.mxu1 %v9125_v5 }
 0x299   :  { %8246 = vmatprep.subr.mxu1 %v8625_v61 }
 0x29a   :  { %8247 = vmatpush3.msra.mxu1 %v9129_v41 }
 0x29b   :  { %8248 = vmatprep.subr.mxu1 %v8625_v61 }
 0x29c   :  { %8249 = vmatpush3.msra.mxu1 %v9133_v6 }
 0x29d   :  { %8251 = vmatmul.mubr.msk.f32.vlgmr.msra.gmra.mxu1 %vm858_vm7, %v855_v7  ;;  %8259 = vmatprep.subr.mxu1 %v8625_v61  ;;  %v7277_v7 = vld [vmem:[%s12191_s10 + $0x3b8] sm:$0x7] }
 0x29e   :  { %8260 = vmatpush3.msk.msra.mxu1 %vm868_vm6, %v9113_v42  ;;  %8253 = vmatprep.mubr.msk.f32.mxu1 %vm8626_vm4, %v8625_v61 }
 0x29f   :  { %8261 = vmatprep.subr.mxu1 %v8625_v61 }
 0x2a0   :  { %8262 = vmatpush3.msra.mxu1 %v9116_v1 }
 0x2a1   :  { %8254 = vmatmul.mubr.msk.f32.gmra.mxu1 %vm858_vm7, %v856_v8  ;;  %8263 = vmatprep.subr.mxu1 %v8625_v61  ;;  %v7230_v8 = vld [vmem:[%s12191_s10 + $0x2a0] sm:$0xff] }
 0x2a2   :  { %8264 = vmatpush3.msra.mxu1 %v9121_v3  ;;  %8256 = vmatprep.mubr.msk.f32.mxu1 %vm8626_vm4, %v8625_v61 }
 0x2a3   :  { %8265 = vmatprep.subr.mxu1 %v8625_v61 }
 0x2a4   :  { %8266 = vmatpush3.msra.mxu1 %v9125_v5 }
 0x2a5   :  { %8257 = vmatmul.mubr.msk.f32.gmra.mxu1 %vm858_vm7, %v857_v9  ;;  %8267 = vmatprep.subr.mxu1 %v8625_v61  ;;  %v7276_v9 = vld [vmem:[%s12191_s10 + $0x3b0] sm:$0x7] }
 0x2a6   :  { %8268 = vmatpush3.msra.mxu1 %v9129_v41  ;;  %8271 = vmatprep.mubr.msk.f32.mxu1 %vm8626_vm4, %v8625_v61 }
 0x2a7   :  { %8269 = vmatprep.subr.mxu1 %v8625_v61 }
 0x2a8   :  { %8270 = vmatpush3.msra.mxu1 %v9133_v6 }
 0x2a9   :  { %8272 = vmatmul.mubr.msk.f32.vlgmr.msra.gmra.mxu1 %vm858_vm7, %v7157_v10  ;;  %7194 = vmatprep.subr.msk.mxu1 %vm992_vm5, %v7193_v11  ;;  %v7242_v10 = vld [vmem:[%s12193_s3 + $0x50] sm:$0xff]  ;;  %v7229_v11 = vld [vmem:[%s12191_s10 + $0x298] sm:$0xff] }
 0x2aa   :  { %8274 = vmatprep.mubr.msk.f32.mxu1 %vm8626_vm4, %v8625_v61  ;;  %7195 = vmatpush1.msk.msra.mxu1 %vm992_vm5, %v7192_v12  ;;  %v7228_v12 = vld [vmem:[%s12191_s10 + $0x290] sm:$0xff] }
 0x2ab   :  { %1231 = vmatprep.subr.mxu1 %v7191_v13  ;;  %v7227_v13 = vld [vmem:[%s12191_s10 + $0x288] sm:$0xff] }
 0x2ac   :  { %1232 = vmatpush1.msra.mxu1 %v7190_v14  ;;  %v7275_v14 = vld [vmem:[%s12191_s10 + $0x3a8] sm:$0xff] }
 0x2ad   :  { %8275 = vmatmul.mubr.msk.f32.gmra.mxu1 %vm858_vm7, %v7158_v15  ;;  %1233 = vmatprep.subr.mxu1 %v7189_v16  ;;  %v7226_v15 = vld [vmem:[%s12191_s10 + $0x280] sm:$0xff] }
 0x2ae   :  { %8277 = vmatprep.mubr.msk.f32.mxu1 %vm8626_vm4, %v8625_v61  ;;  %1234 = vmatpush1.msra.mxu1 %v7188_v17  ;;  %v7274_v16 = vld [vmem:[%s12191_s10 + $0x3a0] sm:$0xff]  ;;  %v7243_v17 = vld [vmem:[%s12193_s3 + $0x58] sm:$0xf] }
 0x2af   :  { %1235 = vmatprep.subr.mxu1 %v7187_v18  ;;  %v7225_v18 = vld [vmem:[%s12191_s10 + $0x278] sm:$0xff] }
 0x2b0   :  { %1236 = vmatpush1.msra.mxu1 %v7186_v19  ;;  %v7224_v19 = vld [vmem:[%s12191_s10 + $0x270] sm:$0xff] }
 0x2b1   :  { %8278 = vmatmul.mubr.msk.f32.gmra.mxu1 %vm858_vm7, %v7159_v20  ;;  %1237 = vmatprep.subr.mxu1 %v7185_v21  ;;  %v7273_v20 = vld [vmem:[%s12191_s10 + $0x398] sm:$0xff]  ;;  %v7223_v21 = vld [vmem:[%s12191_s10 + $0x268] sm:$0xff] }
 0x2b2   :  { %1238 = vmatpush1.msra.mxu1 %v7184_v22  ;;  %1291 = vmatprep.mubr.f32.mxu1 %v8625_v61  ;;  %v7222_v22 = vld [vmem:[%s12191_s10 + $0x260] sm:$0xff] }
 0x2b3   :  { %1239 = vmatprep.subr.mxu1 %v7183_v23  ;;  %v7221_v23 = vld [vmem:[%s12191_s10 + $0x258] sm:$0xff] }
 0x2b4   :  { %1240 = vmatpush1.msra.mxu1 %v7182_v24  ;;  %v7220_v24 = vld [vmem:[%s12191_s10 + $0x250] sm:$0xff] }
 0x2b5   :  { %1241 = vmatprep.subr.mxu1 %v7181_v25  ;;  %v7219_v25 = vld [vmem:[%s12191_s10 + $0x248] sm:$0xff] }
 0x2b6   :  { %1242 = vmatpush1.msra.mxu1 %v7180_v26  ;;  %v7218_v26 = vld [vmem:[%s12191_s10 + $0x240] sm:$0xff] }
 0x2b7   :  { %1243 = vmatprep.subr.mxu1 %v7179_v27  ;;  %v7217_v27 = vld [vmem:[%s12191_s10 + $0x238] sm:$0xff] }
 0x2b8   :  { %1244 = vmatpush1.msra.mxu1 %v7178_v28  ;;  %v7272_v28 = vld [vmem:[%s12191_s10 + $0x390] sm:$0xff] }
 0x2b9   :  { %1245 = vmatprep.subr.mxu1 %v7177_v29  ;;  %v7216_v29 = vld [vmem:[%s12191_s10 + $0x230] sm:$0xff] }
 0x2ba   :  { %1246 = vmatpush1.msra.mxu1 %v7176_v30  ;;  %v7271_v30 = vld [vmem:[%s12191_s10 + $0x388] sm:$0xff] }
 0x2bb   :  { %1247 = vmatprep.subr.mxu1 %v7175_v31  ;;  %v7215_v31 = vld [vmem:[%s12191_s10 + $0x228] sm:$0xff] }
 0x2bc   :  { %1248 = vmatpush1.msra.mxu1 %v7174_v32  ;;  %v7270_v32 = vld [vmem:[%s12191_s10 + $0x380] sm:$0xff] }
 0x2bd   :  { %1249 = vmatprep.subr.mxu1 %v7173_v33  ;;  %v7214_v33 = vld [vmem:[%s12191_s10 + $0x220] sm:$0xff] }
 0x2be   :  { %1250 = vmatpush1.msra.mxu1 %v7172_v34  ;;  %v7269_v34 = vld [vmem:[%s12191_s10 + $0x378] sm:$0xff] }
 0x2bf   :  { %1251 = vmatprep.subr.mxu1 %v7171_v35  ;;  %v7213_v35 = vld [vmem:[%s12191_s10 + $0x218] sm:$0xff] }
 0x2c0   :  { %1252 = vmatpush1.msra.mxu1 %v7170_v36  ;;  %v7268_v36 = vld [vmem:[%s12191_s10 + $0x370] sm:$0xff] }
 0x2c1   :  { %1253 = vmatprep.subr.mxu1 %v7169_v37  ;;  %v7212_v37 = vld [vmem:[%s12191_s10 + $0x210] sm:$0xff] }
 0x2c2   :  { %1254 = vmatpush1.msra.mxu1 %v7168_v38  ;;  %v7267_v38 = vld [vmem:[%s12191_s10 + $0x368] sm:$0xff] }
 0x2c3   :  { %1255 = vmatprep.subr.mxu1 %v7167_v39  ;;  %v7211_v39 = vld [vmem:[%s12191_s10 + $0x208] sm:$0xff] }
 0x2c4   :  { %1256 = vmatpush1.msra.mxu1 %v7166_v46  ;;  %v7266_v46 = vld [vmem:[%s12191_s10 + $0x360] sm:$0xff] }
 0x2c5   :  { %1257 = vmatprep.subr.mxu1 %v7165_v47  ;;  %v7210_v47 = vld [vmem:[%s12191_s10 + $0x200] sm:$0xff] }
 0x2c6   :  { %1258 = vmatpush1.msra.mxu1 %v7164_v48  ;;  %v7265_v48 = vld [vmem:[%s12191_s10 + $0x358] sm:$0xff] }
 0x2c7   :  { %8301 = vmatprep.subr.mxu1 %v8625_v61 }
 0x35d   :  { %v938_v49 = vpop.f32.mrf.mxu1 }
 0x35e   :  { %7154 = vmatmul.mubr.msk.f32.vlgmr.msra.gmra.mxu0 %vm982_vm8, %v938_v49  ;;  %v7209_v49 = vld [vmem:[%s12191_s10 + $0x1f8] sm:$0xff] }
 0x35f   :  { %8281 = vmatpush3.msk.msra.mxu0 %vm868_vm6, %v9113_v42  ;;  %v8252_v50 = vpop.f32.mrf.mxu1  ;;  %1069 = vmatprep.mubr.f32.mxu0 %v8625_v61 }
 0x360   :  { %8282 = vmatprep.subr.mxu0 %v8625_v61  ;;  %v7264_v50 = vld [vmem:[%s12191_s10 + $0x350] sm:$0xff] }
 0x361   :  { %8283 = vmatpush3.msra.mxu0 %v9116_v1  ;;  %v943_v51 = vpop.f32.mrf.mxu1 }
 0x362   :  { %8284 = vmatprep.subr.mxu0 %v8625_v61  ;;  %7155 = vmatmul.mubr.msk.f32.gmra.mxu0 %vm982_vm8, %v943_v51  ;;  %v7208_v51 = vld [vmem:[%s12191_s10 + $0x1f0] sm:$0xff] }
 0x363   :  { %8285 = vmatpush3.msra.mxu0 %v9121_v3  ;;  %v8255_v52 = vpop.f32.mrf.mxu1  ;;  %1075 = vmatprep.mubr.f32.mxu0 %v8625_v61 }
 0x364   :  { %8286 = vmatprep.subr.mxu0 %v8625_v61  ;;  %v7263_v52 = vld [vmem:[%s12191_s10 + $0x348] sm:$0xff] }
 0x365   :  { %8287 = vmatpush3.msra.mxu0 %v9125_v5  ;;  %v948_v53 = vpop.f32.mrf.mxu1 }
 0x366   :  { %8288 = vmatprep.subr.mxu0 %v8625_v61  ;;  %7156 = vmatmul.mubr.msk.f32.gmra.mxu0 %vm982_vm8, %v948_v53  ;;  %v7207_v53 = vld [vmem:[%s12191_s10 + $0x1e8] sm:$0xff] }
 0x367   :  { %8289 = vmatpush3.msra.mxu0 %v9129_v41  ;;  %v8258_v54 = vpop.f32.mrf.mxu1  ;;  %8292 = vmatprep.mubr.msk.f32.mxu0 %vm8626_vm4, %v8625_v61 }
 0x368   :  { %8290 = vmatprep.subr.mxu0 %v8625_v61  ;;  %v7262_v54 = vld [vmem:[%s12191_s10 + $0x340] sm:$0xff] }
 0x369   :  { %8291 = vmatpush3.msra.mxu0 %v9133_v6  ;;  %v1167_v56 = vpop.f32.mrf.mxu1 }
 0x36a   :  { %7196 = vmatmul.mubr.msk.f32.vlgmr.msra.gmra.mxu1 %vm982_vm8, %v1167_v56  ;;  %8293 = vmatmul.mubr.msk.f32.vlgmr.msra.gmra.mxu0 %vm858_vm7, %v7199_v55  ;;  %v7206_v55 = vld [vmem:[%s12191_s10 + $0x1e0] sm:$0xff]  ;;  %v7261_v56 = vld [vmem:[%s12191_s10 + $0x338] sm:$0xff] }
 0x36b   :  { %8302 = vmatpush3.msk.msra.mxu1 %vm868_vm6, %v9113_v42  ;;  %v8273_v57 = vpop.f32.mrf.mxu1  ;;  %1297 = vmatprep.mubr.f32.mxu1 %v8625_v61 }
 0x36c   :  { %8303 = vmatprep.subr.mxu1 %v8625_v61  ;;  %8295 = vmatprep.mubr.msk.f32.mxu0 %vm8626_vm4, %v8625_v61  ;;  %v7259_v57 = vld [vmem:[%s12191_s10 + $0x328] sm:$0xff] }
 0x36d   :  { %8304 = vmatpush3.msra.mxu1 %v9116_v1  ;;  %v1172_v59 = vpop.f32.mrf.mxu1  ;;  %7236 = vmatprep.subr.msk.mxu0 %vm992_vm5, %v7235_v44  ;;  %v7260_v44 = vld [vmem:[%s12191_s10 + $0x330] sm:$0xff] }
 0x36e   :  { %8305 = vmatprep.subr.mxu1 %v8625_v61  ;;  %7197 = vmatmul.mubr.msk.f32.gmra.mxu1 %vm982_vm8, %v1172_v59  ;;  %v7257_v59 = vld [vmem:[%s12191_s10 + $0x318] sm:$0xff] }
 0x36f   :  { %8296 = vmatmul.mubr.msk.f32.gmra.mxu0 %vm858_vm7, %v7200_v58  ;;  %8306 = vmatpush3.msra.mxu1 %v9121_v3  ;;  %v8276_v60 = vpop.f32.mrf.mxu1  ;;  %v7258_v58 = vld [vmem:[%s12191_s10 + $0x320] sm:$0xff] }
 0x370   :  { %8307 = vmatprep.subr.mxu1 %v8625_v61  ;;  %1303 = vmatprep.mubr.f32.mxu1 %v8625_v61  ;;  %v7256_v60 = vld [vmem:[%s12191_s10 + $0x310] sm:$0xff] }
 0x371   :  { %8308 = vmatpush3.msra.mxu1 %v9125_v5  ;;  %v1177_v45 = vpop.f32.mrf.mxu1  ;;  %8298 = vmatprep.mubr.msk.f32.mxu0 %vm8626_vm4, %v8625_v61 }
 0x372   :  { %8309 = vmatprep.subr.mxu1 %v8625_v61  ;;  %7198 = vmatmul.mubr.msk.f32.gmra.mxu1 %vm982_vm8, %v1177_v45  ;;  %v7254_v45 = vld [vmem:[%s12191_s10 + $0x300] sm:$0xff] }
 0x373   :  { %8299 = vmatmul.mubr.msk.f32.gmra.mxu0 %vm858_vm7, %v7201_v62  ;;  %8310 = vmatpush3.msra.mxu1 %v9129_v41  ;;  %v8279_v40 = vpop.f32.mrf.mxu1  ;;  %v7255_v62 = vld [vmem:[%s12191_s10 + $0x308] sm:$0xff] }
 0x374   :  { %8311 = vmatprep.subr.mxu1 %v8625_v61  ;;  %8313 = vmatprep.mubr.msk.f32.mxu1 %vm8626_vm4, %v8625_v61  ;;  %v7250_v40 = vld [vmem:[%s12191_s10 + $0x2e0] sm:$0xff] }
 0x375   :  { %8312 = vmatpush3.msra.mxu1 %v9133_v6  ;;  %7237 = vmatpush1.msk.msra.mxu0 %vm992_vm5, %v7234_v63  ;;  %v7253_v63 = vld [vmem:[%s12191_s10 + $0x2f8] sm:$0xff] }
 0x376   :  { %8314 = vmatmul.mubr.msk.f32.vlgmr.msra.gmra.mxu1 %vm858_vm7, %v7241_v0  ;;  %1459 = vmatprep.subr.mxu0 %v7233_v43  ;;  %v7252_v0 = vld [vmem:[%s12191_s10 + $0x2f0] sm:$0xff]  ;;  %v7251_v43 = vld [vmem:[%s12191_s10 + $0x2e8] sm:$0xff] }
 0x377   :  { %8316 = vmatprep.mubr.msk.f32.mxu1 %vm8626_vm4, %v8625_v61  ;;  %1460 = vmatpush1.msra.mxu0 %v7232_v2  ;;  %v7249_v2 = vld [vmem:[%s12191_s10 + $0x2d8] sm:$0xff] }
 0x378   :  { %1461 = vmatprep.subr.mxu0 %v7231_v4  ;;  %7278 = vmatprep.subr.msk.mxu1 %vm992_vm5, %v7277_v7  ;;  %v7248_v4 = vld [vmem:[%s12191_s10 + $0x2d0] sm:$0xff] }
 0x379   :  { %1462 = vmatpush1.msra.mxu0 %v7230_v8  ;;  %7279 = vmatpush1.msk.msra.mxu1 %vm992_vm5, %v7276_v9 }
 0x37a   :  { %8317 = vmatmul.mubr.msk.f32.gmra.mxu1 %vm858_vm7, %v7242_v10  ;;  %1463 = vmatprep.subr.mxu0 %v7229_v11  ;;  %v849_v11 = vld [vmem:[%s12194_s5] sm:$0xff] }
 0x37b   :  { %8319 = vmatprep.mubr.msk.f32.mxu1 %vm8626_vm4, %v8625_v61  ;;  %1464 = vmatpush1.msra.mxu0 %v7228_v12 }
 0x37c   :  { %1465 = vmatprep.subr.mxu0 %v7227_v13  ;;  %1687 = vmatprep.subr.mxu1 %v7275_v14 }
 0x37d   :  { %1466 = vmatpush1.msra.mxu0 %v7226_v15  ;;  %1688 = vmatpush1.msra.mxu1 %v7274_v16  ;;  %v851_v15 = vld [vmem:[%s12194_s5 + $0x10] sm:$0xff] }
 0x37e   :  { %8320 = vmatmul.mubr.msk.f32.gmra.mxu1 %vm858_vm7, %v7243_v17  ;;  %1467 = vmatprep.subr.mxu0 %v7225_v18 }
 0x37f   :  { %1468 = vmatpush1.msra.mxu0 %v7224_v19  ;;  %1689 = vmatprep.subr.mxu1 %v7273_v20 }
 0x380   :  { %1469 = vmatprep.subr.mxu0 %v7223_v21  ;;  %1519 = vmatprep.mubr.f32.mxu0 %v8625_v61 }
 0x381   :  { %1470 = vmatpush1.msra.mxu0 %v7222_v22  ;;  %1747 = vmatprep.mubr.f32.mxu1 %v8625_v61  ;;  %v853_v22 = vld [vmem:[%s12194_s5 + $0x20] sm:$0xf] }
 0x382   :  { %1471 = vmatprep.subr.mxu0 %v7221_v23  ;;  %1690 = vmatpush1.msra.mxu1 %v7272_v28 }
 0x383   :  { %1472 = vmatpush1.msra.mxu0 %v7220_v24  ;;  %1691 = vmatprep.subr.mxu1 %v7271_v30 }
 0x384   :  { %1473 = vmatprep.subr.mxu0 %v7219_v25  ;;  %1692 = vmatpush1.msra.mxu1 %v7270_v32  ;;  %v7319_v32 = vld [vmem:[%s12191_s10 + $0x4a8] sm:$0x7] }
 0x385   :  { %1474 = vmatpush1.msra.mxu0 %v7218_v26  ;;  %1693 = vmatprep.subr.mxu1 %v7269_v34  ;;  %v7317_v34 = vld [vmem:[%s12191_s10 + $0x498] sm:$0xff] }
 0x386   :  { %1475 = vmatprep.subr.mxu0 %v7217_v27  ;;  %1694 = vmatpush1.msra.mxu1 %v7268_v36  ;;  %v7316_v36 = vld [vmem:[%s12191_s10 + $0x490] sm:$0xff] }
 0x387   :  { %1476 = vmatpush1.msra.mxu0 %v7216_v29  ;;  %1695 = vmatprep.subr.mxu1 %v7267_v38 }
 0x388   :  { %1477 = vmatprep.subr.mxu0 %v7215_v31  ;;  %1696 = vmatpush1.msra.mxu1 %v7266_v46  ;;  %v7283_v31 = vld [vmem:[%s12193_s3 + $0x60] sm:$0xff]  ;;  %v7285_v46 = vld [vmem:[%s12193_s3 + $0x70] sm:$0xf] }
 0x389   :  { %1478 = vmatpush1.msra.mxu0 %v7214_v33  ;;  %1697 = vmatprep.subr.mxu1 %v7265_v48 }
 0x38a   :  { %1479 = vmatprep.subr.mxu0 %v7213_v35  ;;  %1698 = vmatpush1.msra.mxu1 %v7264_v50  ;;  %v7311_v50 = vld [vmem:[%s12191_s10 + $0x468] sm:$0xff] }
 0x38b   :  { %1480 = vmatpush1.msra.mxu0 %v7212_v37  ;;  %1699 = vmatprep.subr.mxu1 %v7263_v52  ;;  %v7315_v37 = vld [vmem:[%s12191_s10 + $0x488] sm:$0xff] }
 0x38c   :  { %1481 = vmatprep.subr.mxu0 %v7211_v39  ;;  %1700 = vmatpush1.msra.mxu1 %v7262_v54  ;;  %v7314_v39 = vld [vmem:[%s12191_s10 + $0x480] sm:$0xff]  ;;  %v7308_v54 = vld [vmem:[%s12191_s10 + $0x450] sm:$0xff] }
 0x38d   :  { %1482 = vmatpush1.msra.mxu0 %v7210_v47  ;;  %1701 = vmatprep.subr.mxu1 %v7261_v56  ;;  %v7313_v47 = vld [vmem:[%s12191_s10 + $0x478] sm:$0xff]  ;;  %v7306_v56 = vld [vmem:[%s12191_s10 + $0x440] sm:$0xff] }
 0x38e   :  { %1483 = vmatprep.subr.mxu0 %v7209_v49  ;;  %1702 = vmatpush1.msra.mxu1 %v7260_v44  ;;  %v7312_v49 = vld [vmem:[%s12191_s10 + $0x470] sm:$0xff]  ;;  %v7305_v44 = vld [vmem:[%s12191_s10 + $0x438] sm:$0xff] }
 0x38f   :  { %1484 = vmatpush1.msra.mxu0 %v7208_v51  ;;  %1703 = vmatprep.subr.mxu1 %v7259_v57  ;;  %v7310_v51 = vld [vmem:[%s12191_s10 + $0x460] sm:$0xff]  ;;  %v7304_v57 = vld [vmem:[%s12191_s10 + $0x430] sm:$0xff] }
 0x390   :  { %1485 = vmatprep.subr.mxu0 %v7207_v53  ;;  %1704 = vmatpush1.msra.mxu1 %v7258_v58  ;;  %v7309_v53 = vld [vmem:[%s12191_s10 + $0x458] sm:$0xff]  ;;  %v7303_v58 = vld [vmem:[%s12191_s10 + $0x428] sm:$0xff] }
 0x391   :  { %1486 = vmatpush1.msra.mxu0 %v7206_v55  ;;  %1705 = vmatprep.subr.mxu1 %v7257_v59  ;;  %v7307_v55 = vld [vmem:[%s12191_s10 + $0x448] sm:$0xff]  ;;  %v7302_v59 = vld [vmem:[%s12191_s10 + $0x420] sm:$0xff] }
 0x392   :  { %8322 = vmatprep.subr.mxu0 %v8625_v61  ;;  %1706 = vmatpush1.msra.mxu1 %v7256_v60  ;;  %v7301_v60 = vld [vmem:[%s12191_s10 + $0x418] sm:$0xff] }
 0x393   :  { %1707 = vmatprep.subr.mxu1 %v7255_v62  ;;  %v7300_v62 = vld [vmem:[%s12191_s10 + $0x410] sm:$0xff] }
 0x394   :  { %1708 = vmatpush1.msra.mxu1 %v7254_v45  ;;  %v7299_v45 = vld [vmem:[%s12191_s10 + $0x408] sm:$0xff] }
 0x395   :  { %1709 = vmatprep.subr.mxu1 %v7253_v63  ;;  %v7298_v63 = vld [vmem:[%s12191_s10 + $0x400] sm:$0xff] }
 0x396   :  { %1710 = vmatpush1.msra.mxu1 %v7252_v0  ;;  %v7297_v0 = vld [vmem:[%s12191_s10 + $0x3f8] sm:$0xff] }
 0x397   :  { %1711 = vmatprep.subr.mxu1 %v7251_v43  ;;  %v7296_v43 = vld [vmem:[%s12191_s10 + $0x3f0] sm:$0xff] }
 0x398   :  { %1712 = vmatpush1.msra.mxu1 %v7250_v40  ;;  %v7295_v40 = vld [vmem:[%s12191_s10 + $0x3e8] sm:$0xff] }
 0x399   :  { %1713 = vmatprep.subr.mxu1 %v7249_v2  ;;  %v7294_v2 = vld [vmem:[%s12191_s10 + $0x3e0] sm:$0xff] }
 0x39a   :  { %1714 = vmatpush1.msra.mxu1 %v7248_v4  ;;  %v7293_v4 = vld [vmem:[%s12191_s10 + $0x3d8] sm:$0xff] }
 0x39b   :  { %2114 = vmatprep.subr.mxu1 %v8625_v61 }
 0x41e   :  { %v1065_v7 = vpop.f32.mrf.mxu0 }
 0x41f   :  { %v1082_v14 = vadd.f32 %v1065_v7, %v849_v11  ;;  %v7292_v7 = vld [vmem:[%s12191_s10 + $0x3d0] sm:$0xff]  ;;  %v7290_v11 = vld [vmem:[%s12191_s10 + $0x3c0] sm:$0xff] }
 0x420   :  { %v9537_v8 = vpop.f32.mrf.mxu0 }
 0x422   :  { %v1071_v9 = vpop.f32.mrf.mxu0 }
 0x423   :  { %v1084_v21 = vadd.f32 %v1071_v9, %v851_v15  ;;  %v7291_v9 = vld [vmem:[%s12191_s10 + $0x3c8] sm:$0xff] }
 0x424   :  { %v9539_v10 = vpop.f32.mrf.mxu0  ;;  %v2103_v15 = vld [vmem:[%s12195_s0 + $0x68] sm:$0xff] }
 0x426   :  { %v1077_v12 = vpop.f32.mrf.mxu0 }
 0x427   :  { %v1086_v26 = vadd.f32 %v1077_v12, %v853_v22  ;;  %v2105_v12 = vld [vmem:[%s12195_s0 + $0x78] sm:$0xff]  ;;  %v2098_v22 = vld [vmem:[%s12195_s0 + $0x40] sm:$0xff] }
 0x428   :  { %v9544_v13 = vpop.f32.mrf.mxu0 }
 0x42a   :  { %v1293_v16 = vpop.f32.mrf.mxu1  ;;  %v1395_v17 = vpop.f32.mrf.mxu0 }
 0x42b   :  { %v9549_v18 = vadd.f32 %v1293_v16, %v1082_v14  ;;  %7238 = vmatmul.mubr.msk.f32.vlgmr.msra.gmra.mxu0 %vm982_vm8, %v1395_v17  ;;  %v2104_v14 = vld [vmem:[%s12195_s0 + $0x70] sm:$0xff]  ;;  %v2102_v16 = vld [vmem:[%s12195_s0 + $0x60] sm:$0xff]  ;;  %v2101_v17 = vld [vmem:[%s12195_s0 + $0x58] sm:$0xff] }
 0x42c   :  { %8323 = vmatpush3.msk.msra.mxu0 %vm868_vm6, %v9113_v42  ;;  %v9554_v19 = vpop.f32.mrf.mxu1  ;;  %v8294_v20 = vpop.f32.mrf.mxu0  ;;  %1525 = vmatprep.mubr.f32.mxu0 %v8625_v61 }
 0x42d   :  { %8324 = vmatprep.subr.mxu0 %v8625_v61  ;;  %v2100_v20 = vld [vmem:[%s12195_s0 + $0x50] sm:$0xff] }
 0x42e   :  { %8325 = vmatpush3.msra.mxu0 %v9116_v1  ;;  %v1299_v23 = vpop.f32.mrf.mxu1 }
 0x42f   :  { %v9562_v24 = vadd.f32 %v1299_v23, %v1084_v21  ;;  %v1400_v25 = vpop.f32.mrf.mxu0  ;;  %8326 = vmatprep.subr.mxu0 %v8625_v61  ;;  %v2099_v21 = vld [vmem:[%s12195_s0 + $0x48] sm:$0xff]  ;;  %v2097_v23 = vld [vmem:[%s12195_s0 + $0x38] sm:$0xff] }
 0x430   :  { %7239 = vmatmul.mubr.msk.f32.gmra.mxu0 %vm982_vm8, %v1400_v25  ;;  %v9566_v42 = vpop.f32.mrf.mxu1  ;;  %v2096_v25 = vld [vmem:[%s12195_s0 + $0x30] sm:$0xff] }
 0x431   :  { %8327 = vmatpush3.msra.mxu0 %v9121_v3  ;;  %v8297_v27 = vpop.f32.mrf.mxu0  ;;  %1531 = vmatprep.mubr.f32.mxu0 %v8625_v61 }
 0x432   :  { %8328 = vmatprep.subr.mxu0 %v8625_v61  ;;  %v1305_v28 = vpop.f32.mrf.mxu1  ;;  %v2094_v27 = vld [vmem:[%s12195_s0 + $0x20] sm:$0xff] }
 0x433   :  { %8329 = vmatpush3.msra.mxu0 %v9125_v5  ;;  %v9572_v1 = vadd.f32 %v1305_v28, %v1086_v26  ;;  %v1405_v29 = vpop.f32.mrf.mxu0  ;;  %v2095_v26 = vld [vmem:[%s12195_s0 + $0x28] sm:$0xff] }
 0x434   :  { %8330 = vmatprep.subr.mxu0 %v8625_v61  ;;  %7240 = vmatmul.mubr.msk.f32.gmra.mxu0 %vm982_vm8, %v1405_v29  ;;  %v9576_v30 = vpop.f32.mrf.mxu1 }
 0x435   :  { %8331 = vmatpush3.msra.mxu0 %v9129_v41  ;;  %v8300_v3 = vpop.f32.mrf.mxu0  ;;  %8334 = vmatprep.mubr.msk.f32.mxu0 %vm8626_vm4, %v8625_v61  ;;  %v7318_v41 = vld [vmem:[%s12191_s10 + $0x4a0] sm:$0x7] }
 0x436   :  { %8332 = vmatprep.subr.mxu0 %v8625_v61  ;;  %v1623_v5 = vpop.f32.mrf.mxu1 }
 0x437   :  { %8333 = vmatpush3.msra.mxu0 %v9133_v6  ;;  %7280 = vmatmul.mubr.msk.f32.vlgmr.msra.gmra.mxu1 %vm982_vm8, %v1623_v5  ;;  %v7284_v6 = vld [vmem:[%s12193_s3 + $0x68] sm:$0xff] }
 0x438   :  { %8335 = vmatmul.mubr.msk.f32.vlgmr.msra.gmra.mxu0 %vm858_vm7, %v7283_v31  ;;  %v8315_v33 = vpop.f32.mrf.mxu1  ;;  %1753 = vmatprep.mubr.f32.mxu1 %v8625_v61 }
 0x439   :  { %8337 = vmatprep.mubr.msk.f32.mxu0 %vm8626_vm4, %v8625_v61  ;;  %7320 = vmatprep.subr.msk.mxu0 %vm992_vm5, %v7319_v32 }
 0x43a   :  { %v1628_v35 = vpop.f32.mrf.mxu1  ;;  %7321 = vmatpush1.msk.msra.mxu0 %vm992_vm5, %v7318_v41  ;;  %2115 = vmatpush1.msra.mxu1 %v2105_v12  ;;  %vm6575_vm5 = vcmask 252928  }
 0x43b   :  { %7281 = vmatmul.mubr.msk.f32.gmra.mxu1 %vm982_vm8, %v1628_v35  ;;  %1915 = vmatprep.subr.mxu0 %v7317_v34 }
 0x43c   :  { %8338 = vmatmul.mubr.msk.f32.gmra.mxu0 %vm858_vm7, %v7284_v6  ;;  %v8318_v38 = vpop.f32.mrf.mxu1  ;;  %1759 = vmatprep.mubr.f32.mxu1 %v8625_v61 }
 0x43d   :  { %8340 = vmatprep.mubr.msk.f32.mxu0 %vm8626_vm4, %v8625_v61  ;;  %1916 = vmatpush1.msra.mxu0 %v7316_v36  ;;  %v2092_v38 = vld [vmem:[%s12195_s0 + $0x10] sm:$0xff] }
 0x43e   :  { %v1633_v48 = vpop.f32.mrf.mxu1  ;;  %1917 = vmatprep.subr.mxu0 %v7315_v37  ;;  %2116 = vmatprep.subr.mxu1 %v8625_v61 }
 0x43f   :  { %7282 = vmatmul.mubr.msk.f32.gmra.mxu1 %vm982_vm8, %v1633_v48  ;;  %1918 = vmatpush1.msra.mxu0 %v7314_v39  ;;  %v2091_v39 = vld [vmem:[%s12195_s0 + $0x8] sm:$0xff]  ;;  %v2108_v48 = vld [vmem:[%s12195_s0 + $0x90] sm:$0xff] }
 0x440   :  { %8341 = vmatmul.mubr.msk.f32.gmra.mxu0 %vm858_vm7, %v7285_v46  ;;  %1919 = vmatprep.subr.mxu0 %v7313_v47  ;;  %v8321_v52 = vpop.f32.mrf.mxu1  ;;  %v2090_v46 = vld [vmem:[%s12195_s0] sm:$0xff]  ;;  %v2109_v47 = vld [vmem:[%s12195_s0 + $0x98] sm:$0xff] }
 0x441   :  { %1920 = vmatpush1.msra.mxu0 %v7312_v49  ;;  %1975 = vmatprep.mubr.f32.mxu0 %v8625_v61  ;;  %v2107_v49 = vld [vmem:[%s12195_s0 + $0x88] sm:$0xff] }
 0x442   :  { %1921 = vmatprep.subr.mxu0 %v7311_v50  ;;  %2117 = vmatpush1.msra.mxu1 %v2104_v14  ;;  %v2106_v50 = vld [vmem:[%s12195_s0 + $0x80] sm:$0xff] }
 0x443   :  { %1922 = vmatpush1.msra.mxu0 %v7310_v51  ;;  %2118 = vmatprep.subr.mxu1 %v8625_v61 }
 0x444   :  { %1923 = vmatprep.subr.mxu0 %v7309_v53  ;;  %2119 = vmatpush1.msra.mxu1 %v2103_v15 }
 0x445   :  { %1924 = vmatpush1.msra.mxu0 %v7308_v54  ;;  %2120 = vmatprep.subr.mxu1 %v8625_v61 }
 0x446   :  { %1925 = vmatprep.subr.mxu0 %v7307_v55  ;;  %2121 = vmatpush1.msra.mxu1 %v2102_v16  ;;  %v852_v55 = vld [vmem:[%s12194_s5 + $0x18] sm:$0xff] }
 0x447   :  { %1926 = vmatpush1.msra.mxu0 %v7306_v56  ;;  %2122 = vmatprep.subr.mxu1 %v8625_v61  ;;  %v854_v56 = vld [vmem:[%s12194_s5 + $0x28] sm:$0xf] }
 0x448   :  { %1927 = vmatprep.subr.mxu0 %v7305_v44  ;;  %2123 = vmatpush1.msra.mxu1 %v2101_v17 }
 0x449   :  { %1928 = vmatpush1.msra.mxu0 %v7304_v57  ;;  %2124 = vmatprep.subr.mxu1 %v8625_v61  ;;  %v850_v57 = vld [vmem:[%s12194_s5 + $0x8] sm:$0xff]  ;;  %s12197_s5 = sld [smem:[#allocation17_spill]] }
 0x44a   :  { %1929 = vmatprep.subr.mxu0 %v7303_v58  ;;  %2125 = vmatpush1.msra.mxu1 %v2100_v20 }
 0x44b   :  { %1930 = vmatpush1.msra.mxu0 %v7302_v59  ;;  %2126 = vmatprep.subr.mxu1 %v8625_v61 }
 0x44c   :  { %1931 = vmatprep.subr.mxu0 %v7301_v60  ;;  %2127 = vmatpush1.msra.mxu1 %v2099_v21  ;;  %v1085_v60 = vadd.f32 %v9539_v10, %v852_v55  ;;  %v7354_v55 = vld [vmem:[%s12196_s30 + $0x8] sm:$0xf] }
 0x44d   :  { %1932 = vmatpush1.msra.mxu0 %v7300_v62  ;;  %2128 = vmatprep.subr.mxu1 %v8625_v61  ;;  %v1087_v62 = vadd.f32 %v9544_v13, %v854_v56 }
 0x44e   :  { %1933 = vmatprep.subr.mxu0 %v7299_v45  ;;  %2129 = vmatpush1.msra.mxu1 %v2098_v22 }
 0x44f   :  { %1934 = vmatpush1.msra.mxu0 %v7298_v63  ;;  %2130 = vmatprep.subr.mxu1 %v8625_v61  ;;  %v1083_v63 = vadd.f32 %v9537_v8, %v850_v57  ;;  %v7372_v57 = vld [vmem:[%s12195_s0 + $0x1b0] sm:$0xff] }
 0x450   :  { %1935 = vmatprep.subr.mxu0 %v7297_v0  ;;  %2131 = vmatpush1.msra.mxu1 %v2097_v23  ;;  %v1313_v0 = vadd.f32 %v9566_v42, %v1085_v60  ;;  %v7370_v60 = vld [vmem:[%s12195_s0 + $0x1a0] sm:$0xff] }
 0x451   :  { %1936 = vmatpush1.msra.mxu0 %v7296_v43  ;;  %2132 = vmatprep.subr.mxu1 %v8625_v61  ;;  %v1315_v43 = vadd.f32 %v9576_v30, %v1087_v62  ;;  %v7398_v62 = vld [vmem:[%s12195_s0 + $0x258] sm:$0xff] }
 0x452   :  { %1937 = vmatprep.subr.mxu0 %v7295_v40  ;;  %2133 = vmatpush1.msra.mxu1 %v2096_v25 }
 0x453   :  { %1938 = vmatpush1.msra.mxu0 %v7294_v2  ;;  %2134 = vmatprep.subr.mxu1 %v8625_v61 }
 0x454   :  { %1939 = vmatprep.subr.mxu0 %v7293_v4  ;;  %2135 = vmatpush1.msra.mxu1 %v2095_v26  ;;  %v1311_v4 = vadd.f32 %v9554_v19, %v1083_v63  ;;  %v7397_v63 = vld [vmem:[%s12195_s0 + $0x250] sm:$0xff] }
 0x455   :  { %1940 = vmatpush1.msra.mxu0 %v7292_v7  ;;  %2136 = vmatprep.subr.mxu1 %v8625_v61 }
 0x456   :  { %1941 = vmatprep.subr.mxu0 %v7291_v9  ;;  %2137 = vmatpush1.msra.mxu1 %v2094_v27 }
 0x457   :  { %1942 = vmatpush1.msra.mxu0 %v7290_v11  ;;  %2138 = vmatprep.subr.mxu1 %v8625_v61 }
 0x4eb   :  { %v1521_v28 = vpop.f32.mrf.mxu0 }
 0x4ec   :  { %v9746_v29 = vadd.f32 %v1521_v28, %v9549_v18 }
 0x4ed   :  { %v9748_v3 = vpop.f32.mrf.mxu0 }
 0x4ee   :  { %v1539_v14 = vadd.f32 %v9748_v3, %v1311_v4  ;;  %v2007_v3 = vld [vmem:[%s12196_s30] sm:$0xf] }
 0x4ef   :  { %v7366_v4 = vld [vmem:[%s12195_s0 + $0x180] sm:$0xff] }
 0x4f0   :  { %v1527_v31 = vpop.f32.mrf.mxu0 }
 0x4f1   :  { %v9751_v5 = vadd.f32 %v1527_v31, %v9562_v24  ;;  %v7329_v31 = vld [vmem:[%s12196_s30 + $0x4] sm:$0xf] }
 0x4f2   :  { %v1529_v32 = vpop.f32.mrf.mxu0 }
 0x4f3   :  { %v1541_v7 = vadd.f32 %v1529_v32, %v1313_v0  ;;  %v7347_v32 = vld [vmem:[%s12195_s0 + $0x110] sm:$0xff] }
 0x4f4   :  { %v1533_v41 = vpop.f32.mrf.mxu0  ;;  %v7368_v0 = vld [vmem:[%s12195_s0 + $0x190] sm:$0xff] }
 0x4f5   :  { %v1542_v33 = vadd.f32 %v1533_v41, %v9572_v1  ;;  %v2093_v1 = vld [vmem:[%s12195_s0 + $0x18] sm:$0xff]  ;;  %v7346_v41 = vld [vmem:[%s12195_s0 + $0x108] sm:$0xff] }
 0x4f6   :  { %v1535_v34 = vpop.f32.mrf.mxu0  ;;  %2139 = vmatpush1.msra.mxu1 %v2093_v1  ;;  %v7337_v1 = vld [vmem:[%s12195_s0 + $0xc0] sm:$0xff] }
 0x4f7   :  { %2140 = vmatprep.subr.mxu1 %v8625_v61  ;;  %v1749_v51 = vpop.f32.mrf.mxu1  ;;  %v1543_v9 = vadd.f32 %v1535_v34, %v1315_v43  ;;  %v7344_v34 = vld [vmem:[%s12195_s0 + $0xf8] sm:$0xff]  ;;  %v7396_v43 = vld [vmem:[%s12195_s0 + $0x248] sm:$0xff] }
 0x4f8   :  { %v1851_v6 = vpop.f32.mrf.mxu0  ;;  %2141 = vmatpush1.msra.mxu1 %v2092_v38  ;;  %v1766_v30 = vadd.f32 %v1749_v51, %v9746_v29  ;;  %v7336_v38 = vld [vmem:[%s12195_s0 + $0xb8] sm:$0xff]  ;;  %v7349_v51 = vld [vmem:[%s12195_s0 + $0x120] sm:$0xff] }
 0x4f9   :  { %7322 = vmatmul.mubr.msk.f32.vlgmr.msra.gmra.mxu0 %vm982_vm8, %v1851_v6  ;;  %2142 = vmatprep.subr.mxu1 %v8625_v61  ;;  %v1751_v52 = vpop.f32.mrf.mxu1  ;;  %v7343_v6 = vld [vmem:[%s12195_s0 + $0xf0] sm:$0xff] }
 0x4fa   :  { %v8336_v35 = vpop.f32.mrf.mxu0  ;;  %1981 = vmatprep.mubr.f32.mxu0 %v8625_v61  ;;  %2143 = vmatpush1.msra.mxu1 %v2091_v39  ;;  %v1767_v17 = vadd.f32 %v1751_v52, %v1539_v14  ;;  %v7335_v39 = vld [vmem:[%s12195_s0 + $0xb0] sm:$0xff]  ;;  %v7392_v14 = vld [vmem:[%s12195_s0 + $0x228] sm:$0xff] }
 0x4fb   :  { %2144 = vmatprep.subr.mxu1 %v8625_v61  ;;  %v1755_v53 = vpop.f32.mrf.mxu1  ;;  %v7342_v35 = vld [vmem:[%s12195_s0 + $0xe8] sm:$0xff] }
 0x4fc   :  { %v1856_v36 = vpop.f32.mrf.mxu0  ;;  %2145 = vmatpush1.msra.mxu1 %v2090_v46  ;;  %v1768_v13 = vadd.f32 %v1755_v53, %v9751_v5  ;;  %v7348_v5 = vld [vmem:[%s12195_s0 + $0x118] sm:$0xff]  ;;  %v7334_v46 = vld [vmem:[%s12195_s0 + $0xa8] sm:$0xff] }
 0x4fd   :  { %7323 = vmatmul.mubr.msk.f32.gmra.mxu0 %vm982_vm8, %v1856_v36  ;;  %2170 = vmatprep.subr.mxu1 %v8625_v61  ;;  %v1757_v54 = vpop.f32.mrf.mxu1  ;;  %v7341_v36 = vld [vmem:[%s12195_s0 + $0xe0] sm:$0xff] }
 0x4fe   :  { %v8339_v18 = vpop.f32.mrf.mxu0  ;;  %1987 = vmatprep.mubr.f32.mxu0 %v8625_v61  ;;  %2171 = vmatpush2.msra.mxu1 %v2109_v47  ;;  %v1769_v10 = vadd.f32 %v1757_v54, %v1541_v7  ;;  %v7333_v47 = vld [vmem:[%s12195_s0 + $0xa0] sm:$0xff]  ;;  %v7394_v7 = vld [vmem:[%s12195_s0 + $0x238] sm:$0xff] }
 0x4ff   :  { %2172 = vmatprep.subr.mxu1 %v8625_v61  ;;  %v1761_v58 = vpop.f32.mrf.mxu1  ;;  %v7340_v18 = vld [vmem:[%s12195_s0 + $0xd8] sm:$0xff] }
 0x500   :  { %v1861_v37 = vpop.f32.mrf.mxu0  ;;  %2173 = vmatpush2.msra.mxu1 %v2108_v48  ;;  %v1770_v11 = vadd.f32 %v1761_v58, %v1542_v33  ;;  %v7345_v33 = vld [vmem:[%s12195_s0 + $0x100] sm:$0xff]  ;;  %v7352_v48 = vld [vmem:[%s12195_s0 + $0x138] sm:$0xff]  ;;  %v7371_v58 = vld [vmem:[%s12195_s0 + $0x1a8] sm:$0xff] }
 0x501   :  { %7324 = vmatmul.mubr.msk.f32.gmra.mxu0 %vm982_vm8, %v1861_v37  ;;  %2174 = vmatprep.subr.mxu1 %v8625_v61  ;;  %v1763_v40 = vpop.f32.mrf.mxu1  ;;  %v7339_v37 = vld [vmem:[%s12195_s0 + $0xd0] sm:$0xff] }
 0x502   :  { %v8342_v24 = vpop.f32.mrf.mxu0  ;;  %2083 = vmatprep.mubr.f32.mxu0 %v8625_v61  ;;  %2175 = vmatpush2.msra.mxu1 %v2107_v49  ;;  %v1771_v15 = vadd.f32 %v1763_v40, %v1543_v9  ;;  %v7351_v49 = vld [vmem:[%s12195_s0 + $0x130] sm:$0xff]  ;;  %v7367_v40 = vld [vmem:[%s12195_s0 + $0x188] sm:$0xff]  ;;  %v7365_v9 = vld [vmem:[%s12195_s0 + $0x178] sm:$0xff] }
 0x503   :  { %2176 = vmatprep.subr.mxu1 %v8625_v61  ;;  %v7338_v24 = vld [vmem:[%s12195_s0 + $0xc8] sm:$0xff] }
 0x504   :  { %2177 = vmatpush2.msra.mxu1 %v2106_v50  ;;  %v7350_v50 = vld [vmem:[%s12195_s0 + $0x128] sm:$0xff] }
 0x5b9   :  { %v1977_v44 = vpop.f32.mrf.mxu0 }
 0x5ba   :  { %v1994_v23 = vadd.f32 %v1977_v44, %v1766_v30  ;;  %v7373_v44 = vld [vmem:[%s12195_s0 + $0x1b8] sm:$0xff]  ;;  %v7359_v30 = vld [vmem:[%s12195_s0 + $0x148] sm:$0xff] }
 0x5bb   :  { %v1979_v59 = vpop.f32.mrf.mxu0 }
 0x5bc   :  { %v1995_v19 = vadd.f32 %v1979_v59, %v1767_v17  ;;  %v9826_v29 = vmax.f32 %v1994_v23, 0.0  ;;  %v7379_v59 = vld [vmem:[%s12196_s30 + $0xc] sm:$0xf]  ;;  %v7389_v17 = vld [vmem:[%s12195_s0 + $0x210] sm:$0xff]  ;;  %v7377_v23 = vld [vmem:[%s12195_s0 + $0x1d8] sm:$0xff] }
 0x5bd   :  { %v1983_v45 = vpop.f32.mrf.mxu0 }
 0x5be   :  { %v1996_v21 = vadd.f32 %v1983_v45, %v1768_v13  ;;  %v9823_v28 = vmax.f32 %v1995_v19, 0.0  ;;  %v7369_v45 = vld [vmem:[%s12195_s0 + $0x198] sm:$0xff]  ;;  %v7362_v13 = vld [vmem:[%s12195_s0 + $0x160] sm:$0xff] }
 0x5bf   :  { %v1985_v2 = vpop.f32.mrf.mxu0  ;;  %v7358_v19 = vld [vmem:[%s12195_s0 + $0x140] sm:$0xff] }
 0x5c0   :  { %v1997_v42 = vadd.f32 %v1985_v2, %v1769_v10  ;;  %v9819_v27 = vmax.f32 %v1996_v21, 0.0  ;;  %v7395_v2 = vld [vmem:[%s12195_s0 + $0x240] sm:$0xff]  ;;  %v7363_v10 = vld [vmem:[%s12195_s0 + $0x168] sm:$0xff] }
 0x5c1   :  { %v1989_v12 = vpop.f32.mrf.mxu0  ;;  %v7387_v21 = vld [vmem:[%s12195_s0 + $0x200] sm:$0xff] }
 0x5c2   :  { %v1998_v16 = vadd.f32 %v1989_v12, %v1770_v11  ;;  %v9813_v26 = vmax.f32 %v1997_v42, 0.0  ;;  %v7393_v11 = vld [vmem:[%s12195_s0 + $0x230] sm:$0xff] }
 0x5c3   :  { %v1991_v8 = vpop.f32.mrf.mxu0  ;;  %v7364_v12 = vld [vmem:[%s12195_s0 + $0x170] sm:$0xff] }
 0x5c4   :  { %v1999_v20 = vadd.f32 %v1991_v8, %v1771_v15  ;;  %v9811_v25 = vmax.f32 %v1998_v16, 0.0  ;;  %v7391_v15 = vld [vmem:[%s12195_s0 + $0x220] sm:$0xff]  ;;  %v7390_v16 = vld [vmem:[%s12195_s0 + $0x218] sm:$0xff]  ;;  %v7360_v42 = vld [vmem:[%s12195_s0 + $0x150] sm:$0xff] }
 0x5c5   :  { %v7361_v8 = vld [vmem:[%s12195_s0 + $0x158] sm:$0xff] }
 0x5c6   :  { %v9809_v22 = vmax.f32 %v1999_v20, 0.0  ;;  %v7388_v20 = vld [vmem:[%s12195_s0 + $0x208] sm:$0xff] }
 0x5c8   :  { %7325 = vmatprep.subr.msk.mxu0 %vm2012_vm9, %v9809_v22  ;;  %7355 = vmatprep.subr.msk.mxu1 %vm2012_vm9, %v9809_v22 }
 0x5c9   :  { %7326 = vmatpush1.msk.msra.mxu0 %vm2012_vm9, %v9811_v25 }
 0x5ca   :  { %2047 = vmatprep.subr.mxu0 %v9813_v26 }
 0x5cb   :  { %2048 = vmatpush1.msra.mxu0 %v9819_v27 }
 0x5cc   :  { %2049 = vmatprep.subr.mxu0 %v9823_v28 }
 0x5cd   :  { %2050 = vmatpush1.msra.mxu0 %v9826_v29 }
 0x5ce   :  { %7327 = vmatmul.mubr.msk.f32.vlgmr.msra.gmra.mxu0 %vm2008_vm10, %v2007_v3  ;;  %7330 = vmatprep.subr.msk.mxu0 %vm2012_vm9, %v9809_v22  ;;  %v7376_v3 = vld [vmem:[%s12195_s0 + $0x1d0] sm:$0xff] }
 0x5cf   :  { %7331 = vmatpush1.msk.msra.mxu0 %vm2012_vm9, %v9811_v25  ;;  %2254 = vmatprep.mubr.f32.mxu0 %v8625_v61 }
 0x5d0   :  { %2218 = vmatprep.subr.mxu0 %v9813_v26 }
 0x5d1   :  { %2219 = vmatpush1.msra.mxu0 %v9819_v27 }
 0x5d2   :  { %2220 = vmatprep.subr.mxu0 %v9823_v28 }
 0x5d3   :  { %2221 = vmatpush1.msra.mxu0 %v9826_v29 }
 0x5d4   :  { %7332 = vmatmul.mubr.msk.f32.vlgmr.msra.gmra.mxu0 %vm2008_vm10, %v7329_v31  ;;  %2285 = vmatprep.subr.mxu0 %v8625_v61  ;;  %v7375_v31 = vld [vmem:[%s12195_s0 + $0x1c8] sm:$0xff] }
 0x5d5   :  { %2286 = vmatpush1.msra.mxu0 %v7348_v5  ;;  %v7374_v5 = vld [vmem:[%s12195_s0 + $0x1c0] sm:$0xff] }
 0x5d6   :  { %2287 = vmatprep.subr.mxu0 %v8625_v61 }
 0x5d7   :  { %2288 = vmatpush1.msra.mxu0 %v7347_v32  ;;  %v7386_v32 = vld [vmem:[%s12195_s0 + $0x1f8] sm:$0xff] }
 0x5d8   :  { %2289 = vmatprep.subr.mxu0 %v8625_v61 }
 0x5d9   :  { %2290 = vmatpush1.msra.mxu0 %v7346_v41  ;;  %v7385_v41 = vld [vmem:[%s12195_s0 + $0x1f0] sm:$0xff] }
 0x5da   :  { %2291 = vmatprep.subr.mxu0 %v8625_v61 }
 0x5db   :  { %2292 = vmatpush1.msra.mxu0 %v7345_v33  ;;  %v7384_v33 = vld [vmem:[%s12195_s0 + $0x1e8] sm:$0xff] }
 0x5dc   :  { %2293 = vmatprep.subr.mxu0 %v8625_v61 }
 0x5dd   :  { %2294 = vmatpush1.msra.mxu0 %v7344_v34  ;;  %v7402_v34 = vld [vmem:[%s12195_s0 + $0x278] sm:$0xff] }
 0x5de   :  { %2295 = vmatprep.subr.mxu0 %v8625_v61 }
 0x5df   :  { %2296 = vmatpush1.msra.mxu0 %v7343_v6  ;;  %v7401_v6 = vld [vmem:[%s12195_s0 + $0x270] sm:$0xff] }
 0x5e0   :  { %2297 = vmatprep.subr.mxu0 %v8625_v61 }
 0x5e1   :  { %2298 = vmatpush1.msra.mxu0 %v7342_v35  ;;  %v7400_v35 = vld [vmem:[%s12195_s0 + $0x268] sm:$0xff] }
 0x5e2   :  { %2299 = vmatprep.subr.mxu0 %v8625_v61 }
 0x5e3   :  { %2300 = vmatpush1.msra.mxu0 %v7341_v36  ;;  %v7399_v36 = vld [vmem:[%s12195_s0 + $0x260] sm:$0xff] }
 0x5e4   :  { %2301 = vmatprep.subr.mxu0 %v8625_v61 }
 0x5e5   :  { %2302 = vmatpush1.msra.mxu0 %v7340_v18 }
 0x5e6   :  { %2303 = vmatprep.subr.mxu0 %v8625_v61 }
 0x5e7   :  { %2304 = vmatpush1.msra.mxu0 %v7339_v37 }
 0x5e8   :  { %2305 = vmatprep.subr.mxu0 %v8625_v61 }
 0x5e9   :  { %2306 = vmatpush1.msra.mxu0 %v7338_v24  ;;  %v2006_v24 = vld [vmem:[%s12197_s5] sm:$0xf] }
 0x5ea   :  { %2307 = vmatprep.subr.mxu0 %v8625_v61 }
 0x5eb   :  { %2308 = vmatpush1.msra.mxu0 %v7337_v1 }
 0x5ec   :  { %2309 = vmatprep.subr.mxu0 %v8625_v61 }
 0x5ed   :  { %2310 = vmatpush1.msra.mxu0 %v7336_v38 }
 0x5ee   :  { %2311 = vmatprep.subr.mxu0 %v8625_v61 }
 0x5ef   :  { %2312 = vmatpush1.msra.mxu0 %v7335_v39 }
 0x5f0   :  { %2313 = vmatprep.subr.mxu0 %v8625_v61 }
 0x5f1   :  { %2314 = vmatpush1.msra.mxu0 %v7334_v46 }
 0x5f2   :  { %2315 = vmatprep.subr.mxu0 %v8625_v61 }
 0x5f3   :  { %2316 = vmatpush1.msra.mxu0 %v7333_v47 }
 0x5f4   :  { %2341 = vmatprep.subr.mxu0 %v8625_v61 }
 0x5f5   :  { %2342 = vmatpush2.msra.mxu0 %v7352_v48 }
 0x5f6   :  { %2343 = vmatprep.subr.mxu0 %v8625_v61 }
 0x5f7   :  { %2344 = vmatpush2.msra.mxu0 %v7351_v49 }
 0x5f8   :  { %2345 = vmatprep.subr.mxu0 %v8625_v61 }
 0x5f9   :  { %2346 = vmatpush2.msra.mxu0 %v7350_v50  ;;  %v7404_v50 = vld [vmem:[%s12196_s30 + $0x10] sm:$0xf] }
 0x5fa   :  { %2347 = vmatprep.subr.mxu0 %v8625_v61 }
 0x5fb   :  { %2348 = vmatpush2.msra.mxu0 %v7349_v51 }
 0x5fc   :  { %7380 = vmatprep.subr.msk.mxu0 %vm2012_vm9, %v9809_v22 }
 0x68e   :  { %v2085_v52 = vpop.f32.mrf.mxu0 }
 0x690   :  { %v2087_v53 = vpop.f32.mrf.mxu0 }
 0x691   :  { %7328 = vmatprep.mubr.msk.f32.mxu1 %vm2110_vm11, %v2087_v53  ;;  %v7417_v53 = vld [vmem:[%s12195_s0 + $0x2c8] sm:$0xff] }
 0x692   :  { %2179 = vmatmul.mubr.f32.vlgmr.msra.gmra.mxu1 %v2085_v52  ;;  %v7418_v52 = vld [vmem:[%s12195_s0 + $0x2d0] sm:$0xff] }
 0x693   :  { %7356 = vmatpush1.msk.msra.mxu1 %vm2012_vm9, %v9811_v25  ;;  %2425 = vmatprep.mubr.f32.mxu1 %v8625_v61 }
 0x694   :  { %2389 = vmatprep.subr.mxu1 %v9813_v26  ;;  %v2256_v54 = vpop.f32.mrf.mxu0 }
 0x695   :  { %2390 = vmatpush1.msra.mxu1 %v9819_v27 }
 0x696   :  { %2391 = vmatprep.subr.mxu1 %v9823_v28  ;;  %v2258_v56 = vpop.f32.mrf.mxu0 }
 0x697   :  { %2392 = vmatpush1.msra.mxu1 %v9826_v29  ;;  %7353 = vmatprep.mubr.msk.f32.mxu0 %vm2110_vm11, %v2258_v56  ;;  %v7414_v56 = vld [vmem:[%s12195_s0 + $0x2b0] sm:$0xff] }
 0x698   :  { %7357 = vmatmul.mubr.msk.f32.vlgmr.msra.gmra.mxu1 %vm2008_vm10, %v7354_v55  ;;  %2456 = vmatprep.subr.mxu1 %v8625_v61  ;;  %v7415_v55 = vld [vmem:[%s12195_s0 + $0x2b8] sm:$0xff] }
 0x699   :  { %2350 = vmatmul.mubr.f32.vlgmr.msra.gmra.mxu0 %v2256_v54  ;;  %2457 = vmatpush1.msra.mxu1 %v7373_v44  ;;  %v7416_v54 = vld [vmem:[%s12195_s0 + $0x2c0] sm:$0xff]  ;;  %v7413_v44 = vld [vmem:[%s12195_s0 + $0x2a8] sm:$0xff] }
 0x69a   :  { %7381 = vmatpush1.msk.msra.mxu0 %vm2012_vm9, %v9811_v25  ;;  %2458 = vmatprep.subr.mxu1 %v8625_v61 }
 0x69b   :  { %2560 = vmatprep.subr.mxu0 %v9813_v26  ;;  %2459 = vmatpush1.msra.mxu1 %v7372_v57  ;;  %v7412_v57 = vld [vmem:[%s12195_s0 + $0x2a0] sm:$0xff] }
 0x69c   :  { %2561 = vmatpush1.msra.mxu0 %v9819_v27  ;;  %2460 = vmatprep.subr.mxu1 %v8625_v61 }
 0x69d   :  { %2562 = vmatprep.subr.mxu0 %v9823_v28  ;;  %2461 = vmatpush1.msra.mxu1 %v7371_v58  ;;  %v7411_v58 = vld [vmem:[%s12195_s0 + $0x298] sm:$0xff] }
 0x69e   :  { %2563 = vmatpush1.msra.mxu0 %v9826_v29  ;;  %2596 = vmatprep.mubr.f32.mxu0 %v8625_v61 }
 0x69f   :  { %2462 = vmatprep.subr.mxu1 %v8625_v61  ;;  %7382 = vmatmul.mubr.msk.f32.vlgmr.msra.gmra.mxu0 %vm2008_vm10, %v7379_v59  ;;  %v7410_v59 = vld [vmem:[%s12195_s0 + $0x290] sm:$0xff] }
 0x6a0   :  { %2463 = vmatpush1.msra.mxu1 %v7370_v60  ;;  %2627 = vmatprep.subr.mxu0 %v8625_v61  ;;  %v7409_v60 = vld [vmem:[%s12195_s0 + $0x288] sm:$0xff] }
 0x6a1   :  { %2464 = vmatprep.subr.mxu1 %v8625_v61  ;;  %2628 = vmatpush1.msra.mxu0 %v7398_v62  ;;  %v7408_v62 = vld [vmem:[%s12195_s0 + $0x280] sm:$0xff] }
 0x6a2   :  { %2465 = vmatpush1.msra.mxu1 %v7369_v45  ;;  %2629 = vmatprep.subr.mxu0 %v8625_v61  ;;  %v7427_v45 = vld [vmem:[%s12195_s0 + $0x318] sm:$0xff] }
 0x6a3   :  { %2466 = vmatprep.subr.mxu1 %v8625_v61  ;;  %2630 = vmatpush1.msra.mxu0 %v7397_v63  ;;  %v7426_v63 = vld [vmem:[%s12195_s0 + $0x310] sm:$0xff] }
 0x6a4   :  { %2467 = vmatpush1.msra.mxu1 %v7368_v0  ;;  %2631 = vmatprep.subr.mxu0 %v8625_v61  ;;  %v7425_v0 = vld [vmem:[%s12195_s0 + $0x308] sm:$0xff] }
 0x6a5   :  { %2468 = vmatprep.subr.mxu1 %v8625_v61  ;;  %2632 = vmatpush1.msra.mxu0 %v7396_v43  ;;  %v7424_v43 = vld [vmem:[%s12195_s0 + $0x300] sm:$0xff] }
 0x6a6   :  { %2469 = vmatpush1.msra.mxu1 %v7367_v40  ;;  %2633 = vmatprep.subr.mxu0 %v8625_v61 }
 0x6a7   :  { %2470 = vmatprep.subr.mxu1 %v8625_v61  ;;  %2634 = vmatpush1.msra.mxu0 %v7395_v2 }
 0x6a8   :  { %2471 = vmatpush1.msra.mxu1 %v7366_v4  ;;  %2635 = vmatprep.subr.mxu0 %v8625_v61 }
 0x6a9   :  { %2472 = vmatprep.subr.mxu1 %v8625_v61  ;;  %2636 = vmatpush1.msra.mxu0 %v7394_v7 }
 0x6aa   :  { %2473 = vmatpush1.msra.mxu1 %v7365_v9  ;;  %2637 = vmatprep.subr.mxu0 %v8625_v61 }
 0x6ab   :  { %2474 = vmatprep.subr.mxu1 %v8625_v61  ;;  %2638 = vmatpush1.msra.mxu0 %v7393_v11 }
 0x6ac   :  { %2475 = vmatpush1.msra.mxu1 %v7364_v12  ;;  %2639 = vmatprep.subr.mxu0 %v8625_v61 }
 0x6ad   :  { %2476 = vmatprep.subr.mxu1 %v8625_v61  ;;  %2640 = vmatpush1.msra.mxu0 %v7392_v14 }
 0x6ae   :  { %2477 = vmatpush1.msra.mxu1 %v7363_v10  ;;  %2641 = vmatprep.subr.mxu0 %v8625_v61  ;;  %v2949_v10 = vld [vmem:[%s12151_s11] sm:$0xff] }
 0x6af   :  { %2478 = vmatprep.subr.mxu1 %v8625_v61  ;;  %2642 = vmatpush1.msra.mxu0 %v7391_v15 }
 0x6b0   :  { %2479 = vmatpush1.msra.mxu1 %v7362_v13  ;;  %2643 = vmatprep.subr.mxu0 %v8625_v61 }
 0x6b1   :  { %2480 = vmatprep.subr.mxu1 %v8625_v61  ;;  %2644 = vmatpush1.msra.mxu0 %v7390_v16 }
 0x6b2   :  { %2481 = vmatpush1.msra.mxu1 %v7361_v8  ;;  %2645 = vmatprep.subr.mxu0 %v8625_v61 }
 0x6b3   :  { %2482 = vmatprep.subr.mxu1 %v8625_v61  ;;  %2646 = vmatpush1.msra.mxu0 %v7389_v17  ;;  %v2871_v17 = vld [vmem:[%s12198_s28] sm:$0x3] }
 0x6b4   :  { %2483 = vmatpush1.msra.mxu1 %v7360_v42  ;;  %2647 = vmatprep.subr.mxu0 %v8625_v61  ;;  %v7444_v42 = vld [vmem:[%s12154_s14 + $0x18] sm:$0xff] }
 0x6b5   :  { %2484 = vmatprep.subr.mxu1 %v8625_v61  ;;  %2648 = vmatpush1.msra.mxu0 %v7388_v20  ;;  %v7443_v20 = vld [vmem:[%s12154_s14 + $0x10] sm:$0xff] }
 0x6b6   :  { %2485 = vmatpush1.msra.mxu1 %v7359_v30  ;;  %2649 = vmatprep.subr.mxu0 %v8625_v61 }
 0x6b7   :  { %2486 = vmatprep.subr.mxu1 %v8625_v61  ;;  %2650 = vmatpush1.msra.mxu0 %v7387_v21 }
 0x6b8   :  { %2487 = vmatpush1.msra.mxu1 %v7358_v19  ;;  %2651 = vmatprep.subr.mxu0 %v8625_v61  ;;  %v7432_v19 = vld [vmem:[%s12198_s28 + $0x2] sm:$0x3] }
 0x6b9   :  { %2512 = vmatprep.subr.mxu1 %v8625_v61  ;;  %2652 = vmatpush1.msra.mxu0 %v7386_v32  ;;  %v7465_v32 = vld [vmem:[%s12154_s14 + $0x30] sm:$0xff] }
 0x6ba   :  { %2513 = vmatpush2.msra.mxu1 %v7377_v23  ;;  %2653 = vmatprep.subr.mxu0 %v8625_v61 }
 0x6bb   :  { %2514 = vmatprep.subr.mxu1 %v8625_v61  ;;  %2654 = vmatpush1.msra.mxu0 %v7385_v41  ;;  %v7447_v41 = vld [vmem:[%s12153_s13 + $0x20] sm:$0xff] }
 0x6bc   :  { %2515 = vmatpush2.msra.mxu1 %v7376_v3  ;;  %2655 = vmatprep.subr.mxu0 %v8625_v61 }
 0x6bd   :  { %2516 = vmatprep.subr.mxu1 %v8625_v61  ;;  %2656 = vmatpush1.msra.mxu0 %v7384_v33  ;;  %v7448_v33 = vld [vmem:[%s12153_s13 + $0x28] sm:$0x3] }
 0x6be   :  { %2517 = vmatpush2.msra.mxu1 %v7375_v31  ;;  %2657 = vmatprep.subr.mxu0 %v8625_v61  ;;  %v7446_v31 = vld [vmem:[%s12153_s13 + $0x18] sm:$0xff] }
 0x6bf   :  { %2518 = vmatprep.subr.mxu1 %v8625_v61 }
 0x6c0   :  { %2519 = vmatpush2.msra.mxu1 %v7374_v5  ;;  %v7466_v5 = vld [vmem:[%s12154_s14 + $0x38] sm:$0xff] }
 0x6c1   :  { %7405 = vmatprep.subr.msk.mxu1 %vm2012_vm9, %v9809_v22  ;;  %v7383_v22 = vld [vmem:[%s12195_s0 + $0x1e0] sm:$0xff] }
 0x6c2   :  { %2658 = vmatpush1.msra.mxu0 %v7383_v22  ;;  %v7435_v22 = vld [vmem:[%s12151_s11 + $0x8] sm:$0xff] }
 0x6c3   :  { %2683 = vmatprep.subr.mxu0 %v8625_v61 }
 0x6c4   :  { %2684 = vmatpush2.msra.mxu0 %v7402_v34  ;;  %v3185_v34 = vld [vmem:[%s12154_s14 + $0x8] sm:$0xff] }
 0x6c5   :  { %2685 = vmatprep.subr.mxu0 %v8625_v61 }
 0x6c6   :  { %2686 = vmatpush2.msra.mxu0 %v7401_v6 }
 0x6c7   :  { %2687 = vmatprep.subr.mxu0 %v8625_v61 }
 0x6c8   :  { %2688 = vmatpush2.msra.mxu0 %v7400_v35 }
 0x6c9   :  { %2689 = vmatprep.subr.mxu0 %v8625_v61 }
 0x6ca   :  { %2690 = vmatpush2.msra.mxu0 %v7399_v36  ;;  %v3184_v36 = vld [vmem:[%s12154_s14] sm:$0xff] }
 0x6cb   :  { %8348 = vmatprep.subr.mxu0 %v8625_v61 }
 0x752   :  { %v2180_v18 = vpop.f32.mrf.mxu1 }
 0x753   :  { %v2184_v1 = vadd.f32 %v2180_v18, %v2006_v24 }
 0x754   :  { %v2182_v37 = vpop.f32.mrf.mxu1 }
 0x758   :  { %v2427_v38 = vpop.f32.mrf.mxu1 }
 0x759   :  { %v2351_v39 = vpop.f32.mrf.mxu0 }
 0x75a   :  { %v10120_v46 = vadd.f32 %v2351_v39, %v2184_v1  ;;  %v2429_v47 = vpop.f32.mrf.mxu1 }
 0x75b   :  { %7378 = vmatprep.mubr.msk.f32.mxu1 %vm2110_vm11, %v2429_v47  ;;  %v2353_v48 = vpop.f32.mrf.mxu0 }
 0x75c   :  { %2521 = vmatmul.mubr.f32.vlgmr.msra.gmra.mxu1 %v2427_v38 }
 0x75d   :  { %7406 = vmatpush1.msk.msra.mxu1 %vm2012_vm9, %v9811_v25  ;;  %2767 = vmatprep.mubr.f32.mxu1 %v8625_v61  ;;  %v7423_v25 = vld [vmem:[%s12195_s0 + $0x2f8] sm:$0xff] }
 0x75e   :  { %2731 = vmatprep.subr.mxu1 %v9813_v26  ;;  %v7422_v26 = vld [vmem:[%s12195_s0 + $0x2f0] sm:$0xff] }
 0x75f   :  { %v2598_v49 = vpop.f32.mrf.mxu0  ;;  %2732 = vmatpush1.msra.mxu1 %v9819_v27  ;;  %v7421_v27 = vld [vmem:[%s12195_s0 + $0x2e8] sm:$0xff] }
 0x760   :  { %2733 = vmatprep.subr.mxu1 %v9823_v28  ;;  %v7420_v28 = vld [vmem:[%s12195_s0 + $0x2e0] sm:$0xff] }
 0x761   :  { %v2600_v51 = vpop.f32.mrf.mxu0  ;;  %2734 = vmatpush1.msra.mxu1 %v9826_v29  ;;  %v7419_v29 = vld [vmem:[%s12195_s0 + $0x2d8] sm:$0xff] }
 0x762   :  { %7403 = vmatprep.mubr.msk.f32.mxu0 %vm2110_vm11, %v2600_v51  ;;  %7407 = vmatmul.mubr.msk.f32.vlgmr.msra.gmra.mxu1 %vm2008_vm10, %v7404_v50  ;;  %v2870_v50 = vld [vmem:[%s12152_s12] sm:$0x3] }
 0x763   :  { %2692 = vmatmul.mubr.f32.vlgmr.msra.gmra.mxu0 %v2598_v49  ;;  %2798 = vmatprep.subr.mxu1 %v8625_v61 }
 0x764   :  { %2799 = vmatpush1.msra.mxu1 %v7423_v25  ;;  %8350 = vmatprep.mubr.msk.f32.mxu0 %vm8626_vm4, %v8625_v61 }
 0x765   :  { %2800 = vmatprep.subr.mxu1 %v8625_v61  ;;  %8349 = vmatpush3.msra.mxu0 %v2949_v10  ;;  %v4139_v10 = vld [vmem:[%s12157_s17 + $0xe8] sm:$0xff] }
 0x766   :  { %2801 = vmatpush1.msra.mxu1 %v7422_v26  ;;  %8353 = vmatprep.subr.mxu0 %v8625_v61 }
 0x767   :  { %2802 = vmatprep.subr.mxu1 %v8625_v61 }
 0x768   :  { %2803 = vmatpush1.msra.mxu1 %v7421_v27 }
 0x769   :  { %2804 = vmatprep.subr.mxu1 %v8625_v61 }
 0x76a   :  { %2805 = vmatpush1.msra.mxu1 %v7420_v28 }
 0x76b   :  { %2806 = vmatprep.subr.mxu1 %v8625_v61 }
 0x76c   :  { %2807 = vmatpush1.msra.mxu1 %v7419_v29 }
 0x76d   :  { %2808 = vmatprep.subr.mxu1 %v8625_v61 }
 0x76e   :  { %2809 = vmatpush1.msra.mxu1 %v7418_v52  ;;  %v3259_v52 = vld [vmem:[%s12153_s13] sm:$0xff] }
 0x76f   :  { %2810 = vmatprep.subr.mxu1 %v8625_v61 }
 0x770   :  { %2811 = vmatpush1.msra.mxu1 %v7417_v53  ;;  %v7455_v53 = vld [vmem:[%s12154_s14 + $0x28] sm:$0xff] }
 0x771   :  { %2812 = vmatprep.subr.mxu1 %v8625_v61 }
 0x772   :  { %2813 = vmatpush1.msra.mxu1 %v7416_v54  ;;  %v7454_v54 = vld [vmem:[%s12154_s14 + $0x20] sm:$0xff] }
 0x773   :  { %2814 = vmatprep.subr.mxu1 %v8625_v61 }
 0x774   :  { %2815 = vmatpush1.msra.mxu1 %v7415_v55  ;;  %v3260_v55 = vld [vmem:[%s12153_s13 + $0x8] sm:$0xff] }
 0x775   :  { %2816 = vmatprep.subr.mxu1 %v8625_v61 }
 0x776   :  { %2817 = vmatpush1.msra.mxu1 %v7414_v56  ;;  %v3261_v56 = vld [vmem:[%s12153_s13 + $0x10] sm:$0x3] }
 0x777   :  { %2818 = vmatprep.subr.mxu1 %v8625_v61 }
 0x778   :  { %2819 = vmatpush1.msra.mxu1 %v7413_v44  ;;  %v7468_v44 = vld [vmem:[%s12153_s13 + $0x48] sm:$0xff] }
 0x779   :  { %2820 = vmatprep.subr.mxu1 %v8625_v61 }
 0x77a   :  { %2821 = vmatpush1.msra.mxu1 %v7412_v57  ;;  %v7469_v57 = vld [vmem:[%s12153_s13 + $0x50] sm:$0xff] }
 0x77b   :  { %2822 = vmatprep.subr.mxu1 %v8625_v61 }
 0x77c   :  { %2823 = vmatpush1.msra.mxu1 %v7411_v58  ;;  %v7470_v58 = vld [vmem:[%s12153_s13 + $0x58] sm:$0x3] }
 0x77d   :  { %2824 = vmatprep.subr.mxu1 %v8625_v61 }
 0x77e   :  { %2825 = vmatpush1.msra.mxu1 %v7410_v59 }
 0x77f   :  { %2826 = vmatprep.subr.mxu1 %v8625_v61 }
 0x780   :  { %2827 = vmatpush1.msra.mxu1 %v7409_v60 }
 0x781   :  { %2828 = vmatprep.subr.mxu1 %v8625_v61 }
 0x782   :  { %2829 = vmatpush1.msra.mxu1 %v7408_v62 }
 0x783   :  { %2854 = vmatprep.subr.mxu1 %v8625_v61 }
 0x784   :  { %2855 = vmatpush2.msra.mxu1 %v7427_v45 }
 0x785   :  { %2856 = vmatprep.subr.mxu1 %v8625_v61 }
 0x786   :  { %2857 = vmatpush2.msra.mxu1 %v7426_v63 }
 0x787   :  { %2858 = vmatprep.subr.mxu1 %v8625_v61 }
 0x788   :  { %2859 = vmatpush2.msra.mxu1 %v7425_v0 }
 0x789   :  { %2860 = vmatprep.subr.mxu1 %v8625_v61 }
 0x78a   :  { %2861 = vmatpush2.msra.mxu1 %v7424_v43 }
 0x78b   :  { %8343 = vmatprep.subr.mxu1 %v8625_v61 }
 0x81c   :  { %v2522_v40 = vpop.f32.mrf.mxu1 }
 0x81d   :  { %v2526_v2 = vadd.f32 %v2522_v40, %v10120_v46 }
 0x81e   :  { %v2524_v4 = vpop.f32.mrf.mxu1 }
 0x81f   :  { %v7477_v4 = vld [vmem:[%s12154_s14 + $0x48] sm:$0xff] }
 0x822   :  { %v2769_v7 = vpop.f32.mrf.mxu1 }
 0x823   :  { %v2693_v9 = vpop.f32.mrf.mxu0 }
 0x824   :  { %v2697_v11 = vadd.f32 %v2693_v9, %v2526_v2  ;;  %v2771_v12 = vpop.f32.mrf.mxu1  ;;  %v7457_v2 = vld [vmem:[%s12153_s13 + $0x30] sm:$0xff]  ;;  %v7458_v9 = vld [vmem:[%s12153_s13 + $0x38] sm:$0xff] }
 0x825   :  { %7428 = vmatprep.mubr.msk.f32.mxu1 %vm2110_vm11, %v2771_v12  ;;  %v2695_v14 = vpop.f32.mrf.mxu0  ;;  %v4141_v12 = vld [vmem:[%s12157_s17 + $0xf8] sm:$0xff] }
 0x826   :  { %2863 = vmatmul.mubr.f32.vlgmr.msra.gmra.mxu1 %v2769_v7  ;;  %v7476_v7 = vld [vmem:[%s12154_s14 + $0x40] sm:$0xff]  ;;  %v4140_v14 = vld [vmem:[%s12157_s17 + $0xf0] sm:$0xff] }
 0x827   :  { %8345 = vmatprep.mubr.msk.f32.mxu1 %vm8626_vm4, %v8625_v61 }
 0x8e6   :  { %v2864_v15 = vpop.f32.mrf.mxu1 }
 0x8e7   :  { %v2868_v13 = vadd.f32 %v2864_v15, %v2697_v11  ;;  %v7459_v11 = vld [vmem:[%s12153_s13 + $0x40] sm:$0x3] }
 0x8e8   :  { %v2866_v16 = vpop.f32.mrf.mxu1  ;;  %v4138_v15 = vld [vmem:[%s12157_s17 + $0xe0] sm:$0xff] }
 0x8e9   :  { %v10226_v8 = vmax.f32 %v2868_v13, 0.0  ;;  %v4137_v13 = vld [vmem:[%s12157_s17 + $0xd8] sm:$0xff]  ;;  %v4136_v16 = vld [vmem:[%s12157_s17 + $0xd0] sm:$0xff] }
 0x8eb   :  { %8344 = vmatpush3.msk.msra.mxu1 %vm2012_vm9, %v10226_v8 }
 0x8ec   :  { %8346 = vmatmul.mubr.msk.f32.vlgmr.msra.gmra.mxu1 %vm2872_vm12, %v2871_v17  ;;  %3399 = vmatprep.subr.mxu1 %v7444_v42  ;;  %v4134_v17 = vld [vmem:[%s12157_s17 + $0xc0] sm:$0xff]  ;;  %v4133_v42 = vld [vmem:[%s12157_s17 + $0xb8] sm:$0xff] }
 0x8ed   :  { %3400 = vmatpush1.msra.mxu1 %v7443_v20  ;;  %3433 = vmatprep.mubr.f32.mxu1 %v8625_v61  ;;  %v4132_v20 = vld [vmem:[%s12157_s17 + $0xb0] sm:$0xff] }
 0x8f0   :  { %7445 = vmatmul.mubr.msk.f32.vlgmr.msra.gmra.mxu1 %vm2950_vm13, %v10226_v8 }
 0x8f1   :  { %3523 = vmatprep.mubr.f32.mxu1 %v8625_v61 }
 0x9ac   :  { %v2945_v30 = vpop.f32.mrf.mxu1 }
 0x9ad   :  { %8351 = vmatmul.mubr.msk.f32.vlgmr.msra.gmra.mxu0 %vm2950_vm13, %v2945_v30  ;;  %v4131_v30 = vld [vmem:[%s12157_s17 + $0xa8] sm:$0xff] }
 0x9ae   :  { %8354 = vmatpush3.msk.msra.mxu0 %vm2012_vm9, %v10226_v8  ;;  %v8347_v21 = vpop.f32.mrf.mxu1  ;;  %8355 = vmatprep.mubr.msk.f32.mxu0 %vm8626_vm4, %v8625_v61 }
 0x9af   :  { %8358 = vmatprep.subr.mxu0 %v8625_v61  ;;  %v4130_v21 = vld [vmem:[%s12157_s17 + $0xa0] sm:$0xff] }
 0x9b0   :  { %v3435_v23 = vpop.f32.mrf.mxu1 }
 0x9b1   :  { %8356 = vmatmul.mubr.msk.f32.vlgmr.msra.gmra.mxu0 %vm2872_vm12, %v7432_v19  ;;  %v4129_v19 = vld [vmem:[%s12157_s17 + $0x98] sm:$0xff] }
 0x9b2   :  { %v3437_v3 = vpop.f32.mrf.mxu1  ;;  %8360 = vmatprep.mubr.msk.f32.mxu0 %vm8626_vm4, %v8625_v61  ;;  %8359 = vmatpush3.msra.mxu0 %v7435_v22  ;;  %v4121_v22 = vld [vmem:[%s12157_s17 + $0x58] sm:$0xff]  ;;  %vm5727_vm4 = vcmask 474112  }
 0x9b3   :  { %7449 = vmatprep.subr.msk.mxu1 %vm2012_vm9, %v3437_v3  ;;  %3218 = vmatprep.subr.mxu0 %v3185_v34  ;;  %v4127_v3 = vld [vmem:[%s12157_s17 + $0x88] sm:$0xff]  ;;  %v4120_v34 = vld [vmem:[%s12157_s17 + $0x50] sm:$0xff] }
 0x9b4   :  { %7450 = vmatpush1.msk.msra.mxu1 %vm2012_vm9, %v3435_v23  ;;  %v4128_v23 = vld [vmem:[%s12157_s17 + $0x90] sm:$0xff] }
 0x9b5   :  { %7451 = vmatmul.mubr.msk.f32.vlgmr.msra.gmra.mxu1 %vm2872_vm12, %v7446_v31  ;;  %3763 = vmatprep.subr.mxu1 %v7466_v5  ;;  %v4126_v31 = vld [vmem:[%s12157_s17 + $0x80] sm:$0xff]  ;;  %v4125_v5 = vld [vmem:[%s12157_s17 + $0x78] sm:$0xff] }
 0x9b6   :  { %3529 = vmatprep.mubr.f32.mxu1 %v8625_v61  ;;  %3764 = vmatpush1.msra.mxu1 %v7465_v32  ;;  %v4124_v32 = vld [vmem:[%s12157_s17 + $0x70] sm:$0xff] }
 0x9b9   :  { %7452 = vmatmul.mubr.msk.f32.gmra.mxu1 %vm2872_vm12, %v7447_v41  ;;  %v4123_v41 = vld [vmem:[%s12157_s17 + $0x68] sm:$0xff] }
 0x9ba   :  { %3535 = vmatprep.mubr.f32.mxu1 %v8625_v61 }
 0x9bd   :  { %7453 = vmatmul.mubr.msk.f32.gmra.mxu1 %vm2872_vm12, %v7448_v33  ;;  %v4122_v33 = vld [vmem:[%s12157_s17 + $0x60] sm:$0xff] }
 0x9be   :  { %3797 = vmatprep.mubr.f32.mxu1 %v8625_v61 }
 0x9c1   :  { %7467 = vmatmul.mubr.msk.f32.vlgmr.msra.gmra.mxu1 %vm2950_vm13, %v10226_v8 }
 0x9c2   :  { %3887 = vmatprep.mubr.f32.mxu1 %v8625_v61 }
 0xa6d   :  { %v3020_v6 = vpop.f32.mrf.mxu0 }
 0xa6e   :  { %v3024_v51 = vadd.f32 %v3020_v6, %v2870_v50  ;;  %v4119_v6 = vld [vmem:[%s12157_s17 + $0x48] sm:$0xff]  ;;  %v4112_v50 = vld [vmem:[%s12157_s17 + $0x10] sm:$0xff] }
 0xa6f   :  { %v8352_v35 = vpop.f32.mrf.mxu0 }
 0xa70   :  { %v4118_v35 = vld [vmem:[%s12157_s17 + $0x40] sm:$0xff] }
 0xa71   :  { %v3096_v18 = vpop.f32.mrf.mxu0 }
 0xa72   :  { %8361 = vmatmul.mubr.msk.f32.vlgmr.msra.gmra.mxu0 %vm2950_vm13, %v3096_v18  ;;  %v4116_v18 = vld [vmem:[%s12157_s17 + $0x30] sm:$0xff] }
 0xa73   :  { %v8357_v37 = vpop.f32.mrf.mxu0  ;;  %3219 = vmatpush1.msra.mxu0 %v3184_v36  ;;  %3252 = vmatprep.mubr.f32.mxu0 %v8625_v61  ;;  %v4117_v36 = vld [vmem:[%s12157_s17 + $0x38] sm:$0xff] }
 0xa74   :  { %v4115_v37 = vld [vmem:[%s12157_s17 + $0x28] sm:$0xff] }
 0xa75   :  { %v10293_v24 = vpop.f32.mrf.mxu1 }
 0xa76   :  { %7437 = vmatmul.mubr.msk.f32.vlgmr.msra.gmra.mxu0 %vm2950_vm13, %v10226_v8 }
 0xa77   :  { %v10297_v1 = vpop.f32.mrf.mxu1  ;;  %3341 = vmatprep.mubr.f32.mxu0 %v8625_v61 }
 0xa79   :  { %v10300_v38 = vpop.f32.mrf.mxu1 }
 0xa7b   :  { %v10302_v39 = vpop.f32.mrf.mxu1 }
 0xa7d   :  { %v10304_v46 = vpop.f32.mrf.mxu1 }
 0xa7f   :  { %v10306_v47 = vpop.f32.mrf.mxu1 }
 0xa81   :  { %v3799_v48 = vpop.f32.mrf.mxu1 }
 0xa83   :  { %v3801_v49 = vpop.f32.mrf.mxu1 }
 0xa84   :  { %7471 = vmatprep.subr.msk.mxu1 %vm2012_vm9, %v3801_v49  ;;  %v4113_v49 = vld [vmem:[%s12157_s17 + $0x18] sm:$0xff] }
 0xa85   :  { %7472 = vmatpush1.msk.msra.mxu1 %vm2012_vm9, %v3799_v48  ;;  %v4114_v48 = vld [vmem:[%s12157_s17 + $0x20] sm:$0xff] }
 0xa86   :  { %7473 = vmatmul.mubr.msk.f32.vlgmr.msra.gmra.mxu1 %vm2872_vm12, %v7468_v44  ;;  %4156 = vmatprep.subr.mxu1 %v4141_v12  ;;  %v4143_v12 = vld [vmem:[%s12157_s17 + $0x108] sm:$0xff] }
 0xa87   :  { %3893 = vmatprep.mubr.f32.mxu1 %v8625_v61  ;;  %4157 = vmatpush1.msra.mxu1 %v4140_v14  ;;  %v4142_v14 = vld [vmem:[%s12157_s17 + $0x100] sm:$0xff] }
 0xa88   :  { %4158 = vmatprep.subr.mxu1 %v4139_v10 }
 0xa89   :  { %4159 = vmatpush1.msra.mxu1 %v4138_v15  ;;  %v3179_v15 = vld [vmem:[%s12155_s15 + $0x8] sm:$0xff] }
 0xa8a   :  { %7474 = vmatmul.mubr.msk.f32.gmra.mxu1 %vm2872_vm12, %v7469_v57  ;;  %4160 = vmatprep.subr.mxu1 %v4137_v13 }
 0xa8b   :  { %3899 = vmatprep.mubr.f32.mxu1 %v8625_v61  ;;  %4161 = vmatpush1.msra.mxu1 %v4136_v16 }
 0xa8e   :  { %7475 = vmatmul.mubr.msk.f32.gmra.mxu1 %vm2872_vm12, %v7470_v58 }
 0xb32   :  { %v3171_v25 = vpop.f32.mrf.mxu0 }
 0xb33   :  { %v3175_v26 = vadd.f32 %v3171_v25, %v3024_v51  ;;  %v3178_v51 = vld [vmem:[%s12155_s15] sm:$0xff] }
 0xb34   :  { %v8362_v27 = vpop.f32.mrf.mxu0 }
 0xb35   :  { %3177 = vst.msk [vmem:[#allocation4] sm:$0x3] %vm3176_vm14, %v3175_v26  ;;  %v3180_v26 = vld [vmem:[%s12155_s15 + $0x10] sm:$0xff] }
 0xb36   :  { %v3254_v28 = vpop.f32.mrf.mxu0 }
 0xb38   :  { %v3256_v29 = vpop.f32.mrf.mxu0 }
 0xb39   :  { %7438 = vmatprep.subr.msk.mxu0 %vm2012_vm9, %v3256_v29  ;;  %v3182_v29 = vld [vmem:[%s12155_s15 + $0x20] sm:$0x3] }
 0xb3a   :  { %7439 = vmatpush1.msk.msra.mxu0 %vm2012_vm9, %v3254_v28 }
 0xb3b   :  { %7440 = vmatmul.mubr.msk.f32.vlgmr.msra.gmra.mxu0 %vm2872_vm12, %v3259_v52  ;;  %3581 = vmatprep.subr.mxu0 %v7455_v53 }
 0xb3c   :  { %3347 = vmatprep.mubr.f32.mxu0 %v8625_v61  ;;  %3582 = vmatpush1.msra.mxu0 %v7454_v54 }
 0xb3f   :  { %7441 = vmatmul.mubr.msk.f32.gmra.mxu0 %vm2872_vm12, %v3260_v55 }
 0xb40   :  { %3353 = vmatprep.mubr.f32.mxu0 %v8625_v61 }
 0xb43   :  { %7442 = vmatmul.mubr.msk.f32.gmra.mxu0 %vm2872_vm12, %v3261_v56 }
 0xb44   :  { %3615 = vmatprep.mubr.f32.mxu0 %v8625_v61 }
 0xb46   :  { %v3889_v10 = vpop.f32.mrf.mxu1 }
 0xb47   :  { %7456 = vmatmul.mubr.msk.f32.vlgmr.msra.gmra.mxu0 %vm2950_vm13, %v10226_v8 }
 0xb48   :  { %3705 = vmatprep.mubr.f32.mxu0 %v8625_v61  ;;  %v3891_v13 = vpop.f32.mrf.mxu1 }
 0xbfb   :  { %v10353_v59 = vpop.f32.mrf.mxu0 }
 0xbfc   :  { %v3360_v25 = vadd.f32 %v10353_v59, %v3178_v51 }
 0xbfd   :  { %v10355_v60 = vpop.f32.mrf.mxu0 }
 0xbfe   :  { %v3542_v28 = vadd.f32 %v10293_v24, %v3360_v25  ;;  %v3361_v16 = vadd.f32 %v10355_v60, %v3179_v15  ;;  %v7514_v15 = vld [vmem:[%s12157_s17 + $0x190] sm:$0xff] }
 0xbff   :  { %v10357_v62 = vpop.f32.mrf.mxu0 }
 0xc00   :  { %v3362_v27 = vadd.f32 %v10357_v62, %v3180_v26 }
 0xc01   :  { %v10359_v45 = vpop.f32.mrf.mxu0 }
 0xc02   :  { %v3544_v56 = vadd.f32 %v10300_v38, %v3362_v27  ;;  %v7480_v38 = vld [vmem:[%s12153_s13 + $0x68] sm:$0xff] }
 0xc03   :  { %v10361_v63 = vpop.f32.mrf.mxu0 }
 0xc04   :  { %v3364_v55 = vadd.f32 %v10361_v63, %v3182_v29  ;;  %v4111_v63 = vld [vmem:[%s12157_s17 + $0x8] sm:$0xff] }
 0xc05   :  { %v10363_v0 = vpop.f32.mrf.mxu0 }
 0xc06   :  { %v3546_v59 = vadd.f32 %v10304_v46, %v3364_v55  ;;  %v7481_v46 = vld [vmem:[%s12153_s13 + $0x70] sm:$0x3]  ;;  %v7531_v55 = vld [vmem:[%s12157_s17 + $0x218] sm:$0xff] }
 0xc07   :  { %v3617_v43 = vpop.f32.mrf.mxu0 }
 0xc09   :  { %v3619_v40 = vpop.f32.mrf.mxu0 }
 0xc0a   :  { %7460 = vmatprep.subr.msk.mxu0 %vm2012_vm9, %v3619_v40 }
 0xc0b   :  { %7461 = vmatpush1.msk.msra.mxu0 %vm2012_vm9, %v3617_v43 }
 0xc0c   :  { %7462 = vmatmul.mubr.msk.f32.vlgmr.msra.gmra.mxu0 %vm2872_vm12, %v7457_v2  ;;  %3945 = vmatprep.subr.mxu0 %v7477_v4  ;;  %v7479_v4 = vld [vmem:[%s12153_s13 + $0x60] sm:$0xff] }
 0xc0d   :  { %3711 = vmatprep.mubr.f32.mxu0 %v8625_v61  ;;  %3946 = vmatpush1.msra.mxu0 %v7476_v7  ;;  %v4110_v7 = vld [vmem:[%s12157_s17] sm:$0xff] }
 0xc10   :  { %7463 = vmatmul.mubr.msk.f32.gmra.mxu0 %vm2872_vm12, %v7458_v9  ;;  %v4145_v9 = vld [vmem:[%s12157_s17 + $0x118] sm:$0xff] }
 0xc11   :  { %3717 = vmatprep.mubr.f32.mxu0 %v8625_v61 }
 0xc14   :  { %7464 = vmatmul.mubr.msk.f32.gmra.mxu0 %vm2872_vm12, %v7459_v11  ;;  %v4144_v11 = vld [vmem:[%s12157_s17 + $0x110] sm:$0xff] }
 0xc15   :  { %3979 = vmatprep.mubr.f32.mxu0 %v8625_v61 }
 0xc18   :  { %7478 = vmatmul.mubr.msk.f32.vlgmr.msra.gmra.mxu0 %vm2950_vm13, %v10226_v8  ;;  %v4135_v8 = vld [vmem:[%s12157_s17 + $0xc8] sm:$0xff] }
 0xc19   :  { %4069 = vmatprep.mubr.f32.mxu0 %v8625_v61  ;;  %4162 = vmatprep.subr.mxu1 %v4135_v8  ;;  %v3181_v8 = vld [vmem:[%s12155_s15 + $0x18] sm:$0xff] }
 0xc1a   :  { %4163 = vmatpush1.msra.mxu1 %v4134_v17  ;;  %v3895_v17 = vpop.f32.mrf.mxu1 }
 0xc1b   :  { %4164 = vmatprep.subr.mxu1 %v4133_v42  ;;  %v3363_v42 = vadd.f32 %v10359_v45, %v3181_v8  ;;  %v4244_v8 = vld [vmem:[%s12156_s16 + $0x28] sm:$0xff] }
 0xc1c   :  { %4165 = vmatpush1.msra.mxu1 %v4132_v20  ;;  %v3543_v20 = vadd.f32 %v10297_v1, %v3361_v16  ;;  %v7512_v16 = vld [vmem:[%s12157_s17 + $0x180] sm:$0xff] }
 0xc1d   :  { %4166 = vmatprep.subr.mxu1 %v4131_v30  ;;  %v3183_v30 = vld [vmem:[%s12155_s15 + $0x28] sm:$0x3] }
 0xc1e   :  { %4167 = vmatpush1.msra.mxu1 %v4130_v21 }
 0xc1f   :  { %4168 = vmatprep.subr.mxu1 %v4129_v19  ;;  %v3897_v19 = vpop.f32.mrf.mxu1 }
 0xc20   :  { %4169 = vmatpush1.msra.mxu1 %v4128_v23  ;;  %v3365_v23 = vadd.f32 %v10363_v0, %v3183_v30  ;;  %v7508_v30 = vld [vmem:[%s12157_s17 + $0x160] sm:$0xff] }
 0xc21   :  { %4170 = vmatprep.subr.mxu1 %v4127_v3  ;;  %v3545_v3 = vadd.f32 %v10302_v39, %v3363_v42  ;;  %v7510_v42 = vld [vmem:[%s12157_s17 + $0x170] sm:$0xff] }
 0xc22   :  { %4171 = vmatpush1.msra.mxu1 %v4126_v31  ;;  %v3547_v45 = vadd.f32 %v10306_v47, %v3365_v23  ;;  %v7506_v23 = vld [vmem:[%s12157_s17 + $0x150] sm:$0xff] }
 0xc23   :  { %4172 = vmatprep.subr.mxu1 %v4125_v5 }
 0xc24   :  { %4173 = vmatpush1.msra.mxu1 %v4124_v32 }
 0xc25   :  { %4174 = vmatprep.subr.mxu1 %v4123_v41  ;;  %v3901_v41 = vpop.f32.mrf.mxu1 }
 0xc26   :  { %4175 = vmatpush1.msra.mxu1 %v4122_v33 }
 0xc27   :  { %4176 = vmatprep.subr.mxu1 %v4121_v22  ;;  %v3903_v0 = vpop.f32.mrf.mxu1 }
 0xc28   :  { %4177 = vmatpush1.msra.mxu1 %v4120_v34 }
 0xc29   :  { %4178 = vmatprep.subr.mxu1 %v4119_v6 }
 0xc2a   :  { %4179 = vmatpush1.msra.mxu1 %v4118_v35 }
 0xc2b   :  { %4180 = vmatprep.subr.mxu1 %v4117_v36 }
 0xc2c   :  { %4181 = vmatpush1.msra.mxu1 %v4116_v18 }
 0xc2d   :  { %4182 = vmatprep.subr.mxu1 %v4115_v37 }
 0xc2e   :  { %4183 = vmatpush1.msra.mxu1 %v4114_v48 }
 0xc2f   :  { %4184 = vmatprep.subr.mxu1 %v4113_v49 }
 0xc30   :  { %4185 = vmatpush1.msra.mxu1 %v4112_v50 }
 0xc31   :  { %4186 = vmatprep.subr.mxu1 %v4111_v63  ;;  %v4242_v63 = vld [vmem:[%s12156_s16 + $0x18] sm:$0xff] }
 0xc32   :  { %4187 = vmatpush1.msra.mxu1 %v4110_v7  ;;  %v7519_v7 = vld [vmem:[%s12157_s17 + $0x1b8] sm:$0xff] }
 0xc33   :  { %4216 = vmatprep.subr.mxu1 %v4145_v9  ;;  %v7518_v9 = vld [vmem:[%s12157_s17 + $0x1b0] sm:$0xff] }
 0xc34   :  { %4217 = vmatpush2.msra.mxu1 %v4144_v11  ;;  %v7517_v11 = vld [vmem:[%s12157_s17 + $0x1a8] sm:$0xff] }
 0xc35   :  { %4218 = vmatprep.subr.mxu1 %v4143_v12  ;;  %v7516_v12 = vld [vmem:[%s12157_s17 + $0x1a0] sm:$0xff] }
 0xc36   :  { %4219 = vmatpush2.msra.mxu1 %v4142_v14  ;;  %v4243_v14 = vld [vmem:[%s12156_s16 + $0x20] sm:$0xff] }
 0xccc   :  { %v3707_v52 = vpop.f32.mrf.mxu0 }
 0xccd   :  { %v3724_v53 = vadd.f32 %v3707_v52, %v3542_v28 }
 0xcce   :  { %v3709_v54 = vpop.f32.mrf.mxu0 }
 0xccf   :  { %v3725_v21 = vadd.f32 %v3709_v54, %v3543_v20  ;;  %v3906_v32 = vadd.f32 %v3889_v10, %v3724_v53  ;;  %v4239_v54 = vld [vmem:[%s12156_s16] sm:$0xff]  ;;  %v7515_v10 = vld [vmem:[%s12157_s17 + $0x198] sm:$0xff]  ;;  %v7509_v20 = vld [vmem:[%s12157_s17 + $0x168] sm:$0xff] }
 0xcd0   :  { %v3713_v44 = vpop.f32.mrf.mxu0 }
 0xcd1   :  { %v3726_v57 = vadd.f32 %v3713_v44, %v3544_v56  ;;  %v3907_v31 = vadd.f32 %v3891_v13, %v3725_v21  ;;  %v7530_v56 = vld [vmem:[%s12157_s17 + $0x210] sm:$0xff]  ;;  %v7529_v44 = vld [vmem:[%s12157_s17 + $0x208] sm:$0xff] }
 0xcd2   :  { %v3715_v58 = vpop.f32.mrf.mxu0  ;;  %v7513_v13 = vld [vmem:[%s12157_s17 + $0x188] sm:$0xff]  ;;  %v4245_v21 = vld [vmem:[%s12156_s16 + $0x30] sm:$0xff] }
 0xcd3   :  { %v3727_v5 = vadd.f32 %v3715_v58, %v3545_v3  ;;  %v3908_v39 = vadd.f32 %v3895_v17, %v3726_v57  ;;  %v7528_v57 = vld [vmem:[%s12157_s17 + $0x200] sm:$0xff]  ;;  %v4240_v58 = vld [vmem:[%s12156_s16 + $0x8] sm:$0xff]  ;;  %v7511_v17 = vld [vmem:[%s12157_s17 + $0x178] sm:$0xff] }
 0xcd4   :  { %v3719_v43 = vpop.f32.mrf.mxu0  ;;  %v7505_v3 = vld [vmem:[%s12157_s17 + $0x148] sm:$0xff] }
 0xcd5   :  { %v10496_v62 = vadd.f32 %v3719_v43, %v3546_v59  ;;  %v3909_v6 = vadd.f32 %v3897_v19, %v3727_v5  ;;  %v7527_v59 = vld [vmem:[%s12157_s17 + $0x1f8] sm:$0xff]  ;;  %v7526_v43 = vld [vmem:[%s12157_s17 + $0x1f0] sm:$0xff] }
 0xcd6   :  { %v3721_v24 = vpop.f32.mrf.mxu0  ;;  %v7507_v19 = vld [vmem:[%s12157_s17 + $0x158] sm:$0xff] }
 0xcd7   :  { %v3729_v35 = vadd.f32 %v3721_v24, %v3547_v45  ;;  %v3910_v49 = vadd.f32 %v3901_v41, %v10496_v62  ;;  %v7525_v62 = vld [vmem:[%s12157_s17 + $0x1e8] sm:$0xff]  ;;  %v7524_v24 = vld [vmem:[%s12157_s17 + $0x1e0] sm:$0xff]  ;;  %v7503_v5 = vld [vmem:[%s12157_s17 + $0x138] sm:$0xff] }
 0xcd8   :  { %v3981_v40 = vpop.f32.mrf.mxu0  ;;  %v7501_v41 = vld [vmem:[%s12157_s17 + $0x128] sm:$0xff]  ;;  %v7535_v45 = vld [vmem:[%s12157_s17 + $0x238] sm:$0xff] }
 0xcd9   :  { %v3911_v48 = vadd.f32 %v3903_v0, %v3729_v35  ;;  %v7532_v35 = vld [vmem:[%s12157_s17 + $0x220] sm:$0xff] }
 0xcda   :  { %v3983_v2 = vpop.f32.mrf.mxu0 }
 0xcdb   :  { %7482 = vmatprep.subr.msk.mxu0 %vm2012_vm9, %v3983_v2  ;;  %v7523_v2 = vld [vmem:[%s12157_s17 + $0x1d8] sm:$0xff] }
 0xcdc   :  { %7483 = vmatpush1.msk.msra.mxu0 %vm2012_vm9, %v3981_v40  ;;  %v4241_v40 = vld [vmem:[%s12156_s16 + $0x10] sm:$0xff] }
 0xcdd   :  { %7484 = vmatmul.mubr.msk.f32.vlgmr.msra.gmra.mxu0 %vm2872_vm12, %v7479_v4  ;;  %v7522_v4 = vld [vmem:[%s12157_s17 + $0x1d0] sm:$0xff] }
 0xcde   :  { %4075 = vmatprep.mubr.f32.mxu0 %v8625_v61 }
 0xce1   :  { %7485 = vmatmul.mubr.msk.f32.gmra.mxu0 %vm2872_vm12, %v7480_v38  ;;  %v7521_v38 = vld [vmem:[%s12157_s17 + $0x1c8] sm:$0xff] }
 0xce2   :  { %4081 = vmatprep.mubr.f32.mxu0 %v8625_v61 }
 0xce5   :  { %7486 = vmatmul.mubr.msk.f32.gmra.mxu0 %vm2872_vm12, %v7481_v46  ;;  %v7520_v46 = vld [vmem:[%s12157_s17 + $0x1c0] sm:$0xff] }
 0xce6   :  { %4342 = vmatprep.mubr.f32.mxu0 %v8625_v61 }
 0xd9d   :  { %v4071_v60 = vpop.f32.mrf.mxu0 }
 0xd9e   :  { %v10550_v22 = vadd.f32 %v4071_v60, %v3906_v32  ;;  %v7504_v60 = vld [vmem:[%s12157_s17 + $0x140] sm:$0xff]  ;;  %v7502_v32 = vld [vmem:[%s12157_s17 + $0x130] sm:$0xff] }
 0xd9f   :  { %v4073_v33 = vpop.f32.mrf.mxu0 }
 0xda0   :  { %v10548_v1 = vadd.f32 %v4073_v33, %v3907_v31  ;;  %v4246_v31 = vld [vmem:[%s12156_s16 + $0x38] sm:$0x3]  ;;  %v7500_v33 = vld [vmem:[%s12157_s17 + $0x120] sm:$0xff] }
 0xda1   :  { %v4077_v34 = vpop.f32.mrf.mxu0 }
 0xda2   :  { %7487 = vmatprep.mubr.msk.f32.mxu1 %vm4146_vm15, %v10548_v1  ;;  %v10557_v37 = vadd.f32 %v4077_v34, %v3908_v39  ;;  %v7534_v34 = vld [vmem:[%s12157_s17 + $0x230] sm:$0xff] }
 0xda3   :  { %v4079_v36 = vpop.f32.mrf.mxu0  ;;  %4221 = vmatmul.mubr.f32.vlgmr.msra.gmra.mxu1 %v10550_v22 }
 0xda4   :  { %v10555_v18 = vadd.f32 %v4079_v36, %v3909_v6  ;;  %v7533_v6 = vld [vmem:[%s12157_s17 + $0x228] sm:$0xff] }
 0xda5   :  { %v4083_v47 = vpop.f32.mrf.mxu0 }
 0xda6   :  { %7488 = vmatprep.mubr.msk.f32.mxu1 %vm4146_vm15, %v10555_v18  ;;  %v10565_v25 = vadd.f32 %v4083_v47, %v3910_v49 }
 0xda7   :  { %v4085_v50 = vpop.f32.mrf.mxu0  ;;  %4227 = vmatmul.mubr.f32.gmra.mxu1 %v10557_v37 }
 0xda8   :  { %v10563_v51 = vadd.f32 %v4085_v50, %v3911_v48 }
 0xdaa   :  { %7489 = vmatprep.mubr.msk.f32.mxu1 %vm4146_vm15, %v10563_v51 }
 0xdab   :  { %4233 = vmatmul.mubr.f32.gmra.mxu1 %v10565_v25 }
 0xdac   :  { %4630 = vmatprep.mubr.f32.mxu1 %v8625_v61 }
 0xe63   :  { %v4222_v26 = vpop.f32.mrf.mxu1 }
 0xe65   :  { %v4224_v27 = vpop.f32.mrf.mxu1 }
 0xe67   :  { %v4228_v28 = vpop.f32.mrf.mxu1 }
 0xe69   :  { %v4230_v29 = vpop.f32.mrf.mxu1 }
 0xe6b   :  { %v4234_v52 = vpop.f32.mrf.mxu1 }
 0xe6d   :  { %v4236_v53 = vpop.f32.mrf.mxu1 }
 0xe6e   :  { %7490 = vmatprep.subr.msk.mxu0 %vm122_vm0, %v4236_v53 }
 0xe6f   :  { %7491 = vmatpush1.msk.msra.mxu0 %vm122_vm0, %v4234_v52 }
 0xe70   :  { %4306 = vmatprep.subr.mxu0 %v4230_v29 }
 0xe71   :  { %4307 = vmatpush1.msra.mxu0 %v4228_v28 }
 0xe72   :  { %4308 = vmatprep.subr.mxu0 %v4224_v27 }
 0xe73   :  { %4309 = vmatpush1.msra.mxu0 %v4222_v26 }
 0xe74   :  { %7492 = vmatmul.mubr.msk.f32.vlgmr.msra.gmra.mxu0 %vm4247_vm1, %v4239_v54  ;;  %4444 = vmatprep.subr.mxu0 %v7531_v55 }
 0xe75   :  { %4445 = vmatpush1.msra.mxu0 %v7530_v56  ;;  %4348 = vmatprep.mubr.f32.mxu0 %v8625_v61 }
 0xe76   :  { %4446 = vmatprep.subr.mxu0 %v7529_v44 }
 0xe77   :  { %4447 = vmatpush1.msra.mxu0 %v7528_v57 }
 0xe78   :  { %7493 = vmatmul.mubr.msk.f32.gmra.mxu0 %vm4247_vm1, %v4240_v58  ;;  %4448 = vmatprep.subr.mxu0 %v7527_v59 }
 0xe79   :  { %4449 = vmatpush1.msra.mxu0 %v7526_v43  ;;  %4354 = vmatprep.mubr.f32.mxu0 %v8625_v61 }
 0xe7a   :  { %4450 = vmatprep.subr.mxu0 %v7525_v62 }
 0xe7b   :  { %4451 = vmatpush1.msra.mxu0 %v7524_v24  ;;  %v7539_v24 = vld [vmem:[%s12156_s16 + $0x40] sm:$0xff] }
 0xe7c   :  { %7494 = vmatmul.mubr.msk.f32.gmra.mxu0 %vm4247_vm1, %v4241_v40  ;;  %4452 = vmatprep.subr.mxu0 %v7523_v2  ;;  %v7588_v40 = vld [vmem:[%s12157_s17 + $0x338] sm:$0xff]  ;;  %v7587_v2 = vld [vmem:[%s12157_s17 + $0x330] sm:$0xff] }
 0xe7d   :  { %4453 = vmatpush1.msra.mxu0 %v7522_v4  ;;  %4360 = vmatprep.mubr.f32.mxu0 %v8625_v61  ;;  %v7586_v4 = vld [vmem:[%s12157_s17 + $0x328] sm:$0xff] }
 0xe7e   :  { %4454 = vmatprep.subr.mxu0 %v7521_v38  ;;  %v7585_v38 = vld [vmem:[%s12157_s17 + $0x320] sm:$0xff] }
 0xe7f   :  { %4455 = vmatpush1.msra.mxu0 %v7520_v46  ;;  %v7540_v46 = vld [vmem:[%s12156_s16 + $0x48] sm:$0xff] }
 0xe80   :  { %7495 = vmatmul.mubr.msk.f32.gmra.mxu0 %vm4247_vm1, %v4242_v63  ;;  %4456 = vmatprep.subr.mxu0 %v7519_v7  ;;  %v7584_v63 = vld [vmem:[%s12157_s17 + $0x318] sm:$0xff]  ;;  %v7583_v7 = vld [vmem:[%s12157_s17 + $0x310] sm:$0xff] }
 0xe81   :  { %4457 = vmatpush1.msra.mxu0 %v7518_v9  ;;  %4366 = vmatprep.mubr.f32.mxu0 %v8625_v61  ;;  %v7582_v9 = vld [vmem:[%s12157_s17 + $0x308] sm:$0xff] }
 0xe82   :  { %4458 = vmatprep.subr.mxu0 %v7517_v11  ;;  %v7581_v11 = vld [vmem:[%s12157_s17 + $0x300] sm:$0xff] }
 0xe83   :  { %4459 = vmatpush1.msra.mxu0 %v7516_v12  ;;  %v7541_v12 = vld [vmem:[%s12156_s16 + $0x50] sm:$0xff] }
 0xe84   :  { %7496 = vmatmul.mubr.msk.f32.gmra.mxu0 %vm4247_vm1, %v4243_v14  ;;  %4460 = vmatprep.subr.mxu0 %v7515_v10  ;;  %v7580_v14 = vld [vmem:[%s12157_s17 + $0x2f8] sm:$0xff]  ;;  %v7579_v10 = vld [vmem:[%s12157_s17 + $0x2f0] sm:$0xff] }
 0xe85   :  { %4461 = vmatpush1.msra.mxu0 %v7514_v15  ;;  %4372 = vmatprep.mubr.f32.mxu0 %v8625_v61  ;;  %v7578_v15 = vld [vmem:[%s12157_s17 + $0x2e8] sm:$0xff] }
 0xe86   :  { %4462 = vmatprep.subr.mxu0 %v7513_v13  ;;  %v7577_v13 = vld [vmem:[%s12157_s17 + $0x2e0] sm:$0xff] }
 0xe87   :  { %4463 = vmatpush1.msra.mxu0 %v7512_v16  ;;  %v7542_v16 = vld [vmem:[%s12156_s16 + $0x58] sm:$0xff] }
 0xe88   :  { %7497 = vmatmul.mubr.msk.f32.gmra.mxu0 %vm4247_vm1, %v4244_v8  ;;  %4464 = vmatprep.subr.mxu0 %v7511_v17  ;;  %v7576_v8 = vld [vmem:[%s12157_s17 + $0x2d8] sm:$0xff]  ;;  %v7575_v17 = vld [vmem:[%s12157_s17 + $0x2d0] sm:$0xff] }
 0xe89   :  { %4465 = vmatpush1.msra.mxu0 %v7510_v42  ;;  %4378 = vmatprep.mubr.f32.mxu0 %v8625_v61  ;;  %v7574_v42 = vld [vmem:[%s12157_s17 + $0x2c8] sm:$0xff] }
 0xe8a   :  { %4466 = vmatprep.subr.mxu0 %v7509_v20  ;;  %v7573_v20 = vld [vmem:[%s12157_s17 + $0x2c0] sm:$0xff] }
 0xe8b   :  { %4467 = vmatpush1.msra.mxu0 %v7508_v30  ;;  %v7543_v30 = vld [vmem:[%s12156_s16 + $0x60] sm:$0xff] }
 0xe8c   :  { %7498 = vmatmul.mubr.msk.f32.gmra.mxu0 %vm4247_vm1, %v4245_v21  ;;  %4468 = vmatprep.subr.mxu0 %v7507_v19  ;;  %v7572_v21 = vld [vmem:[%s12157_s17 + $0x2b8] sm:$0xff]  ;;  %v7571_v19 = vld [vmem:[%s12157_s17 + $0x2b0] sm:$0xff] }
 0xe8d   :  { %4469 = vmatpush1.msra.mxu0 %v7506_v23  ;;  %4384 = vmatprep.mubr.f32.mxu0 %v8625_v61  ;;  %v7570_v23 = vld [vmem:[%s12157_s17 + $0x2a8] sm:$0xff] }
 0xe8e   :  { %4470 = vmatprep.subr.mxu0 %v7505_v3  ;;  %v7569_v3 = vld [vmem:[%s12157_s17 + $0x2a0] sm:$0xff] }
 0xe8f   :  { %4471 = vmatpush1.msra.mxu0 %v7504_v60  ;;  %v7544_v60 = vld [vmem:[%s12156_s16 + $0x68] sm:$0xff] }
 0xe90   :  { %7499 = vmatmul.mubr.msk.f32.gmra.mxu0 %vm4247_vm1, %v4246_v31  ;;  %4472 = vmatprep.subr.mxu0 %v7503_v5  ;;  %v7568_v31 = vld [vmem:[%s12157_s17 + $0x298] sm:$0xff]  ;;  %v7567_v5 = vld [vmem:[%s12157_s17 + $0x290] sm:$0xff] }
 0xe91   :  { %4473 = vmatpush1.msra.mxu0 %v7502_v32  ;;  %7536 = vmatprep.mubr.msk.f32.mxu0 %vm4146_vm15, %v10548_v1  ;;  %v7566_v32 = vld [vmem:[%s12157_s17 + $0x288] sm:$0xff] }
 0xe92   :  { %4474 = vmatprep.subr.mxu0 %v7501_v41  ;;  %v7565_v41 = vld [vmem:[%s12157_s17 + $0x280] sm:$0xff] }
 0xe93   :  { %4475 = vmatpush1.msra.mxu0 %v7500_v33  ;;  %v7545_v33 = vld [vmem:[%s12156_s16 + $0x70] sm:$0xff] }
 0xe94   :  { %4504 = vmatprep.subr.mxu0 %v7535_v45  ;;  %v7564_v45 = vld [vmem:[%s12157_s17 + $0x278] sm:$0xff] }
 0xe95   :  { %4505 = vmatpush2.msra.mxu0 %v7534_v34  ;;  %v7563_v34 = vld [vmem:[%s12157_s17 + $0x270] sm:$0xff] }
 0xe96   :  { %4506 = vmatprep.subr.mxu0 %v7533_v6  ;;  %v7562_v6 = vld [vmem:[%s12157_s17 + $0x268] sm:$0xff] }
 0xe97   :  { %4507 = vmatpush2.msra.mxu0 %v7532_v35  ;;  %v7561_v35 = vld [vmem:[%s12157_s17 + $0x260] sm:$0xff] }
 0xe98   :  { %4509 = vmatmul.mubr.f32.vlgmr.msra.gmra.mxu0 %v10550_v22 }
 0xe99   :  { %7537 = vmatprep.mubr.msk.f32.mxu0 %vm4146_vm15, %v10555_v18 }
 0xe9c   :  { %4515 = vmatmul.mubr.f32.gmra.mxu0 %v10557_v37 }
 0xe9d   :  { %7538 = vmatprep.mubr.msk.f32.mxu0 %vm4146_vm15, %v10563_v51 }
 0xea0   :  { %4521 = vmatmul.mubr.f32.gmra.mxu0 %v10565_v25 }
 0xea1   :  { %4918 = vmatprep.mubr.f32.mxu0 %v8625_v61 }
 0xf34   :  { %v10730_v39 = vpop.f32.mrf.mxu0 }
 0xf36   :  { %v10732_v0 = vpop.f32.mrf.mxu0 }
 0xf38   :  { %v10734_v36 = vpop.f32.mrf.mxu0 }
 0xf3a   :  { %v10736_v47 = vpop.f32.mrf.mxu0 }
 0xf3c   :  { %v10738_v48 = vpop.f32.mrf.mxu0 }
 0xf3e   :  { %v10740_v49 = vpop.f32.mrf.mxu0 }
 0xf40   :  { %v10742_v50 = vpop.f32.mrf.mxu0 }
 0xf42   :  { %v10744_v26 = vpop.f32.mrf.mxu0 }
 0xf44   :  { %v10746_v27 = vpop.f32.mrf.mxu0 }
 0xf46   :  { %v10748_v28 = vpop.f32.mrf.mxu0 }
 0xf48   :  { %v10750_v29 = vpop.f32.mrf.mxu0 }
 0xf4a   :  { %v10752_v52 = vpop.f32.mrf.mxu0 }
 0xf4c   :  { %v10754_v53 = vpop.f32.mrf.mxu0 }
 0xf4e   :  { %v10756_v54 = vpop.f32.mrf.mxu0 }
 0xf50   :  { %v10758_v55 = vpop.f32.mrf.mxu0 }
 0xf52   :  { %v10760_v56 = vpop.f32.mrf.mxu0 }
 0xf58   :  { %v4510_v44 = vpop.f32.mrf.mxu0 }
 0xf5a   :  { %v4512_v57 = vpop.f32.mrf.mxu0 }
 0xf5c   :  { %v4516_v58 = vpop.f32.mrf.mxu0 }
 0xf5e   :  { %v4518_v59 = vpop.f32.mrf.mxu0 }
 0xf60   :  { %v4522_v43 = vpop.f32.mrf.mxu0 }
 0xf62   :  { %v4524_v62 = vpop.f32.mrf.mxu0 }
 0xf63   :  { %7547 = vmatprep.subr.msk.mxu1 %vm122_vm0, %v4524_v62  ;;  %v7592_v62 = vld [vmem:[%s12157_s17 + $0x358] sm:$0xff] }
 0xf64   :  { %7548 = vmatpush1.msk.msra.mxu1 %vm122_vm0, %v4522_v43  ;;  %v7557_v43 = vld [vmem:[%s12157_s17 + $0x240] sm:$0xff] }
 0xf65   :  { %4594 = vmatprep.subr.mxu1 %v4518_v59  ;;  %v7558_v59 = vld [vmem:[%s12157_s17 + $0x248] sm:$0xff] }
 0xf66   :  { %4595 = vmatpush1.msra.mxu1 %v4516_v58  ;;  %v7559_v58 = vld [vmem:[%s12157_s17 + $0x250] sm:$0xff] }
 0xf67   :  { %4596 = vmatprep.subr.mxu1 %v4512_v57  ;;  %v7560_v57 = vld [vmem:[%s12157_s17 + $0x258] sm:$0xff] }
 0xf68   :  { %4597 = vmatpush1.msra.mxu1 %v4510_v44  ;;  %v7546_v44 = vld [vmem:[%s12156_s16 + $0x78] sm:$0x3] }
 0xf69   :  { %7549 = vmatmul.mubr.msk.f32.vlgmr.msra.gmra.mxu1 %vm4247_vm1, %v7539_v24  ;;  %4732 = vmatprep.subr.mxu1 %v7588_v40  ;;  %v7591_v24 = vld [vmem:[%s12157_s17 + $0x350] sm:$0xff]  ;;  %v7590_v40 = vld [vmem:[%s12157_s17 + $0x348] sm:$0xff] }
 0xf6a   :  { %4733 = vmatpush1.msra.mxu1 %v7587_v2  ;;  %4636 = vmatprep.mubr.f32.mxu1 %v8625_v61  ;;  %v7589_v2 = vld [vmem:[%s12157_s17 + $0x340] sm:$0xff] }
 0xf6b   :  { %4734 = vmatprep.subr.mxu1 %v7586_v4  ;;  %v4094_v4 = vld [vmem:[%s12158_s18] sm:$0xff] }
 0xf6c   :  { %4735 = vmatpush1.msra.mxu1 %v7585_v38  ;;  %v4095_v38 = vld [vmem:[%s12158_s18 + $0x8] sm:$0xff] }
 0xf6d   :  { %7550 = vmatmul.mubr.msk.f32.gmra.mxu1 %vm4247_vm1, %v7540_v46  ;;  %4736 = vmatprep.subr.mxu1 %v7584_v63  ;;  %v4391_v46 = vadd.f32 %v10730_v39, %v4094_v4  ;;  %v4096_v63 = vld [vmem:[%s12158_s18 + $0x10] sm:$0xff]  ;;  %v4098_v39 = vld [vmem:[%s12158_s18 + $0x20] sm:$0xff] }
 0xf6e   :  { %4737 = vmatpush1.msra.mxu1 %v7583_v7  ;;  %4642 = vmatprep.mubr.f32.mxu1 %v8625_v61 }
 0xf6f   :  { %4738 = vmatprep.subr.mxu1 %v7582_v9  ;;  %v4392_v9 = vadd.f32 %v10732_v0, %v4095_v38  ;;  %v4099_v0 = vld [vmem:[%s12158_s18 + $0x28] sm:$0xff] }
 0xf70   :  { %4739 = vmatpush1.msra.mxu1 %v7581_v11 }
 0xf71   :  { %7551 = vmatmul.mubr.msk.f32.gmra.mxu1 %vm4247_vm1, %v7541_v12  ;;  %4740 = vmatprep.subr.mxu1 %v7580_v14  ;;  %v4097_v12 = vld [vmem:[%s12158_s18 + $0x18] sm:$0xff] }
 0xf72   :  { %4741 = vmatpush1.msra.mxu1 %v7579_v10  ;;  %4648 = vmatprep.mubr.f32.mxu1 %v8625_v61  ;;  %v4393_v10 = vadd.f32 %v10734_v36, %v4096_v63  ;;  %v4100_v36 = vld [vmem:[%s12158_s18 + $0x30] sm:$0xff] }
 0xf73   :  { %4742 = vmatprep.subr.mxu1 %v7578_v15 }
 0xf74   :  { %4743 = vmatpush1.msra.mxu1 %v7577_v13 }
 0xf75   :  { %7552 = vmatmul.mubr.msk.f32.gmra.mxu1 %vm4247_vm1, %v7542_v16  ;;  %4744 = vmatprep.subr.mxu1 %v7576_v8  ;;  %v4394_v16 = vadd.f32 %v10736_v47, %v4097_v12  ;;  %v4101_v47 = vld [vmem:[%s12158_s18 + $0x38] sm:$0xff] }
 0xf76   :  { %4745 = vmatpush1.msra.mxu1 %v7575_v17  ;;  %4654 = vmatprep.mubr.f32.mxu1 %v8625_v61 }
 0xf77   :  { %4746 = vmatprep.subr.mxu1 %v7574_v42  ;;  %v4395_v42 = vadd.f32 %v10738_v48, %v4098_v39  ;;  %v4102_v48 = vld [vmem:[%s12158_s18 + $0x40] sm:$0xff] }
 0xf78   :  { %4747 = vmatpush1.msra.mxu1 %v7573_v20 }
 0xf79   :  { %7553 = vmatmul.mubr.msk.f32.gmra.mxu1 %vm4247_vm1, %v7543_v30  ;;  %4748 = vmatprep.subr.mxu1 %v7572_v21  ;;  %v4396_v21 = vadd.f32 %v10740_v49, %v4099_v0  ;;  %v4103_v49 = vld [vmem:[%s12158_s18 + $0x48] sm:$0xff] }
 0xf7a   :  { %4749 = vmatpush1.msra.mxu1 %v7571_v19  ;;  %4660 = vmatprep.mubr.f32.mxu1 %v8625_v61 }
 0xf7b   :  { %4750 = vmatprep.subr.mxu1 %v7570_v23 }
 0xf7c   :  { %4751 = vmatpush1.msra.mxu1 %v7569_v3  ;;  %v4397_v3 = vadd.f32 %v10742_v50, %v4100_v36  ;;  %v4104_v50 = vld [vmem:[%s12158_s18 + $0x50] sm:$0xff] }
 0xf7d   :  { %7554 = vmatmul.mubr.msk.f32.gmra.mxu1 %vm4247_vm1, %v7544_v60  ;;  %4752 = vmatprep.subr.mxu1 %v7568_v31  ;;  %v7644_v36 = vld [vmem:[%s12157_s17 + $0x450] sm:$0xff] }
 0xf7e   :  { %4753 = vmatpush1.msra.mxu1 %v7567_v5  ;;  %4666 = vmatprep.mubr.f32.mxu1 %v8625_v61  ;;  %v4398_v5 = vadd.f32 %v10744_v26, %v4101_v47  ;;  %v4105_v26 = vld [vmem:[%s12158_s18 + $0x58] sm:$0xff]  ;;  %v7597_v47 = vld [vmem:[%s12156_s16 + $0x88] sm:$0xff] }
 0xf7f   :  { %4754 = vmatprep.subr.mxu1 %v7566_v32 }
 0xf80   :  { %4755 = vmatpush1.msra.mxu1 %v7565_v41 }
 0xf81   :  { %7555 = vmatmul.mubr.msk.f32.gmra.mxu1 %vm4247_vm1, %v7545_v33  ;;  %4756 = vmatprep.subr.mxu1 %v7564_v45  ;;  %v4399_v33 = vadd.f32 %v10746_v27, %v4102_v48  ;;  %v4106_v27 = vld [vmem:[%s12158_s18 + $0x60] sm:$0xff]  ;;  %v7639_v48 = vld [vmem:[%s12157_s17 + $0x428] sm:$0xff] }
 0xf82   :  { %4757 = vmatpush1.msra.mxu1 %v7563_v34  ;;  %4672 = vmatprep.mubr.f32.mxu1 %v8625_v61 }
 0xf83   :  { %4758 = vmatprep.subr.mxu1 %v7562_v6  ;;  %v4400_v6 = vadd.f32 %v10748_v28, %v4103_v49  ;;  %v4107_v28 = vld [vmem:[%s12158_s18 + $0x68] sm:$0xff]  ;;  %v7637_v49 = vld [vmem:[%s12157_s17 + $0x418] sm:$0xff] }
 0xf84   :  { %4759 = vmatpush1.msra.mxu1 %v7561_v35  ;;  %v4404_v38 = vadd.f32 %v10756_v54, %v4107_v28  ;;  %v7627_v28 = vld [vmem:[%s12157_s17 + $0x3c8] sm:$0xff] }
 0xf85   :  { %7556 = vmatmul.mubr.msk.f32.gmra.mxu1 %vm4247_vm1, %v7546_v44  ;;  %4760 = vmatprep.subr.mxu1 %v7560_v57  ;;  %v4401_v57 = vadd.f32 %v10750_v29, %v4104_v50  ;;  %v4108_v29 = vld [vmem:[%s12158_s18 + $0x70] sm:$0x3]  ;;  %v7634_v50 = vld [vmem:[%s12157_s17 + $0x400] sm:$0xff] }
 0xf86   :  { %4761 = vmatpush1.msra.mxu1 %v7559_v58  ;;  %7593 = vmatprep.mubr.msk.f32.mxu1 %vm4146_vm15, %v10548_v1 }
 0xf87   :  { %4762 = vmatprep.subr.mxu1 %v7558_v59 }
 0xf88   :  { %4763 = vmatpush1.msra.mxu1 %v7557_v43  ;;  %v4402_v43 = vadd.f32 %v10752_v52, %v4105_v26  ;;  %v4109_v52 = vld [vmem:[%s12158_s18 + $0x78] sm:$0x3]  ;;  %v7632_v26 = vld [vmem:[%s12157_s17 + $0x3f0] sm:$0xff] }
 0xf89   :  { %4792 = vmatprep.subr.mxu1 %v7592_v62  ;;  %v4406_v12 = vadd.f32 %v10760_v56, %v4109_v52  ;;  %v7645_v56 = vld [vmem:[%s12157_s17 + $0x458] sm:$0xff]  ;;  %v7622_v52 = vld [vmem:[%s12157_s17 + $0x3a0] sm:$0xff] }
 0xf8a   :  { %4793 = vmatpush2.msra.mxu1 %v7591_v24 }
 0xf8b   :  { %4794 = vmatprep.subr.mxu1 %v7590_v40  ;;  %v4403_v40 = vadd.f32 %v10754_v53, %v4106_v27  ;;  %v7600_v27 = vld [vmem:[%s12156_s16 + $0xa0] sm:$0xff] }
 0xf8c   :  { %4795 = vmatpush2.msra.mxu1 %v7589_v2 }
 0xf8d   :  { %4797 = vmatmul.mubr.f32.vlgmr.msra.gmra.mxu1 %v10550_v22 }
 0xf8e   :  { %7594 = vmatprep.mubr.msk.f32.mxu1 %vm4146_vm15, %v10555_v18 }
 0xf91   :  { %4803 = vmatmul.mubr.f32.gmra.mxu1 %v10557_v37 }
 0xf92   :  { %7595 = vmatprep.mubr.msk.f32.mxu1 %vm4146_vm15, %v10563_v51 }
 0xf95   :  { %4809 = vmatmul.mubr.f32.gmra.mxu1 %v10565_v25 }
 0xf96   :  { %5206 = vmatprep.mubr.f32.mxu1 %v8625_v61 }
0x1029   :  { %v4632_v7 = vpop.f32.mrf.mxu1 }
0x102a   :  { %v10932_v11 = vadd.f32 %v4632_v7, %v4391_v46  ;;  %v4405_v7 = vadd.f32 %v10758_v55, %v4108_v29  ;;  %v7596_v55 = vld [vmem:[%s12156_s16 + $0x80] sm:$0xff]  ;;  %v7625_v29 = vld [vmem:[%s12157_s17 + $0x3b8] sm:$0xff] }
0x102b   :  { %v4634_v14 = vpop.f32.mrf.mxu1 }
0x102c   :  { %v10938_v15 = vadd.f32 %v4634_v14, %v4392_v9 }
0x102d   :  { %v4638_v13 = vpop.f32.mrf.mxu1 }
0x102e   :  { %v10944_v8 = vadd.f32 %v4638_v13, %v4393_v10 }
0x102f   :  { %v4640_v17 = vpop.f32.mrf.mxu1 }
0x1030   :  { %v10950_v20 = vadd.f32 %v4640_v17, %v4394_v16 }
0x1031   :  { %v4644_v30 = vpop.f32.mrf.mxu1 }
0x1032   :  { %v10956_v19 = vadd.f32 %v4644_v30, %v4395_v42  ;;  %v7643_v30 = vld [vmem:[%s12157_s17 + $0x448] sm:$0xff] }
0x1033   :  { %v4646_v23 = vpop.f32.mrf.mxu1 }
0x1034   :  { %v10962_v60 = vadd.f32 %v4646_v23, %v4396_v21  ;;  %v7642_v21 = vld [vmem:[%s12157_s17 + $0x440] sm:$0xff]  ;;  %v7641_v23 = vld [vmem:[%s12157_s17 + $0x438] sm:$0xff] }
0x1035   :  { %v4650_v31 = vpop.f32.mrf.mxu1 }
0x1036   :  { %v10968_v32 = vadd.f32 %v4650_v31, %v4397_v3  ;;  %v7640_v3 = vld [vmem:[%s12157_s17 + $0x430] sm:$0xff]  ;;  %v7638_v31 = vld [vmem:[%s12157_s17 + $0x420] sm:$0xff] }
0x1037   :  { %v4652_v41 = vpop.f32.mrf.mxu1 }
0x1038   :  { %v10974_v45 = vadd.f32 %v4652_v41, %v4398_v5  ;;  %v7598_v5 = vld [vmem:[%s12156_s16 + $0x90] sm:$0xff] }
0x1039   :  { %v4656_v34 = vpop.f32.mrf.mxu1  ;;  %v7636_v41 = vld [vmem:[%s12157_s17 + $0x410] sm:$0xff] }
0x103a   :  { %v10980_v35 = vadd.f32 %v4656_v34, %v4399_v33  ;;  %v7635_v33 = vld [vmem:[%s12157_s17 + $0x408] sm:$0xff]  ;;  %v7599_v34 = vld [vmem:[%s12156_s16 + $0x98] sm:$0xff] }
0x103b   :  { %v4658_v44 = vpop.f32.mrf.mxu1 }
0x103c   :  { %v10986_v58 = vadd.f32 %v4658_v44, %v4400_v6  ;;  %v7633_v6 = vld [vmem:[%s12157_s17 + $0x3f8] sm:$0xff]  ;;  %v7631_v44 = vld [vmem:[%s12157_s17 + $0x3e8] sm:$0xff] }
0x103d   :  { %v4662_v59 = vpop.f32.mrf.mxu1 }
0x103e   :  { %v10992_v62 = vadd.f32 %v4662_v59, %v4401_v57  ;;  %v7630_v57 = vld [vmem:[%s12157_s17 + $0x3e0] sm:$0xff]  ;;  %v7629_v59 = vld [vmem:[%s12157_s17 + $0x3d8] sm:$0xff] }
0x103f   :  { %v4664_v24 = vpop.f32.mrf.mxu1 }
0x1040   :  { %v10998_v2 = vadd.f32 %v4664_v24, %v4402_v43  ;;  %v7628_v43 = vld [vmem:[%s12157_s17 + $0x3d0] sm:$0xff]  ;;  %v7626_v24 = vld [vmem:[%s12157_s17 + $0x3c0] sm:$0xff] }
0x1041   :  { %v4668_v4 = vpop.f32.mrf.mxu1 }
0x1042   :  { %v11004_v46 = vadd.f32 %v4668_v4, %v4403_v40  ;;  %v7601_v40 = vld [vmem:[%s12156_s16 + $0xa8] sm:$0xff]  ;;  %v7624_v4 = vld [vmem:[%s12157_s17 + $0x3b0] sm:$0xff] }
0x1043   :  { %v4670_v63 = vpop.f32.mrf.mxu1 }
0x1044   :  { %v11010_v9 = vadd.f32 %v4670_v63, %v4404_v38  ;;  %v7623_v38 = vld [vmem:[%s12157_s17 + $0x3a8] sm:$0xff]  ;;  %v7602_v63 = vld [vmem:[%s12156_s16 + $0xb0] sm:$0xff] }
0x1045   :  { %v4674_v53 = vpop.f32.mrf.mxu1 }
0x1046   :  { %v11013_v14 = vadd.f32 %v4674_v53, %v4405_v7  ;;  %v7621_v7 = vld [vmem:[%s12157_s17 + $0x398] sm:$0xff]  ;;  %v7620_v53 = vld [vmem:[%s12157_s17 + $0x390] sm:$0xff] }
0x1047   :  { %v4676_v10 = vpop.f32.mrf.mxu1 }
0x1048   :  { %v11015_v39 = vadd.f32 %v4676_v10, %v4406_v12  ;;  %v7619_v12 = vld [vmem:[%s12157_s17 + $0x388] sm:$0xff]  ;;  %v7618_v10 = vld [vmem:[%s12157_s17 + $0x380] sm:$0xff] }
0x104d   :  { %v4798_v54 = vpop.f32.mrf.mxu1 }
0x104f   :  { %v4800_v13 = vpop.f32.mrf.mxu1 }
0x1051   :  { %v4804_v16 = vpop.f32.mrf.mxu1 }
0x1053   :  { %v4806_v0 = vpop.f32.mrf.mxu1 }
0x1055   :  { %v4810_v17 = vpop.f32.mrf.mxu1 }
0x1057   :  { %v4812_v42 = vpop.f32.mrf.mxu1 }
0x1058   :  { %7604 = vmatprep.subr.msk.mxu0 %vm122_vm0, %v4812_v42  ;;  %v7649_v42 = vld [vmem:[%s12157_s17 + $0x478] sm:$0xff] }
0x1059   :  { %7605 = vmatpush1.msk.msra.mxu0 %vm122_vm0, %v4810_v17  ;;  %v7614_v17 = vld [vmem:[%s12157_s17 + $0x360] sm:$0xff] }
0x105a   :  { %4882 = vmatprep.subr.mxu0 %v4806_v0  ;;  %v7615_v0 = vld [vmem:[%s12157_s17 + $0x368] sm:$0xff] }
0x105b   :  { %4883 = vmatpush1.msra.mxu0 %v4804_v16  ;;  %v7616_v16 = vld [vmem:[%s12157_s17 + $0x370] sm:$0xff] }
0x105c   :  { %4884 = vmatprep.subr.mxu0 %v4800_v13  ;;  %v7617_v13 = vld [vmem:[%s12157_s17 + $0x378] sm:$0xff] }
0x105d   :  { %4885 = vmatpush1.msra.mxu0 %v4798_v54  ;;  %v7603_v54 = vld [vmem:[%s12156_s16 + $0xb8] sm:$0x3] }
0x105e   :  { %7606 = vmatmul.mubr.msk.f32.vlgmr.msra.gmra.mxu0 %vm4247_vm1, %v7596_v55  ;;  %5020 = vmatprep.subr.mxu0 %v7645_v56  ;;  %v7648_v55 = vld [vmem:[%s12157_s17 + $0x470] sm:$0xff]  ;;  %v7647_v56 = vld [vmem:[%s12157_s17 + $0x468] sm:$0xff] }
0x105f   :  { %5021 = vmatpush1.msra.mxu0 %v7644_v36  ;;  %4924 = vmatprep.mubr.f32.mxu0 %v8625_v61  ;;  %v7646_v36 = vld [vmem:[%s12157_s17 + $0x460] sm:$0xff] }
0x1060   :  { %5022 = vmatprep.subr.mxu0 %v7643_v30 }
0x1061   :  { %5023 = vmatpush1.msra.mxu0 %v7642_v21 }
0x1062   :  { %7607 = vmatmul.mubr.msk.f32.gmra.mxu0 %vm4247_vm1, %v7597_v47  ;;  %5024 = vmatprep.subr.mxu0 %v7641_v23 }
0x1063   :  { %5025 = vmatpush1.msra.mxu0 %v7640_v3  ;;  %4930 = vmatprep.mubr.f32.mxu0 %v8625_v61 }
0x1064   :  { %5026 = vmatprep.subr.mxu0 %v7639_v48 }
0x1065   :  { %5027 = vmatpush1.msra.mxu0 %v7638_v31 }
0x1066   :  { %7608 = vmatmul.mubr.msk.f32.gmra.mxu0 %vm4247_vm1, %v7598_v5  ;;  %5028 = vmatprep.subr.mxu0 %v7637_v49 }
0x1067   :  { %5029 = vmatpush1.msra.mxu0 %v7636_v41  ;;  %4936 = vmatprep.mubr.f32.mxu0 %v8625_v61 }
0x1068   :  { %5030 = vmatprep.subr.mxu0 %v7635_v33 }
0x1069   :  { %5031 = vmatpush1.msra.mxu0 %v7634_v50 }
0x106a   :  { %7609 = vmatmul.mubr.msk.f32.gmra.mxu0 %vm4247_vm1, %v7599_v34  ;;  %5032 = vmatprep.subr.mxu0 %v7633_v6 }
0x106b   :  { %5033 = vmatpush1.msra.mxu0 %v7632_v26  ;;  %4942 = vmatprep.mubr.f32.mxu0 %v8625_v61 }
0x106c   :  { %5034 = vmatprep.subr.mxu0 %v7631_v44 }
0x106d   :  { %5035 = vmatpush1.msra.mxu0 %v7630_v57 }
0x106e   :  { %7610 = vmatmul.mubr.msk.f32.gmra.mxu0 %vm4247_vm1, %v7600_v27  ;;  %5036 = vmatprep.subr.mxu0 %v7629_v59 }
0x106f   :  { %5037 = vmatpush1.msra.mxu0 %v7628_v43  ;;  %4948 = vmatprep.mubr.f32.mxu0 %v8625_v61 }
0x1070   :  { %5038 = vmatprep.subr.mxu0 %v7627_v28 }
0x1071   :  { %5039 = vmatpush1.msra.mxu0 %v7626_v24 }
0x1072   :  { %7611 = vmatmul.mubr.msk.f32.gmra.mxu0 %vm4247_vm1, %v7601_v40  ;;  %5040 = vmatprep.subr.mxu0 %v7625_v29 }
0x1073   :  { %5041 = vmatpush1.msra.mxu0 %v7624_v4  ;;  %4954 = vmatprep.mubr.f32.mxu0 %v8625_v61 }
0x1074   :  { %5042 = vmatprep.subr.mxu0 %v7623_v38 }
0x1075   :  { %5043 = vmatpush1.msra.mxu0 %v7622_v52  ;;  %v7699_v52 = vld [vmem:[%s12157_s17 + $0x560] sm:$0xff] }
0x1076   :  { %7612 = vmatmul.mubr.msk.f32.gmra.mxu0 %vm4247_vm1, %v7602_v63  ;;  %5044 = vmatprep.subr.mxu0 %v7621_v7  ;;  %v7654_v63 = vld [vmem:[%s12156_s16 + $0xc8] sm:$0xff]  ;;  %v7698_v7 = vld [vmem:[%s12157_s17 + $0x558] sm:$0xff] }
0x1077   :  { %5045 = vmatpush1.msra.mxu0 %v7620_v53  ;;  %4960 = vmatprep.mubr.f32.mxu0 %v8625_v61  ;;  %v7697_v53 = vld [vmem:[%s12157_s17 + $0x550] sm:$0xff] }
0x1078   :  { %5046 = vmatprep.subr.mxu0 %v7619_v12  ;;  %v7696_v12 = vld [vmem:[%s12157_s17 + $0x548] sm:$0xff] }
0x1079   :  { %5047 = vmatpush1.msra.mxu0 %v7618_v10  ;;  %v7695_v10 = vld [vmem:[%s12157_s17 + $0x540] sm:$0xff] }
0x107a   :  { %7613 = vmatmul.mubr.msk.f32.gmra.mxu0 %vm4247_vm1, %v7603_v54  ;;  %5048 = vmatprep.subr.mxu0 %v7617_v13  ;;  %v7655_v54 = vld [vmem:[%s12156_s16 + $0xd0] sm:$0xff]  ;;  %v7694_v13 = vld [vmem:[%s12157_s17 + $0x538] sm:$0xff] }
0x107b   :  { %5049 = vmatpush1.msra.mxu0 %v7616_v16  ;;  %7650 = vmatprep.mubr.msk.f32.mxu0 %vm4146_vm15, %v10548_v1  ;;  %v7693_v16 = vld [vmem:[%s12157_s17 + $0x530] sm:$0xff] }
0x107c   :  { %5050 = vmatprep.subr.mxu0 %v7615_v0  ;;  %v7692_v0 = vld [vmem:[%s12157_s17 + $0x528] sm:$0xff] }
0x107d   :  { %5051 = vmatpush1.msra.mxu0 %v7614_v17  ;;  %v7691_v17 = vld [vmem:[%s12157_s17 + $0x520] sm:$0xff] }
0x107e   :  { %5080 = vmatprep.subr.mxu0 %v7649_v42  ;;  %v7656_v42 = vld [vmem:[%s12156_s16 + $0xd8] sm:$0xff] }
0x107f   :  { %5081 = vmatpush2.msra.mxu0 %v7648_v55  ;;  %v7690_v55 = vld [vmem:[%s12157_s17 + $0x518] sm:$0xff] }
0x1080   :  { %5082 = vmatprep.subr.mxu0 %v7647_v56  ;;  %v7689_v56 = vld [vmem:[%s12157_s17 + $0x510] sm:$0xff] }
0x1081   :  { %5083 = vmatpush2.msra.mxu0 %v7646_v36  ;;  %v7688_v36 = vld [vmem:[%s12157_s17 + $0x508] sm:$0xff] }
0x1082   :  { %5085 = vmatmul.mubr.f32.vlgmr.msra.gmra.mxu0 %v10550_v22 }
0x1083   :  { %7651 = vmatprep.mubr.msk.f32.mxu0 %vm4146_vm15, %v10555_v18 }
0x1086   :  { %5091 = vmatmul.mubr.f32.gmra.mxu0 %v10557_v37 }
0x1087   :  { %7652 = vmatprep.mubr.msk.f32.mxu0 %vm4146_vm15, %v10563_v51 }
0x108a   :  { %5097 = vmatmul.mubr.f32.gmra.mxu0 %v10565_v25 }
0x108b   :  { %5494 = vmatprep.mubr.f32.mxu0 %v8625_v61 }
0x111e   :  { %v4920_v30 = vpop.f32.mrf.mxu0 }
0x111f   :  { %v11177_v21 = vadd.f32 %v4920_v30, %v10932_v11  ;;  %v7687_v30 = vld [vmem:[%s12157_s17 + $0x500] sm:$0xff] }
0x1120   :  { %v4922_v47 = vpop.f32.mrf.mxu0 }
0x1121   :  { %v11180_v23 = vadd.f32 %v4922_v47, %v10938_v15  ;;  %v7657_v47 = vld [vmem:[%s12156_s16 + $0xe0] sm:$0xff] }
0x1122   :  { %v4926_v3 = vpop.f32.mrf.mxu0 }
0x1123   :  { %v11183_v48 = vadd.f32 %v4926_v3, %v10944_v8  ;;  %v7686_v3 = vld [vmem:[%s12157_s17 + $0x4f8] sm:$0xff] }
0x1124   :  { %v4928_v31 = vpop.f32.mrf.mxu0 }
0x1125   :  { %v11186_v5 = vadd.f32 %v4928_v31, %v10950_v20  ;;  %v7685_v31 = vld [vmem:[%s12157_s17 + $0x4f0] sm:$0xff] }
0x1126   :  { %v4932_v49 = vpop.f32.mrf.mxu0 }
0x1127   :  { %v11189_v41 = vadd.f32 %v4932_v49, %v10956_v19  ;;  %v7684_v49 = vld [vmem:[%s12157_s17 + $0x4e8] sm:$0xff] }
0x1128   :  { %v4934_v33 = vpop.f32.mrf.mxu0 }
0x1129   :  { %v11192_v11 = vadd.f32 %v4934_v33, %v10962_v60  ;;  %v7683_v33 = vld [vmem:[%s12157_s17 + $0x4e0] sm:$0xff] }
0x112a   :  { %v4938_v50 = vpop.f32.mrf.mxu0 }
0x112b   :  { %v11195_v15 = vadd.f32 %v4938_v50, %v10968_v32  ;;  %v7658_v50 = vld [vmem:[%s12156_s16 + $0xe8] sm:$0xff] }
0x112c   :  { %v4940_v34 = vpop.f32.mrf.mxu0 }
0x112d   :  { %v11198_v8 = vadd.f32 %v4940_v34, %v10974_v45  ;;  %v7682_v34 = vld [vmem:[%s12157_s17 + $0x4d8] sm:$0xff] }
0x112e   :  { %v4944_v6 = vpop.f32.mrf.mxu0 }
0x112f   :  { %v11201_v20 = vadd.f32 %v4944_v6, %v10980_v35  ;;  %v7681_v6 = vld [vmem:[%s12157_s17 + $0x4d0] sm:$0xff] }
0x1130   :  { %v4946_v26 = vpop.f32.mrf.mxu0 }
0x1131   :  { %v11204_v19 = vadd.f32 %v4946_v26, %v10986_v58  ;;  %v7680_v26 = vld [vmem:[%s12157_s17 + $0x4c8] sm:$0xff] }
0x1132   :  { %v4950_v44 = vpop.f32.mrf.mxu0 }
0x1133   :  { %v11207_v60 = vadd.f32 %v4950_v44, %v10992_v62  ;;  %v7679_v44 = vld [vmem:[%s12157_s17 + $0x4c0] sm:$0xff] }
0x1134   :  { %v4952_v57 = vpop.f32.mrf.mxu0 }
0x1135   :  { %v11210_v32 = vadd.f32 %v4952_v57, %v10998_v2  ;;  %v7659_v57 = vld [vmem:[%s12156_s16 + $0xf0] sm:$0xff] }
0x1136   :  { %v4956_v27 = vpop.f32.mrf.mxu0 }
0x1137   :  { %v11213_v45 = vadd.f32 %v4956_v27, %v11004_v46  ;;  %v7653_v46 = vld [vmem:[%s12156_s16 + $0xc0] sm:$0xff]  ;;  %v7678_v27 = vld [vmem:[%s12157_s17 + $0x4b8] sm:$0xff] }
0x1138   :  { %v4958_v59 = vpop.f32.mrf.mxu0 }
0x1139   :  { %v11216_v35 = vadd.f32 %v4958_v59, %v11010_v9  ;;  %v7702_v9 = vld [vmem:[%s12157_s17 + $0x578] sm:$0xff]  ;;  %v7677_v59 = vld [vmem:[%s12157_s17 + $0x4b0] sm:$0xff] }
0x113a   :  { %v4962_v43 = vpop.f32.mrf.mxu0 }
0x113b   :  { %v11219_v58 = vadd.f32 %v4962_v43, %v11013_v14  ;;  %v7701_v14 = vld [vmem:[%s12157_s17 + $0x570] sm:$0xff]  ;;  %v7676_v43 = vld [vmem:[%s12157_s17 + $0x4a8] sm:$0xff] }
0x113c   :  { %v4964_v28 = vpop.f32.mrf.mxu0 }
0x113d   :  { %v11222_v62 = vadd.f32 %v4964_v28, %v11015_v39  ;;  %v7700_v39 = vld [vmem:[%s12157_s17 + $0x568] sm:$0xff]  ;;  %v7675_v28 = vld [vmem:[%s12157_s17 + $0x4a0] sm:$0xff] }
0x1142   :  { %v5086_v24 = vpop.f32.mrf.mxu0 }
0x1144   :  { %v5088_v40 = vpop.f32.mrf.mxu0 }
0x1146   :  { %v5092_v2 = vpop.f32.mrf.mxu0 }
0x1148   :  { %v5094_v29 = vpop.f32.mrf.mxu0 }
0x114a   :  { %v5098_v4 = vpop.f32.mrf.mxu0 }
0x114c   :  { %v5100_v38 = vpop.f32.mrf.mxu0 }
0x114d   :  { %7661 = vmatprep.subr.msk.mxu1 %vm122_vm0, %v5100_v38  ;;  %v7706_v38 = vld [vmem:[%s12157_s17 + $0x598] sm:$0xff] }
0x114e   :  { %7662 = vmatpush1.msk.msra.mxu1 %vm122_vm0, %v5098_v4  ;;  %v7671_v4 = vld [vmem:[%s12157_s17 + $0x480] sm:$0xff] }
0x114f   :  { %5170 = vmatprep.subr.mxu1 %v5094_v29  ;;  %v7672_v29 = vld [vmem:[%s12157_s17 + $0x488] sm:$0xff] }
0x1150   :  { %5171 = vmatpush1.msra.mxu1 %v5092_v2  ;;  %v7673_v2 = vld [vmem:[%s12157_s17 + $0x490] sm:$0xff] }
0x1151   :  { %5172 = vmatprep.subr.mxu1 %v5088_v40  ;;  %v7674_v40 = vld [vmem:[%s12157_s17 + $0x498] sm:$0xff] }
0x1152   :  { %5173 = vmatpush1.msra.mxu1 %v5086_v24  ;;  %v7660_v24 = vld [vmem:[%s12156_s16 + $0xf8] sm:$0x3] }
0x1153   :  { %7663 = vmatmul.mubr.msk.f32.vlgmr.msra.gmra.mxu1 %vm4247_vm1, %v7653_v46  ;;  %5308 = vmatprep.subr.mxu1 %v7702_v9  ;;  %v7705_v46 = vld [vmem:[%s12157_s17 + $0x590] sm:$0xff]  ;;  %v7704_v9 = vld [vmem:[%s12157_s17 + $0x588] sm:$0xff] }
0x1154   :  { %5309 = vmatpush1.msra.mxu1 %v7701_v14  ;;  %5212 = vmatprep.mubr.f32.mxu1 %v8625_v61  ;;  %v7703_v14 = vld [vmem:[%s12157_s17 + $0x580] sm:$0xff] }
0x1155   :  { %5310 = vmatprep.subr.mxu1 %v7700_v39 }
0x1156   :  { %5311 = vmatpush1.msra.mxu1 %v7699_v52 }
0x1157   :  { %7664 = vmatmul.mubr.msk.f32.gmra.mxu1 %vm4247_vm1, %v7654_v63  ;;  %5312 = vmatprep.subr.mxu1 %v7698_v7 }
0x1158   :  { %5313 = vmatpush1.msra.mxu1 %v7697_v53  ;;  %5218 = vmatprep.mubr.f32.mxu1 %v8625_v61 }
0x1159   :  { %5314 = vmatprep.subr.mxu1 %v7696_v12 }
0x115a   :  { %5315 = vmatpush1.msra.mxu1 %v7695_v10 }
0x115b   :  { %7665 = vmatmul.mubr.msk.f32.gmra.mxu1 %vm4247_vm1, %v7655_v54  ;;  %5316 = vmatprep.subr.mxu1 %v7694_v13 }
0x115c   :  { %5317 = vmatpush1.msra.mxu1 %v7693_v16  ;;  %5224 = vmatprep.mubr.f32.mxu1 %v8625_v61 }
0x115d   :  { %5318 = vmatprep.subr.mxu1 %v7692_v0 }
0x115e   :  { %5319 = vmatpush1.msra.mxu1 %v7691_v17 }
0x115f   :  { %7666 = vmatmul.mubr.msk.f32.gmra.mxu1 %vm4247_vm1, %v7656_v42  ;;  %5320 = vmatprep.subr.mxu1 %v7690_v55 }
0x1160   :  { %5321 = vmatpush1.msra.mxu1 %v7689_v56  ;;  %5230 = vmatprep.mubr.f32.mxu1 %v8625_v61 }
0x1161   :  { %5322 = vmatprep.subr.mxu1 %v7688_v36 }
0x1162   :  { %5323 = vmatpush1.msra.mxu1 %v7687_v30 }
0x1163   :  { %7667 = vmatmul.mubr.msk.f32.gmra.mxu1 %vm4247_vm1, %v7657_v47  ;;  %5324 = vmatprep.subr.mxu1 %v7686_v3 }
0x1164   :  { %5325 = vmatpush1.msra.mxu1 %v7685_v31  ;;  %5236 = vmatprep.mubr.f32.mxu1 %v8625_v61 }
0x1165   :  { %5326 = vmatprep.subr.mxu1 %v7684_v49  ;;  %v5580_v49 = vld [vmem:[%s12160_s20 + $0x68] sm:$0xff] }
0x1166   :  { %5327 = vmatpush1.msra.mxu1 %v7683_v33  ;;  %v5579_v33 = vld [vmem:[%s12160_s20 + $0x60] sm:$0xff] }
0x1167   :  { %7668 = vmatmul.mubr.msk.f32.gmra.mxu1 %vm4247_vm1, %v7658_v50  ;;  %5328 = vmatprep.subr.mxu1 %v7682_v34  ;;  %v7712_v50 = vld [vmem:[%s12156_s16 + $0x110] sm:$0xff]  ;;  %v5578_v34 = vld [vmem:[%s12160_s20 + $0x58] sm:$0xff] }
0x1168   :  { %5329 = vmatpush1.msra.mxu1 %v7681_v6  ;;  %5242 = vmatprep.mubr.f32.mxu1 %v8625_v61  ;;  %v5577_v6 = vld [vmem:[%s12160_s20 + $0x50] sm:$0xff] }
0x1169   :  { %5330 = vmatprep.subr.mxu1 %v7680_v26  ;;  %v7713_v26 = vld [vmem:[%s12156_s16 + $0x118] sm:$0xff] }
0x116a   :  { %5331 = vmatpush1.msra.mxu1 %v7679_v44  ;;  %v5576_v44 = vld [vmem:[%s12160_s20 + $0x48] sm:$0xff] }
0x116b   :  { %7669 = vmatmul.mubr.msk.f32.gmra.mxu1 %vm4247_vm1, %v7659_v57  ;;  %5332 = vmatprep.subr.mxu1 %v7678_v27  ;;  %v5575_v57 = vld [vmem:[%s12160_s20 + $0x40] sm:$0xff] }
0x116c   :  { %5333 = vmatpush1.msra.mxu1 %v7677_v59  ;;  %5248 = vmatprep.mubr.f32.mxu1 %v8625_v61  ;;  %v7714_v27 = vld [vmem:[%s12156_s16 + $0x120] sm:$0xff]  ;;  %v5574_v59 = vld [vmem:[%s12160_s20 + $0x38] sm:$0xff] }
0x116d   :  { %5334 = vmatprep.subr.mxu1 %v7676_v43  ;;  %v5573_v43 = vld [vmem:[%s12160_s20 + $0x30] sm:$0xff] }
0x116e   :  { %5335 = vmatpush1.msra.mxu1 %v7675_v28  ;;  %v7715_v28 = vld [vmem:[%s12156_s16 + $0x128] sm:$0xff] }
0x116f   :  { %7670 = vmatmul.mubr.msk.f32.gmra.mxu1 %vm4247_vm1, %v7660_v24  ;;  %5336 = vmatprep.subr.mxu1 %v7674_v40  ;;  %v5572_v24 = vld [vmem:[%s12160_s20 + $0x28] sm:$0xff]  ;;  %v5571_v40 = vld [vmem:[%s12160_s20 + $0x20] sm:$0xff] }
0x1170   :  { %5337 = vmatpush1.msra.mxu1 %v7673_v2  ;;  %7707 = vmatprep.mubr.msk.f32.mxu1 %vm4146_vm15, %v10548_v1  ;;  %v7716_v2 = vld [vmem:[%s12156_s16 + $0x130] sm:$0xff] }
0x1171   :  { %5338 = vmatprep.subr.mxu1 %v7672_v29  ;;  %v5570_v29 = vld [vmem:[%s12160_s20 + $0x18] sm:$0xff] }
0x1172   :  { %5339 = vmatpush1.msra.mxu1 %v7671_v4  ;;  %v5569_v4 = vld [vmem:[%s12160_s20 + $0x10] sm:$0xff] }
0x1173   :  { %5368 = vmatprep.subr.mxu1 %v7706_v38  ;;  %v7717_v38 = vld [vmem:[%s12156_s16 + $0x138] sm:$0x3] }
0x1174   :  { %5369 = vmatpush2.msra.mxu1 %v7705_v46  ;;  %v5568_v46 = vld [vmem:[%s12160_s20 + $0x8] sm:$0xff] }
0x1175   :  { %5370 = vmatprep.subr.mxu1 %v7704_v9  ;;  %v5567_v9 = vld [vmem:[%s12160_s20] sm:$0xff] }
0x1176   :  { %5371 = vmatpush2.msra.mxu1 %v7703_v14  ;;  %v5585_v14 = vld [vmem:[%s12160_s20 + $0x90] sm:$0x1] }
0x1177   :  { %5373 = vmatmul.mubr.f32.vlgmr.msra.gmra.mxu1 %v10550_v22 }
0x1178   :  { %7708 = vmatprep.mubr.msk.f32.mxu1 %vm4146_vm15, %v10555_v18 }
0x117b   :  { %5379 = vmatmul.mubr.f32.gmra.mxu1 %v10557_v37 }
0x117c   :  { %7709 = vmatprep.mubr.msk.f32.mxu1 %vm4146_vm15, %v10563_v51 }
0x117f   :  { %5385 = vmatmul.mubr.f32.gmra.mxu1 %v10565_v25 }
0x1213   :  { %v5208_v1 = vpop.f32.mrf.mxu1 }
0x1214   :  { %v11383_v39 = vadd.f32 %v5208_v1, %v11177_v21  ;;  %v5584_v1 = vld [vmem:[%s12160_s20 + $0x88] sm:$0xff] }
0x1215   :  { %v5210_v52 = vpop.f32.mrf.mxu1 }
0x1216   :  { %v11386_v63 = vadd.f32 %v5210_v52, %v11180_v23  ;;  %v5583_v52 = vld [vmem:[%s12160_s20 + $0x80] sm:$0xff] }
0x1217   :  { %v5214_v7 = vpop.f32.mrf.mxu1 }
0x1218   :  { %v11389_v22 = vadd.f32 %v5214_v7, %v11183_v48 }
0x1219   :  { %v5216_v18 = vpop.f32.mrf.mxu1 }
0x121a   :  { %v11392_v37 = vadd.f32 %v5216_v18, %v11186_v5 }
0x121b   :  { %v5220_v53 = vpop.f32.mrf.mxu1 }
0x121c   :  { %v11395_v51 = vadd.f32 %v5220_v53, %v11189_v41 }
0x121d   :  { %v5222_v25 = vpop.f32.mrf.mxu1 }
0x121e   :  { %v11398_v21 = vadd.f32 %v5222_v25, %v11192_v11 }
0x121f   :  { %v5226_v12 = vpop.f32.mrf.mxu1 }
0x1220   :  { %v11401_v23 = vadd.f32 %v5226_v12, %v11195_v15 }
0x1221   :  { %v5228_v10 = vpop.f32.mrf.mxu1 }
0x1222   :  { %v11404_v48 = vadd.f32 %v5228_v10, %v11198_v8 }
0x1223   :  { %v5232_v54 = vpop.f32.mrf.mxu1 }
0x1224   :  { %v11407_v5 = vadd.f32 %v5232_v54, %v11201_v20 }
0x1225   :  { %v5234_v13 = vpop.f32.mrf.mxu1 }
0x1226   :  { %v11410_v41 = vadd.f32 %v5234_v13, %v11204_v19 }
0x1227   :  { %v5238_v16 = vpop.f32.mrf.mxu1 }
0x1228   :  { %v11413_v11 = vadd.f32 %v5238_v16, %v11207_v60 }
0x1229   :  { %v5240_v0 = vpop.f32.mrf.mxu1 }
0x122a   :  { %v11416_v15 = vadd.f32 %v5240_v0, %v11210_v32 }
0x122b   :  { %v5244_v17 = vpop.f32.mrf.mxu1 }
0x122c   :  { %v11419_v8 = vadd.f32 %v5244_v17, %v11213_v45  ;;  %v7710_v45 = vld [vmem:[%s12156_s16 + $0x100] sm:$0xff] }
0x122d   :  { %v5246_v42 = vpop.f32.mrf.mxu1 }
0x122e   :  { %v11422_v20 = vadd.f32 %v5246_v42, %v11216_v35  ;;  %v5582_v35 = vld [vmem:[%s12160_s20 + $0x78] sm:$0xff] }
0x122f   :  { %v5250_v55 = vpop.f32.mrf.mxu1 }
0x1230   :  { %v11425_v19 = vadd.f32 %v5250_v55, %v11219_v58  ;;  %v5581_v58 = vld [vmem:[%s12160_s20 + $0x70] sm:$0xff] }
0x1231   :  { %v5252_v56 = vpop.f32.mrf.mxu1 }
0x1232   :  { %v11428_v60 = vadd.f32 %v5252_v56, %v11222_v62  ;;  %v7711_v62 = vld [vmem:[%s12156_s16 + $0x108] sm:$0xff] }
0x1237   :  { %v5374_v36 = vpop.f32.mrf.mxu1 }
0x1239   :  { %v5376_v30 = vpop.f32.mrf.mxu1 }
0x123b   :  { %v5380_v32 = vpop.f32.mrf.mxu1 }
0x123d   :  { %v5382_v47 = vpop.f32.mrf.mxu1 }
0x123f   :  { %v5386_v3 = vpop.f32.mrf.mxu1 }
0x1241   :  { %v5388_v31 = vpop.f32.mrf.mxu1 }
0x1242   :  { %7718 = vmatprep.subr.msk.mxu0 %vm122_vm0, %v5388_v31 }
0x1243   :  { %7719 = vmatpush1.msk.msra.mxu0 %vm122_vm0, %v5386_v3 }
0x1244   :  { %5458 = vmatprep.subr.mxu0 %v5382_v47 }
0x1245   :  { %5459 = vmatpush1.msra.mxu0 %v5380_v32 }
0x1246   :  { %5460 = vmatprep.subr.mxu0 %v5376_v30 }
0x1247   :  { %5461 = vmatpush1.msra.mxu0 %v5374_v36 }
0x1248   :  { %7720 = vmatmul.mubr.msk.f32.vlgmr.msra.gmra.mxu0 %vm4247_vm1, %v7710_v45  ;;  %5614 = vmatprep.subr.mxu0 %v8625_v61 }
0x1249   :  { %5500 = vmatprep.mubr.f32.mxu0 %v8625_v61  ;;  %5615 = vmatpush1.msra.mxu0 %v5582_v35 }
0x124a   :  { %5616 = vmatprep.subr.mxu0 %v8625_v61 }
0x124b   :  { %5617 = vmatpush1.msra.mxu0 %v5581_v58 }
0x124c   :  { %7721 = vmatmul.mubr.msk.f32.gmra.mxu0 %vm4247_vm1, %v7711_v62  ;;  %5618 = vmatprep.subr.mxu0 %v8625_v61 }
0x124d   :  { %5506 = vmatprep.mubr.f32.mxu0 %v8625_v61  ;;  %5619 = vmatpush1.msra.mxu0 %v5580_v49 }
0x124e   :  { %5620 = vmatprep.subr.mxu0 %v8625_v61 }
0x124f   :  { %5621 = vmatpush1.msra.mxu0 %v5579_v33 }
0x1250   :  { %7722 = vmatmul.mubr.msk.f32.gmra.mxu0 %vm4247_vm1, %v7712_v50  ;;  %5622 = vmatprep.subr.mxu0 %v8625_v61 }
0x1251   :  { %5512 = vmatprep.mubr.f32.mxu0 %v8625_v61  ;;  %5623 = vmatpush1.msra.mxu0 %v5578_v34 }
0x1252   :  { %5624 = vmatprep.subr.mxu0 %v8625_v61 }
0x1253   :  { %5625 = vmatpush1.msra.mxu0 %v5577_v6 }
0x1254   :  { %7723 = vmatmul.mubr.msk.f32.gmra.mxu0 %vm4247_vm1, %v7713_v26  ;;  %5626 = vmatprep.subr.mxu0 %v8625_v61 }
0x1255   :  { %5518 = vmatprep.mubr.f32.mxu0 %v8625_v61  ;;  %5627 = vmatpush1.msra.mxu0 %v5576_v44 }
0x1256   :  { %5628 = vmatprep.subr.mxu0 %v8625_v61 }
0x1257   :  { %5629 = vmatpush1.msra.mxu0 %v5575_v57 }
0x1258   :  { %7724 = vmatmul.mubr.msk.f32.gmra.mxu0 %vm4247_vm1, %v7714_v27  ;;  %5630 = vmatprep.subr.mxu0 %v8625_v61 }
0x1259   :  { %5524 = vmatprep.mubr.f32.mxu0 %v8625_v61  ;;  %5631 = vmatpush1.msra.mxu0 %v5574_v59  ;;  %v5720_v59 = vld [vmem:[%s12159_s19 + $0x8] sm:$0xff] }
0x125a   :  { %5632 = vmatprep.subr.mxu0 %v8625_v61 }
0x125b   :  { %5633 = vmatpush1.msra.mxu0 %v5573_v43  ;;  %v7761_v43 = vld [vmem:[%s12160_s20 + $0x110] sm:$0xff] }
0x125c   :  { %7725 = vmatmul.mubr.msk.f32.gmra.mxu0 %vm4247_vm1, %v7715_v28  ;;  %5634 = vmatprep.subr.mxu0 %v8625_v61  ;;  %v5721_v28 = vld [vmem:[%s12159_s19 + $0x10] sm:$0xff] }
0x125d   :  { %5530 = vmatprep.mubr.f32.mxu0 %v8625_v61  ;;  %5635 = vmatpush1.msra.mxu0 %v5572_v24  ;;  %v7760_v24 = vld [vmem:[%s12160_s20 + $0x108] sm:$0xff] }
0x125e   :  { %5636 = vmatprep.subr.mxu0 %v8625_v61 }
0x125f   :  { %5637 = vmatpush1.msra.mxu0 %v5571_v40  ;;  %v5722_v40 = vld [vmem:[%s12159_s19 + $0x18] sm:$0xff] }
0x1260   :  { %7726 = vmatmul.mubr.msk.f32.gmra.mxu0 %vm4247_vm1, %v7716_v2  ;;  %5638 = vmatprep.subr.mxu0 %v8625_v61  ;;  %v7759_v2 = vld [vmem:[%s12160_s20 + $0x100] sm:$0xff] }
0x1261   :  { %5536 = vmatprep.mubr.f32.mxu0 %v8625_v61  ;;  %5639 = vmatpush1.msra.mxu0 %v5570_v29  ;;  %v5723_v29 = vld [vmem:[%s12159_s19 + $0x20] sm:$0xff] }
0x1262   :  { %5640 = vmatprep.subr.mxu0 %v8625_v61 }
0x1263   :  { %5641 = vmatpush1.msra.mxu0 %v5569_v4  ;;  %v7758_v4 = vld [vmem:[%s12160_s20 + $0xf8] sm:$0xff] }
0x1264   :  { %7727 = vmatmul.mubr.msk.f32.gmra.mxu0 %vm4247_vm1, %v7717_v38  ;;  %5642 = vmatprep.subr.mxu0 %v8625_v61  ;;  %v5724_v38 = vld [vmem:[%s12159_s19 + $0x28] sm:$0xff] }
0x1265   :  { %5643 = vmatpush1.msra.mxu0 %v5568_v46  ;;  %v7757_v46 = vld [vmem:[%s12160_s20 + $0xf0] sm:$0xff] }
0x1266   :  { %5644 = vmatprep.subr.mxu0 %v8625_v61 }
0x1267   :  { %5645 = vmatpush1.msra.mxu0 %v5567_v9  ;;  %v5725_v9 = vld [vmem:[%s12159_s19 + $0x30] sm:$0xff] }
0x1268   :  { %5672 = vmatprep.subr.mxu0 %v8625_v61 }
0x1269   :  { %7728 = vmatpush2.msk.msra.mxu0 %vm244_vm2, %v5585_v14  ;;  %v7756_v14 = vld [vmem:[%s12160_s20 + $0xe8] sm:$0xff] }
0x126a   :  { %5674 = vmatprep.subr.mxu0 %v8625_v61 }
0x126b   :  { %5675 = vmatpush2.msra.mxu0 %v5584_v1  ;;  %v5726_v1 = vld [vmem:[%s12159_s19 + $0x38] sm:$0x3f] }
0x126c   :  { %5676 = vmatprep.subr.mxu0 %v8625_v61 }
0x126d   :  { %5677 = vmatpush2.msra.mxu0 %v5583_v52  ;;  %v7755_v52 = vld [vmem:[%s12160_s20 + $0xe0] sm:$0xff] }
0x1308   :  { %v5496_v7 = vpop.f32.mrf.mxu0 }
0x1309   :  { %v11552_v25 = vadd.f32 %v5496_v7, %v11383_v39  ;;  %v7754_v7 = vld [vmem:[%s12160_s20 + $0xd8] sm:$0xff] }
0x130a   :  { %v5498_v18 = vpop.f32.mrf.mxu0 }
0x130b   :  { %v11549_v53 = vadd.f32 %v5498_v18, %v11386_v63  ;;  %v7753_v18 = vld [vmem:[%s12160_s20 + $0xd0] sm:$0xff] }
0x130c   :  { %v5502_v12 = vpop.f32.mrf.mxu0 }
0x130d   :  { %7729 = vmatprep.mubr.msk.f32.mxu0 %vm5586_vm3, %v11549_v53  ;;  %v11561_v13 = vadd.f32 %v5502_v12, %v11389_v22  ;;  %v7752_v12 = vld [vmem:[%s12160_s20 + $0xc8] sm:$0xff] }
0x130e   :  { %v5504_v10 = vpop.f32.mrf.mxu0  ;;  %5679 = vmatmul.mubr.f32.vlgmr.msra.gmra.mxu0 %v11552_v25 }
0x130f   :  { %v11558_v54 = vadd.f32 %v5504_v10, %v11392_v37  ;;  %v7751_v10 = vld [vmem:[%s12160_s20 + $0xc0] sm:$0xff] }
0x1310   :  { %v5508_v16 = vpop.f32.mrf.mxu0 }
0x1311   :  { %7730 = vmatprep.mubr.msk.f32.mxu0 %vm5586_vm3, %v11558_v54  ;;  %v11570_v0 = vadd.f32 %v5508_v16, %v11395_v51  ;;  %v7750_v16 = vld [vmem:[%s12160_s20 + $0xb8] sm:$0xff] }
0x1312   :  { %v5510_v63 = vpop.f32.mrf.mxu0  ;;  %5684 = vmatmul.mubr.f32.gmra.mxu0 %v11561_v13 }
0x1313   :  { %v11567_v39 = vadd.f32 %v5510_v63, %v11398_v21  ;;  %v7749_v63 = vld [vmem:[%s12160_s20 + $0xb0] sm:$0xff] }
0x1314   :  { %v5514_v17 = vpop.f32.mrf.mxu0 }
0x1315   :  { %7731 = vmatprep.mubr.msk.f32.mxu0 %vm5586_vm3, %v11567_v39  ;;  %v11579_v42 = vadd.f32 %v5514_v17, %v11401_v23  ;;  %v7748_v17 = vld [vmem:[%s12160_s20 + $0xa8] sm:$0xff] }
0x1316   :  { %v5516_v37 = vpop.f32.mrf.mxu0  ;;  %5689 = vmatmul.mubr.f32.gmra.mxu0 %v11570_v0 }
0x1317   :  { %v11576_v22 = vadd.f32 %v5516_v37, %v11404_v48  ;;  %v7747_v37 = vld [vmem:[%s12160_s20 + $0xa0] sm:$0xff] }
0x1318   :  { %v5520_v55 = vpop.f32.mrf.mxu0 }
0x1319   :  { %7732 = vmatprep.mubr.msk.f32.mxu0 %vm5586_vm3, %v11576_v22  ;;  %v11588_v56 = vadd.f32 %v5520_v55, %v11407_v5  ;;  %v7746_v55 = vld [vmem:[%s12160_s20 + $0x98] sm:$0xff] }
0x131a   :  { %v5522_v21 = vpop.f32.mrf.mxu0  ;;  %5694 = vmatmul.mubr.f32.gmra.mxu0 %v11579_v42 }
0x131b   :  { %v11585_v51 = vadd.f32 %v5522_v21, %v11410_v41  ;;  %v7764_v21 = vld [vmem:[%s12160_s20 + $0x128] sm:$0x1] }
0x131c   :  { %v5526_v36 = vpop.f32.mrf.mxu0 }
0x131d   :  { %7733 = vmatprep.mubr.msk.f32.mxu0 %vm5586_vm3, %v11585_v51  ;;  %v11597_v30 = vadd.f32 %v5526_v36, %v11413_v11  ;;  %v7763_v36 = vld [vmem:[%s12160_s20 + $0x120] sm:$0xff] }
0x131e   :  { %v5528_v48 = vpop.f32.mrf.mxu0  ;;  %5699 = vmatmul.mubr.f32.gmra.mxu0 %v11588_v56 }
0x131f   :  { %v11594_v23 = vadd.f32 %v5528_v48, %v11416_v15  ;;  %v7762_v48 = vld [vmem:[%s12160_s20 + $0x118] sm:$0xff] }
0x1320   :  { %v5532_v32 = vpop.f32.mrf.mxu0 }
0x1321   :  { %7734 = vmatprep.mubr.msk.f32.mxu0 %vm5586_vm3, %v11594_v23  ;;  %v11606_v47 = vadd.f32 %v5532_v32, %v11419_v8  ;;  %v5719_v8 = vld [vmem:[%s12159_s19] sm:$0xff] }
0x1322   :  { %v5534_v41 = vpop.f32.mrf.mxu0  ;;  %5704 = vmatmul.mubr.f32.gmra.mxu0 %v11597_v30  ;;  %8379 = vmatprep.mubr.msk.f32.mxu1 %vm5727_vm4, %v5719_v8  ;;  %v7774_v32 = vld [vmem:[%s12159_s19 + $0x40] sm:$0xff] }
0x1323   :  { %v11603_v5 = vadd.f32 %v5534_v41, %v11422_v20 }
0x1324   :  { %v5538_v3 = vpop.f32.mrf.mxu0 }
0x1325   :  { %7735 = vmatprep.mubr.msk.f32.mxu0 %vm5586_vm3, %v11603_v5  ;;  %v11615_v31 = vadd.f32 %v5538_v3, %v11425_v19 }
0x1326   :  { %v5540_v15 = vpop.f32.mrf.mxu0  ;;  %5709 = vmatmul.mubr.f32.gmra.mxu0 %v11606_v47 }
0x1327   :  { %v11612_v11 = vadd.f32 %v5540_v15, %v11428_v60 }
0x1329   :  { %7736 = vmatprep.mubr.msk.f32.mxu0 %vm5586_vm3, %v11612_v11 }
0x132a   :  { %5714 = vmatmul.mubr.f32.gmra.mxu0 %v11615_v31 }
0x132b   :  { %8407 = vmatprep.mubr.msk.f32.mxu0 %vm5727_vm4, %v7774_v32  ;;  %v7809_v32 = vld [vmem:[%s12160_s20 + $0x1c0] sm:$0x1] }
0x13ce   :  { %v5680_v20 = vpop.f32.mrf.mxu0 }
0x13d0   :  { %v5682_v45 = vpop.f32.mrf.mxu0 }
0x13d2   :  { %v5685_v35 = vpop.f32.mrf.mxu0 }
0x13d4   :  { %v5687_v60 = vpop.f32.mrf.mxu0 }
0x13d6   :  { %v5690_v58 = vpop.f32.mrf.mxu0 }
0x13d8   :  { %v5692_v62 = vpop.f32.mrf.mxu0 }
0x13da   :  { %v5695_v19 = vpop.f32.mrf.mxu0 }
0x13dc   :  { %v5697_v49 = vpop.f32.mrf.mxu0 }
0x13de   :  { %v5700_v33 = vpop.f32.mrf.mxu0 }
0x13e0   :  { %v5702_v50 = vpop.f32.mrf.mxu0 }
0x13e2   :  { %v5705_v34 = vpop.f32.mrf.mxu0 }
0x13e4   :  { %v5707_v6 = vpop.f32.mrf.mxu0 }
0x13e6   :  { %v5710_v26 = vpop.f32.mrf.mxu0 }
0x13e8   :  { %v5712_v44 = vpop.f32.mrf.mxu0 }
0x13ea   :  { %v5715_v57 = vpop.f32.mrf.mxu0 }
0x13eb   :  { %8363 = vmatprep.subr.msk.mxu1 %vm122_vm0, %v5715_v57 }
0x13ec   :  { %v5717_v27 = vpop.f32.mrf.mxu0  ;;  %8364 = vmatpush3.msk.msra.mxu1 %vm122_vm0, %v5715_v57 }
0x13ed   :  { %8365 = vmatprep.subr.mxu1 %v5710_v26 }
0x13ee   :  { %8366 = vmatpush3.msra.mxu1 %v5710_v26 }
0x13ef   :  { %8367 = vmatprep.subr.mxu1 %v5705_v34 }
0x13f0   :  { %8368 = vmatpush3.msra.mxu1 %v5705_v34 }
0x13f1   :  { %8369 = vmatprep.subr.mxu1 %v5700_v33 }
0x13f2   :  { %8370 = vmatpush3.msra.mxu1 %v5700_v33 }
0x13f3   :  { %8371 = vmatprep.subr.mxu1 %v5695_v19 }
0x13f4   :  { %8372 = vmatpush3.msra.mxu1 %v5695_v19 }
0x13f5   :  { %8373 = vmatprep.subr.mxu1 %v5690_v58 }
0x13f6   :  { %8374 = vmatpush3.msra.mxu1 %v5690_v58 }
0x13f7   :  { %8375 = vmatprep.subr.mxu1 %v5685_v35 }
0x13f8   :  { %8376 = vmatpush3.msra.mxu1 %v5685_v35 }
0x13f9   :  { %8377 = vmatprep.subr.mxu1 %v5680_v20 }
0x13fa   :  { %8378 = vmatpush3.msra.mxu1 %v5680_v20 }
0x13fb   :  { %8380 = vmatmul.mubr.msk.f32.vlgmr.msra.gmra.mxu1 %vm5727_vm4, %v5720_v59  ;;  %5891 = vmatprep.subr.mxu1 %v8625_v61 }
0x13fc   :  { %5892 = vmatpush1.msra.mxu1 %v7761_v43  ;;  %8382 = vmatprep.mubr.msk.f32.mxu1 %vm5727_vm4, %v5721_v28 }
0x13fd   :  { %5893 = vmatprep.subr.mxu1 %v8625_v61 }
0x13fe   :  { %5894 = vmatpush1.msra.mxu1 %v7760_v24 }
0x13ff   :  { %8383 = vmatmul.mubr.msk.f32.gmra.mxu1 %vm5727_vm4, %v5722_v40  ;;  %5895 = vmatprep.subr.mxu1 %v8625_v61  ;;  %v7775_v40 = vld [vmem:[%s12159_s19 + $0x48] sm:$0xff] }
0x1400   :  { %5896 = vmatpush1.msra.mxu1 %v7759_v2  ;;  %8385 = vmatprep.mubr.msk.f32.mxu1 %vm5727_vm4, %v5723_v29  ;;  %v7806_v2 = vld [vmem:[%s12160_s20 + $0x1a8] sm:$0xff]  ;;  %v7776_v29 = vld [vmem:[%s12159_s19 + $0x50] sm:$0xff] }
0x1401   :  { %5897 = vmatprep.subr.mxu1 %v8625_v61 }
0x1402   :  { %5898 = vmatpush1.msra.mxu1 %v7758_v4  ;;  %v7805_v4 = vld [vmem:[%s12160_s20 + $0x1a0] sm:$0xff] }
0x1403   :  { %8386 = vmatmul.mubr.msk.f32.gmra.mxu1 %vm5727_vm4, %v5724_v38  ;;  %5899 = vmatprep.subr.mxu1 %v8625_v61  ;;  %v7777_v38 = vld [vmem:[%s12159_s19 + $0x58] sm:$0xff] }
0x1404   :  { %5900 = vmatpush1.msra.mxu1 %v7757_v46  ;;  %8388 = vmatprep.mubr.msk.f32.mxu1 %vm5727_vm4, %v5725_v9  ;;  %v7804_v46 = vld [vmem:[%s12160_s20 + $0x198] sm:$0xff]  ;;  %v7778_v9 = vld [vmem:[%s12159_s19 + $0x60] sm:$0xff] }
0x1405   :  { %5901 = vmatprep.subr.mxu1 %v8625_v61 }
0x1406   :  { %5902 = vmatpush1.msra.mxu1 %v7756_v14  ;;  %v7803_v14 = vld [vmem:[%s12160_s20 + $0x190] sm:$0xff] }
0x1407   :  { %8389 = vmatmul.mubr.msk.f32.gmra.mxu1 %vm5727_vm4, %v5726_v1  ;;  %5903 = vmatprep.subr.mxu1 %v8625_v61  ;;  %v7779_v1 = vld [vmem:[%s12159_s19 + $0x68] sm:$0xff] }
0x1408   :  { %5904 = vmatpush1.msra.mxu1 %v7755_v52  ;;  %7766 = vmatprep.mubr.msk.f32.mxu1 %vm5586_vm3, %v11549_v53  ;;  %v7802_v52 = vld [vmem:[%s12160_s20 + $0x188] sm:$0xff] }
0x1409   :  { %5905 = vmatprep.subr.mxu1 %v8625_v61 }
0x140a   :  { %5906 = vmatpush1.msra.mxu1 %v7754_v7  ;;  %v7780_v7 = vld [vmem:[%s12159_s19 + $0x70] sm:$0xff] }
0x140b   :  { %5907 = vmatprep.subr.mxu1 %v8625_v61 }
0x140c   :  { %5908 = vmatpush1.msra.mxu1 %v7753_v18  ;;  %v7801_v18 = vld [vmem:[%s12160_s20 + $0x180] sm:$0xff] }
0x140d   :  { %5909 = vmatprep.subr.mxu1 %v8625_v61 }
0x140e   :  { %5910 = vmatpush1.msra.mxu1 %v7752_v12  ;;  %v7781_v12 = vld [vmem:[%s12159_s19 + $0x78] sm:$0x3f] }
0x140f   :  { %5911 = vmatprep.subr.mxu1 %v8625_v61 }
0x1410   :  { %5912 = vmatpush1.msra.mxu1 %v7751_v10  ;;  %v7800_v10 = vld [vmem:[%s12160_s20 + $0x178] sm:$0xff] }
0x1411   :  { %5913 = vmatprep.subr.mxu1 %v8625_v61 }
0x1412   :  { %5914 = vmatpush1.msra.mxu1 %v7750_v16  ;;  %v7799_v16 = vld [vmem:[%s12160_s20 + $0x170] sm:$0xff] }
0x1413   :  { %5915 = vmatprep.subr.mxu1 %v8625_v61 }
0x1414   :  { %5916 = vmatpush1.msra.mxu1 %v7749_v63  ;;  %v7798_v63 = vld [vmem:[%s12160_s20 + $0x168] sm:$0xff] }
0x1415   :  { %5917 = vmatprep.subr.mxu1 %v8625_v61 }
0x1416   :  { %5918 = vmatpush1.msra.mxu1 %v7748_v17  ;;  %v7797_v17 = vld [vmem:[%s12160_s20 + $0x160] sm:$0xff] }
0x1417   :  { %5919 = vmatprep.subr.mxu1 %v8625_v61 }
0x1418   :  { %5920 = vmatpush1.msra.mxu1 %v7747_v37  ;;  %v7795_v37 = vld [vmem:[%s12160_s20 + $0x150] sm:$0xff] }
0x1419   :  { %5921 = vmatprep.subr.mxu1 %v8625_v61 }
0x141a   :  { %5922 = vmatpush1.msra.mxu1 %v7746_v55  ;;  %v7794_v55 = vld [vmem:[%s12160_s20 + $0x148] sm:$0xff] }
0x141b   :  { %5949 = vmatprep.subr.mxu1 %v8625_v61 }
0x141c   :  { %7765 = vmatpush2.msk.msra.mxu1 %vm244_vm2, %v7764_v21  ;;  %v7793_v21 = vld [vmem:[%s12160_s20 + $0x140] sm:$0xff] }
0x141d   :  { %5951 = vmatprep.subr.mxu1 %v8625_v61 }
0x141e   :  { %5952 = vmatpush2.msra.mxu1 %v7763_v36  ;;  %v7792_v36 = vld [vmem:[%s12160_s20 + $0x138] sm:$0xff] }
0x141f   :  { %5953 = vmatprep.subr.mxu1 %v8625_v61 }
0x1420   :  { %5954 = vmatpush2.msra.mxu1 %v7762_v48  ;;  %v7791_v48 = vld [vmem:[%s12160_s20 + $0x130] sm:$0xff] }
0x1421   :  { %5956 = vmatmul.mubr.f32.vlgmr.msra.gmra.mxu1 %v11552_v25 }
0x1422   :  { %7767 = vmatprep.mubr.msk.f32.mxu1 %vm5586_vm3, %v11558_v54 }
0x1425   :  { %5961 = vmatmul.mubr.f32.gmra.mxu1 %v11561_v13 }
0x1426   :  { %7768 = vmatprep.mubr.msk.f32.mxu1 %vm5586_vm3, %v11567_v39 }
0x1429   :  { %5966 = vmatmul.mubr.f32.gmra.mxu1 %v11570_v0 }
0x142a   :  { %7769 = vmatprep.mubr.msk.f32.mxu1 %vm5586_vm3, %v11576_v22 }
0x142d   :  { %5971 = vmatmul.mubr.f32.gmra.mxu1 %v11579_v42 }
0x142e   :  { %7770 = vmatprep.mubr.msk.f32.mxu1 %vm5586_vm3, %v11585_v51 }
0x1431   :  { %5976 = vmatmul.mubr.f32.gmra.mxu1 %v11588_v56 }
0x1432   :  { %7771 = vmatprep.mubr.msk.f32.mxu1 %vm5586_vm3, %v11594_v23 }
0x1435   :  { %5981 = vmatmul.mubr.f32.gmra.mxu1 %v11597_v30 }
0x1436   :  { %7772 = vmatprep.mubr.msk.f32.mxu1 %vm5586_vm3, %v11603_v5 }
0x1439   :  { %5986 = vmatmul.mubr.f32.gmra.mxu1 %v11606_v47 }
0x143a   :  { %7773 = vmatprep.mubr.msk.f32.mxu1 %vm5586_vm3, %v11612_v11 }
0x143d   :  { %5991 = vmatmul.mubr.f32.gmra.mxu1 %v11615_v31 }
0x14bb   :  { %v11759_v41 = vpop.f32.mrf.mxu1 }
0x14bd   :  { %v11761_v3 = vpop.f32.mrf.mxu1 }
0x14bf   :  { %v11763_v15 = vpop.f32.mrf.mxu1 }
0x14c1   :  { %v11765_v8 = vpop.f32.mrf.mxu1 }
0x14c3   :  { %v11767_v20 = vpop.f32.mrf.mxu1 }
0x14c5   :  { %v11769_v45 = vpop.f32.mrf.mxu1 }
0x14c7   :  { %v11771_v35 = vpop.f32.mrf.mxu1 }
0x14c9   :  { %v11773_v60 = vpop.f32.mrf.mxu1 }
0x14e1   :  { %v5957_v58 = vpop.f32.mrf.mxu1 }
0x14e3   :  { %v5959_v62 = vpop.f32.mrf.mxu1 }
0x14e4   :  { %v7807_v62 = vld [vmem:[%s12160_s20 + $0x1b0] sm:$0xff] }
0x14e5   :  { %v5962_v19 = vpop.f32.mrf.mxu1 }
0x14e7   :  { %v5964_v49 = vpop.f32.mrf.mxu1 }
0x14e9   :  { %v5967_v33 = vpop.f32.mrf.mxu1 }
0x14eb   :  { %v5969_v50 = vpop.f32.mrf.mxu1 }
0x14ed   :  { %v5972_v34 = vpop.f32.mrf.mxu1 }
0x14ef   :  { %v5974_v6 = vpop.f32.mrf.mxu1 }
0x14f1   :  { %v5977_v26 = vpop.f32.mrf.mxu1 }
0x14f3   :  { %v5979_v44 = vpop.f32.mrf.mxu1 }
0x14f5   :  { %v5982_v57 = vpop.f32.mrf.mxu1 }
0x14f7   :  { %v5984_v27 = vpop.f32.mrf.mxu1 }
0x14f9   :  { %v5987_v59 = vpop.f32.mrf.mxu1 }
0x14fb   :  { %v5989_v43 = vpop.f32.mrf.mxu1 }
0x14fd   :  { %v5992_v28 = vpop.f32.mrf.mxu1 }
0x14fe   :  { %8391 = vmatprep.subr.msk.mxu0 %vm122_vm0, %v5992_v28 }
0x14ff   :  { %v5994_v24 = vpop.f32.mrf.mxu1  ;;  %8392 = vmatpush3.msk.msra.mxu0 %vm122_vm0, %v5992_v28 }
0x1500   :  { %8393 = vmatprep.subr.mxu0 %v5987_v59 }
0x1501   :  { %8394 = vmatpush3.msra.mxu0 %v5987_v59 }
0x1502   :  { %8395 = vmatprep.subr.mxu0 %v5982_v57 }
0x1503   :  { %8396 = vmatpush3.msra.mxu0 %v5982_v57 }
0x1504   :  { %8397 = vmatprep.subr.mxu0 %v5977_v26 }
0x1505   :  { %8398 = vmatpush3.msra.mxu0 %v5977_v26 }
0x1506   :  { %8399 = vmatprep.subr.mxu0 %v5972_v34 }
0x1507   :  { %8400 = vmatpush3.msra.mxu0 %v5972_v34 }
0x1508   :  { %8401 = vmatprep.subr.mxu0 %v5967_v33 }
0x1509   :  { %8402 = vmatpush3.msra.mxu0 %v5967_v33 }
0x150a   :  { %8403 = vmatprep.subr.mxu0 %v5962_v19 }
0x150b   :  { %8404 = vmatpush3.msra.mxu0 %v5962_v19 }
0x150c   :  { %8405 = vmatprep.subr.mxu0 %v5957_v58 }
0x150d   :  { %8406 = vmatpush3.msra.mxu0 %v5957_v58  ;;  %v7808_v58 = vld [vmem:[%s12160_s20 + $0x1b8] sm:$0xff] }
0x150e   :  { %8408 = vmatmul.mubr.msk.f32.vlgmr.msra.gmra.mxu0 %vm5727_vm4, %v7775_v40  ;;  %6168 = vmatprep.subr.mxu0 %v8625_v61 }
0x150f   :  { %6169 = vmatpush1.msra.mxu0 %v7806_v2  ;;  %8410 = vmatprep.mubr.msk.f32.mxu0 %vm5727_vm4, %v7776_v29 }
0x1510   :  { %6170 = vmatprep.subr.mxu0 %v8625_v61 }
0x1511   :  { %6171 = vmatpush1.msra.mxu0 %v7805_v4 }
0x1512   :  { %8411 = vmatmul.mubr.msk.f32.gmra.mxu0 %vm5727_vm4, %v7777_v38  ;;  %6172 = vmatprep.subr.mxu0 %v8625_v61 }
0x1513   :  { %6173 = vmatpush1.msra.mxu0 %v7804_v46  ;;  %8413 = vmatprep.mubr.msk.f32.mxu0 %vm5727_vm4, %v7778_v9 }
0x1514   :  { %6174 = vmatprep.subr.mxu0 %v8625_v61 }
0x1515   :  { %6175 = vmatpush1.msra.mxu0 %v7803_v14 }
0x1516   :  { %8414 = vmatmul.mubr.msk.f32.gmra.mxu0 %vm5727_vm4, %v7779_v1  ;;  %6176 = vmatprep.subr.mxu0 %v8625_v61 }
0x1517   :  { %6177 = vmatpush1.msra.mxu0 %v7802_v52  ;;  %8416 = vmatprep.mubr.msk.f32.mxu0 %vm5727_vm4, %v7780_v7 }
0x1518   :  { %6178 = vmatprep.subr.mxu0 %v8625_v61 }
0x1519   :  { %6179 = vmatpush1.msra.mxu0 %v7801_v18  ;;  %v7820_v18 = vld [vmem:[%s12159_s19 + $0x88] sm:$0xff] }
0x151a   :  { %8417 = vmatmul.mubr.msk.f32.gmra.mxu0 %vm5727_vm4, %v7781_v12  ;;  %6180 = vmatprep.subr.mxu0 %v8625_v61  ;;  %v7821_v12 = vld [vmem:[%s12159_s19 + $0x90] sm:$0xff] }
0x151b   :  { %6181 = vmatpush1.msra.mxu0 %v7800_v10  ;;  %7811 = vmatprep.mubr.msk.f32.mxu0 %vm5586_vm3, %v11549_v53  ;;  %v7796_v53 = vld [vmem:[%s12160_s20 + $0x158] sm:$0xff] }
0x151c   :  { %6182 = vmatprep.subr.mxu0 %v8625_v61  ;;  %v7822_v10 = vld [vmem:[%s12159_s19 + $0x98] sm:$0xff] }
0x151d   :  { %6183 = vmatpush1.msra.mxu0 %v7799_v16  ;;  %v7823_v16 = vld [vmem:[%s12159_s19 + $0xa0] sm:$0xff] }
0x151e   :  { %6184 = vmatprep.subr.mxu0 %v8625_v61 }
0x151f   :  { %6185 = vmatpush1.msra.mxu0 %v7798_v63  ;;  %v7824_v63 = vld [vmem:[%s12159_s19 + $0xa8] sm:$0xff] }
0x1520   :  { %6186 = vmatprep.subr.mxu0 %v8625_v61 }
0x1521   :  { %6187 = vmatpush1.msra.mxu0 %v7797_v17  ;;  %v7825_v17 = vld [vmem:[%s12159_s19 + $0xb0] sm:$0xff] }
0x1522   :  { %6188 = vmatprep.subr.mxu0 %v8625_v61 }
0x1523   :  { %6189 = vmatpush1.msra.mxu0 %v7796_v53  ;;  %v7826_v53 = vld [vmem:[%s12159_s19 + $0xb8] sm:$0x3f] }
0x1524   :  { %6190 = vmatprep.subr.mxu0 %v8625_v61 }
0x1525   :  { %6191 = vmatpush1.msra.mxu0 %v7795_v37  ;;  %v6430_v37 = vld [vmem:[%s12162_s22] sm:$0xff] }
0x1526   :  { %6192 = vmatprep.subr.mxu0 %v8625_v61 }
0x1527   :  { %6193 = vmatpush1.msra.mxu0 %v7794_v55  ;;  %v7854_v55 = vld [vmem:[%s12162_s22 + $0x40] sm:$0xff] }
0x1528   :  { %6194 = vmatprep.subr.mxu0 %v8625_v61 }
0x1529   :  { %6195 = vmatpush1.msra.mxu0 %v7793_v21 }
0x152a   :  { %6196 = vmatprep.subr.mxu0 %v8625_v61 }
0x152b   :  { %6197 = vmatpush1.msra.mxu0 %v7792_v36 }
0x152c   :  { %6198 = vmatprep.subr.mxu0 %v8625_v61 }
0x152d   :  { %6199 = vmatpush1.msra.mxu0 %v7791_v48 }
0x152e   :  { %6226 = vmatprep.subr.mxu0 %v8625_v61 }
0x152f   :  { %7810 = vmatpush2.msk.msra.mxu0 %vm244_vm2, %v7809_v32  ;;  %vm6600_vm2 = vcmask 1046528  }
0x1530   :  { %6228 = vmatprep.subr.mxu0 %v8625_v61 }
0x1531   :  { %6229 = vmatpush2.msra.mxu0 %v7808_v58 }
0x1532   :  { %6230 = vmatprep.subr.mxu0 %v8625_v61  ;;  %v7819_v61 = vld [vmem:[%s12159_s19 + $0x80] sm:$0xff] }
0x1533   :  { %6231 = vmatpush2.msra.mxu0 %v7807_v62  ;;  %8435 = vmatprep.mubr.msk.f32.mxu1 %vm5727_vm4, %v7819_v61 }
0x1534   :  { %6233 = vmatmul.mubr.f32.vlgmr.msra.gmra.mxu0 %v11552_v25  ;;  %v5560_v25 = vld [vmem:[%s12161_s21 + $0x8] sm:$0xff] }
0x1535   :  { %7812 = vmatprep.mubr.msk.f32.mxu0 %vm5586_vm3, %v11558_v54  ;;  %v5559_v54 = vld [vmem:[%s12161_s21] sm:$0xff] }
0x1538   :  { %6238 = vmatmul.mubr.f32.gmra.mxu0 %v11561_v13  ;;  %v5861_v13 = vadd.f32 %v11759_v41, %v5560_v25  ;;  %v5563_v41 = vld [vmem:[%s12161_s21 + $0x20] sm:$0xff] }
0x1539   :  { %7813 = vmatprep.mubr.msk.f32.mxu0 %vm5586_vm3, %v11567_v39  ;;  %v5562_v39 = vld [vmem:[%s12161_s21 + $0x18] sm:$0xff]  ;;  %v5864_v50 = vadd.f32 %v11769_v45, %v5563_v41 }
0x153a   :  { %v7857_v41 = vld [vmem:[%s12162_s22 + $0x58] sm:$0xff] }
0x153c   :  { %6243 = vmatmul.mubr.f32.gmra.mxu0 %v11570_v0 }
0x153d   :  { %7814 = vmatprep.mubr.msk.f32.mxu0 %vm5586_vm3, %v11576_v22  ;;  %v5860_v22 = vadd.f32 %v11761_v3, %v5559_v54 }
0x1540   :  { %6248 = vmatmul.mubr.f32.gmra.mxu0 %v11579_v42 }
0x1541   :  { %7815 = vmatprep.mubr.msk.f32.mxu0 %vm5586_vm3, %v11585_v51  ;;  %v5561_v51 = vld [vmem:[%s12161_s21 + $0x10] sm:$0xff] }
0x1544   :  { %6253 = vmatmul.mubr.f32.gmra.mxu0 %v11588_v56 }
0x1545   :  { %7816 = vmatprep.mubr.msk.f32.mxu0 %vm5586_vm3, %v11594_v23  ;;  %v5863_v23 = vadd.f32 %v11763_v15, %v5562_v39  ;;  %v5566_v15 = vld [vmem:[%s12161_s21 + $0x38] sm:$0x3f] }
0x1546   :  { %v5867_v26 = vadd.f32 %v11771_v35, %v5566_v15  ;;  %v6435_v15 = vld [vmem:[%s12162_s22 + $0x28] sm:$0xff] }
0x1548   :  { %6258 = vmatmul.mubr.f32.gmra.mxu0 %v11597_v30 }
0x1549   :  { %7817 = vmatprep.mubr.msk.f32.mxu0 %vm5586_vm3, %v11603_v5  ;;  %v5564_v5 = vld [vmem:[%s12161_s21 + $0x28] sm:$0xff] }
0x154a   :  { %v5865_v19 = vadd.f32 %v11767_v20, %v5564_v5  ;;  %v6431_v5 = vld [vmem:[%s12162_s22 + $0x8] sm:$0xff] }
0x154c   :  { %6263 = vmatmul.mubr.f32.gmra.mxu0 %v11606_v47 }
0x154d   :  { %7818 = vmatprep.mubr.msk.f32.mxu0 %vm5586_vm3, %v11612_v11  ;;  %v5862_v11 = vadd.f32 %v11765_v8, %v5561_v51  ;;  %v5565_v8 = vld [vmem:[%s12161_s21 + $0x30] sm:$0xff] }
0x154e   :  { %v5866_v57 = vadd.f32 %v11773_v60, %v5565_v8  ;;  %v6437_v8 = vld [vmem:[%s12162_s22 + $0x38] sm:$0xff] }
0x1550   :  { %6268 = vmatmul.mubr.f32.gmra.mxu0 %v11615_v31 }
0x15ce   :  { %v8409_v0 = vpop.f32.mrf.mxu0 }
0x15cf   :  { %v11921_v42 = vadd.f32 %v8409_v0, %v5861_v13 }
0x15d0   :  { %v6098_v56 = vpop.f32.mrf.mxu0 }
0x15d1   :  { %v11927_v30 = vadd.f32 %v6098_v56, %v5860_v22 }
0x15d2   :  { %v8412_v47 = vpop.f32.mrf.mxu0 }
0x15d3   :  { %v11933_v31 = vadd.f32 %v8412_v47, %v5863_v23  ;;  %v7855_v47 = vld [vmem:[%s12162_s22 + $0x48] sm:$0xff] }
0x15d4   :  { %v6108_v3 = vpop.f32.mrf.mxu0 }
0x15d5   :  { %v11939_v49 = vadd.f32 %v6108_v3, %v5862_v11  ;;  %v6574_v11 = vld [vmem:[%s12163_s23 + $0x18] sm:$0x7f]  ;;  %v6434_v3 = vld [vmem:[%s12162_s22 + $0x20] sm:$0xff] }
0x15d6   :  { %v8415_v33 = vpop.f32.mrf.mxu0 }
0x15d7   :  { %v11945_v34 = vadd.f32 %v8415_v33, %v5865_v19  ;;  %v7858_v19 = vld [vmem:[%s12162_s22 + $0x60] sm:$0xff]  ;;  %v7859_v33 = vld [vmem:[%s12162_s22 + $0x68] sm:$0xff] }
0x15d8   :  { %v6118_v6 = vpop.f32.mrf.mxu0 }
0x15d9   :  { %v11951_v44 = vadd.f32 %v6118_v6, %v5864_v50  ;;  %v6436_v50 = vld [vmem:[%s12162_s22 + $0x30] sm:$0xff]  ;;  %v7861_v6 = vld [vmem:[%s12162_s22 + $0x78] sm:$0xff] }
0x15da   :  { %v8418_v20 = vpop.f32.mrf.mxu0 }
0x15db   :  { %v6144_v27 = vadd.f32 %v8418_v20, %v5867_v26  ;;  %v6572_v26 = vld [vmem:[%s12163_s23 + $0x8] sm:$0xff]  ;;  %v7874_v20 = vld [vmem:[%s12163_s23 + $0x38] sm:$0x7f] }
0x15dc   :  { %v6128_v59 = vpop.f32.mrf.mxu0 }
0x15dd   :  { %v6143_v43 = vadd.f32 %v6128_v59, %v5866_v57 }
0x15f4   :  { %v6234_v28 = vpop.f32.mrf.mxu0 }
0x15f6   :  { %v6236_v24 = vpop.f32.mrf.mxu0 }
0x15f8   :  { %v6239_v45 = vpop.f32.mrf.mxu0 }
0x15fa   :  { %v6241_v40 = vpop.f32.mrf.mxu0 }
0x15fc   :  { %v6244_v2 = vpop.f32.mrf.mxu0 }
0x15fe   :  { %v6246_v29 = vpop.f32.mrf.mxu0 }
0x15ff   :  { %v7871_v29 = vld [vmem:[%s12163_s23 + $0x20] sm:$0xff] }
0x1600   :  { %v6249_v4 = vpop.f32.mrf.mxu0 }
0x1602   :  { %v6251_v38 = vpop.f32.mrf.mxu0 }
0x1604   :  { %v6254_v46 = vpop.f32.mrf.mxu0 }
0x1606   :  { %v6256_v9 = vpop.f32.mrf.mxu0 }
0x1608   :  { %v6259_v14 = vpop.f32.mrf.mxu0 }
0x160a   :  { %v6261_v35 = vpop.f32.mrf.mxu0 }
0x160c   :  { %v6264_v1 = vpop.f32.mrf.mxu0 }
0x160e   :  { %v6266_v52 = vpop.f32.mrf.mxu0 }
0x1610   :  { %v6269_v7 = vpop.f32.mrf.mxu0 }
0x1611   :  { %8419 = vmatprep.subr.msk.mxu1 %vm122_vm0, %v6269_v7 }
0x1612   :  { %v6271_v60 = vpop.f32.mrf.mxu0  ;;  %8420 = vmatpush3.msk.msra.mxu1 %vm122_vm0, %v6269_v7  ;;  %vm6438_vm0 = vcmask 506880  }
0x1613   :  { %8421 = vmatprep.subr.mxu1 %v6264_v1  ;;  %8511 = vmatprep.mubr.msk.f32.mxu0 %vm6438_vm0, %v7854_v55 }
0x1614   :  { %8422 = vmatpush3.msra.mxu1 %v6264_v1 }
0x1615   :  { %8423 = vmatprep.subr.mxu1 %v6259_v14 }
0x1616   :  { %8424 = vmatpush3.msra.mxu1 %v6259_v14 }
0x1617   :  { %8425 = vmatprep.subr.mxu1 %v6254_v46 }
0x1618   :  { %8426 = vmatpush3.msra.mxu1 %v6254_v46 }
0x1619   :  { %8427 = vmatprep.subr.mxu1 %v6249_v4 }
0x161a   :  { %8428 = vmatpush3.msra.mxu1 %v6249_v4 }
0x161b   :  { %8429 = vmatprep.subr.mxu1 %v6244_v2 }
0x161c   :  { %8430 = vmatpush3.msra.mxu1 %v6244_v2 }
0x161d   :  { %8431 = vmatprep.subr.mxu1 %v6239_v45 }
0x161e   :  { %8432 = vmatpush3.msra.mxu1 %v6239_v45  ;;  %v7872_v45 = vld [vmem:[%s12163_s23 + $0x28] sm:$0xff] }
0x161f   :  { %8433 = vmatprep.subr.mxu1 %v6234_v28 }
0x1620   :  { %8434 = vmatpush3.msra.mxu1 %v6234_v28  ;;  %v7873_v28 = vld [vmem:[%s12163_s23 + $0x30] sm:$0xff] }
0x1621   :  { %8436 = vmatmul.mubr.msk.f32.vlgmr.msra.gmra.mxu1 %vm5727_vm4, %v7820_v18 }
0x1622   :  { %8438 = vmatprep.mubr.msk.f32.mxu1 %vm5727_vm4, %v7821_v12 }
0x1625   :  { %8439 = vmatmul.mubr.msk.f32.gmra.mxu1 %vm5727_vm4, %v7822_v10 }
0x1626   :  { %8441 = vmatprep.mubr.msk.f32.mxu1 %vm5727_vm4, %v7823_v16 }
0x1629   :  { %8442 = vmatmul.mubr.msk.f32.gmra.mxu1 %vm5727_vm4, %v7824_v63 }
0x162a   :  { %8444 = vmatprep.mubr.msk.f32.mxu1 %vm5727_vm4, %v7825_v17 }
0x162d   :  { %8445 = vmatmul.mubr.msk.f32.gmra.mxu1 %vm5727_vm4, %v7826_v53 }
0x162e   :  { %8463 = vmatprep.mubr.msk.f32.mxu1 %vm6438_vm0, %v6430_v37 }
0x16e1   :  { %v8437_v21 = vpop.f32.mrf.mxu1 }
0x16e2   :  { %v6415_v56 = vadd.f32 %v8437_v21, %v11921_v42  ;;  %v6432_v42 = vld [vmem:[%s12162_s22 + $0x10] sm:$0xff] }
0x16e3   :  { %v6375_v36 = vpop.f32.mrf.mxu1 }
0x16e4   :  { %v6414_v23 = vadd.f32 %v6375_v36, %v11927_v30  ;;  %v7856_v30 = vld [vmem:[%s12162_s22 + $0x50] sm:$0xff] }
0x16e5   :  { %v8440_v48 = vpop.f32.mrf.mxu1 }
0x16e6   :  { %v6417_v22 = vadd.f32 %v8440_v48, %v11933_v31  ;;  %v6433_v31 = vld [vmem:[%s12162_s22 + $0x18] sm:$0xff] }
0x16e7   :  { %v6385_v32 = vpop.f32.mrf.mxu1 }
0x16e8   :  { %v6416_v51 = vadd.f32 %v6385_v32, %v11939_v49  ;;  %v6573_v49 = vld [vmem:[%s12163_s23 + $0x10] sm:$0xff] }
0x16e9   :  { %v8443_v58 = vpop.f32.mrf.mxu1 }
0x16ea   :  { %v6419_v39 = vadd.f32 %v8443_v58, %v11945_v34  ;;  %v7860_v34 = vld [vmem:[%s12162_s22 + $0x70] sm:$0xff] }
0x16eb   :  { %v6395_v62 = vpop.f32.mrf.mxu1 }
0x16ec   :  { %v6418_v0 = vadd.f32 %v6395_v62, %v11951_v44  ;;  %v6571_v44 = vld [vmem:[%s12163_s23] sm:$0xff]  ;;  %s8627_s23 = smov [#allocation4]  }
0x16ed   :  { %v8446_v61 = vpop.f32.mrf.mxu1  ;;  %s7074_s16 = sshll.u32 %s8627_s23, 4  ;;  %s7075_s16 = int_to_ptr.vmem [resolvable:$true] %s7074_s16 }
0x16ee   :  { %v6421_v25 = vadd.f32 %v8446_v61, %v6144_v27  ;;  %s8581_s3 = scalar_lea.vmem %s7075_s16, 32  ;;  %p8586_p1 = scmp.lt.s32.totalorder %s7075_s16, %s7075_s16 }
0x16ef   :  { %v6405_v54 = vpop.f32.mrf.mxu1  ;;  %p8582_p0 = scmp.ne.s32.totalorder %s7075_s16, %s8581_s3  ;;  %p8587_p2 = scmp.lt.s32.totalorder %s8581_s3, %s8581_s3 }
0x16f0   :  { %v6420_v13 = vadd.f32 %v6405_v54, %v6143_v43  ;;  %8447 = vmatprep.subr.msk.mxu1 %vm868_vm6, %v6421_v25  ;;  %8495 = vmatprep.subr.msk.mxu0 %vm868_vm6, %v6421_v25 }
0x16f1   :  { %8448 = vmatpush3.msk.msra.mxu1 %vm868_vm6, %v6421_v25  ;;  %8496 = vmatpush3.msk.msra.mxu0 %vm868_vm6, %v6421_v25  ;;  %p8588_p3 = por %p8587_p2, %p8586_p1 }
0x16f2   :  { %8449 = vmatprep.subr.mxu1 %v6420_v13  ;;  %8497 = vmatprep.subr.mxu0 %v6420_v13 }
0x16f3   :  { %8450 = vmatpush3.msra.mxu1 %v6420_v13  ;;  %8498 = vmatpush3.msra.mxu0 %v6420_v13  ;;  %p8589_p4 = pnand %p8588_p3, %p8582_p0 }
0x16f4   :  { %8451 = vmatprep.subr.mxu1 %v6419_v39  ;;  %8499 = vmatprep.subr.mxu0 %v6419_v39 }
0x16f5   :  { %8452 = vmatpush3.msra.mxu1 %v6419_v39  ;;  %8500 = vmatpush3.msra.mxu0 %v6419_v39 }
0x16f6   :  { %8453 = vmatprep.subr.mxu1 %v6418_v0  ;;  %8501 = vmatprep.subr.mxu0 %v6418_v0 }
0x16f7   :  { %8454 = vmatpush3.msra.mxu1 %v6418_v0  ;;  %8502 = vmatpush3.msra.mxu0 %v6418_v0 }
0x16f8   :  { %8455 = vmatprep.subr.mxu1 %v6417_v22  ;;  %8503 = vmatprep.subr.mxu0 %v6417_v22 }
0x16f9   :  { %8456 = vmatpush3.msra.mxu1 %v6417_v22  ;;  %8504 = vmatpush3.msra.mxu0 %v6417_v22 }
0x16fa   :  { %8457 = vmatprep.subr.mxu1 %v6416_v51  ;;  %8505 = vmatprep.subr.mxu0 %v6416_v51 }
0x16fb   :  { %8458 = vmatpush3.msra.mxu1 %v6416_v51  ;;  %8506 = vmatpush3.msra.mxu0 %v6416_v51 }
0x16fc   :  { %8459 = vmatprep.subr.mxu1 %v6415_v56  ;;  %8507 = vmatprep.subr.mxu0 %v6415_v56 }
0x16fd   :  { %8460 = vmatpush3.msra.mxu1 %v6415_v56  ;;  %8508 = vmatpush3.msra.mxu0 %v6415_v56 }
0x16fe   :  { %8461 = vmatprep.subr.mxu1 %v6414_v23  ;;  %8509 = vmatprep.subr.mxu0 %v6414_v23 }
0x16ff   :  { %8462 = vmatpush3.msra.mxu1 %v6414_v23  ;;  %8510 = vmatpush3.msra.mxu0 %v6414_v23 }
0x1700   :  { %8464 = vmatmul.mubr.msk.f32.vlgmr.msra.gmra.mxu1 %vm6438_vm0, %v6431_v5  ;;  %8512 = vmatmul.mubr.msk.f32.vlgmr.msra.gmra.mxu0 %vm6438_vm0, %v7855_v47 }
0x1701   :  { %8466 = vmatprep.mubr.msk.f32.mxu1 %vm6438_vm0, %v6432_v42  ;;  %8514 = vmatprep.mubr.msk.f32.mxu0 %vm6438_vm0, %v7856_v30 }
0x1702   :  { %8475 = vmatprep.subr.msk.mxu1 %vm6600_vm2, %v6574_v11 }
0x1703   :  { %8476 = vmatpush3.msk.msra.mxu1 %vm6600_vm2, %v6574_v11 }
0x1704   :  { %8467 = vmatmul.mubr.msk.f32.gmra.mxu1 %vm6438_vm0, %v6433_v31  ;;  %8515 = vmatmul.mubr.msk.f32.gmra.mxu0 %vm6438_vm0, %v7857_v41 }
0x1705   :  { %8469 = vmatprep.mubr.msk.f32.mxu1 %vm6438_vm0, %v6434_v3  ;;  %8517 = vmatprep.mubr.msk.f32.mxu0 %vm6438_vm0, %v7858_v19 }
0x1706   :  { %8477 = vmatprep.subr.mxu1 %v6573_v49 }
0x1707   :  { %8478 = vmatpush3.msra.mxu1 %v6573_v49 }
0x1708   :  { %8470 = vmatmul.mubr.msk.f32.gmra.mxu1 %vm6438_vm0, %v6435_v15  ;;  %8518 = vmatmul.mubr.msk.f32.gmra.mxu0 %vm6438_vm0, %v7859_v33 }
0x1709   :  { %8472 = vmatprep.mubr.msk.f32.mxu1 %vm6438_vm0, %v6436_v50  ;;  %8520 = vmatprep.mubr.msk.f32.mxu0 %vm6438_vm0, %v7860_v34 }
0x170a   :  { %8479 = vmatprep.subr.mxu1 %v6572_v26 }
0x170b   :  { %8480 = vmatpush3.msra.mxu1 %v6572_v26 }
0x170c   :  { %8473 = vmatmul.mubr.msk.f32.gmra.mxu1 %vm6438_vm0, %v6437_v8  ;;  %8521 = vmatmul.mubr.msk.f32.gmra.mxu0 %vm6438_vm0, %v7861_v6 }
0x170d   :  { %8481 = vmatprep.subr.mxu1 %v6571_v44 }
0x170e   :  { %8482 = vmatpush3.msra.mxu1 %v6571_v44 }
0x170f   :  { %8523 = vmatprep.subr.msk.mxu1 %vm6600_vm2, %v7874_v20 }
0x17c0   :  { %v8465_v57 = vpop.f32.mrf.mxu1  ;;  %v8513_v27 = vpop.f32.mrf.mxu0 }
0x17c2   :  { %v6532_v59 = vpop.f32.mrf.mxu1  ;;  %v6816_v43 = vpop.f32.mrf.mxu0 }
0x17c3   :  { %8483 = vmatprep.mubr.msk.f32.mxu1 %vm6575_vm5, %v6532_v59 }
0x17c4   :  { %v8468_v24 = vpop.f32.mrf.mxu1  ;;  %8484 = vmatmul.mubr.msk.f32.vlgmr.msra.gmra.mxu1 %vm6575_vm5, %v8465_v57  ;;  %v8516_v2 = vpop.f32.mrf.mxu0 }
0x17c5   :  { %8524 = vmatpush3.msk.msra.mxu1 %vm6600_vm2, %v7874_v20 }
0x17c6   :  { %v6542_v40 = vpop.f32.mrf.mxu1  ;;  %8525 = vmatprep.subr.mxu1 %v7873_v28  ;;  %v6826_v46 = vpop.f32.mrf.mxu0 }
0x17c7   :  { %8486 = vmatprep.mubr.msk.f32.mxu1 %vm6575_vm5, %v6542_v40  ;;  %8526 = vmatpush3.msra.mxu1 %v7873_v28 }
0x17c8   :  { %v8471_v4 = vpop.f32.mrf.mxu1  ;;  %8487 = vmatmul.mubr.msk.f32.gmra.mxu1 %vm6575_vm5, %v8468_v24  ;;  %8527 = vmatprep.subr.mxu1 %v7872_v45  ;;  %v8519_v35 = vpop.f32.mrf.mxu0 }
0x17c9   :  { %8528 = vmatpush3.msra.mxu1 %v7872_v45 }
0x17ca   :  { %v6552_v38 = vpop.f32.mrf.mxu1  ;;  %8529 = vmatprep.subr.mxu1 %v7871_v29  ;;  %v6836_v1 = vpop.f32.mrf.mxu0 }
0x17cb   :  { %8489 = vmatprep.mubr.msk.f32.mxu1 %vm6575_vm5, %v6552_v38  ;;  %8530 = vmatpush3.msra.mxu1 %v7871_v29 }
0x17cc   :  { %v8474_v9 = vpop.f32.mrf.mxu1  ;;  %8490 = vmatmul.mubr.msk.f32.gmra.mxu1 %vm6575_vm5, %v8471_v4  ;;  %v8522_v52 = vpop.f32.mrf.mxu0 }
0x17ce   :  { %v6562_v14 = vpop.f32.mrf.mxu1  ;;  %v6846_v7 = vpop.f32.mrf.mxu0 }
0x17cf   :  { %8492 = vmatprep.mubr.msk.f32.mxu1 %vm6575_vm5, %v6562_v14 }
0x17d0   :  { %8493 = vmatmul.mubr.msk.f32.gmra.mxu1 %vm6575_vm5, %v8474_v9 }
0x17d1   :  { %8531 = vmatprep.mubr.msk.f32.mxu1 %vm6575_vm5, %v6816_v43 }
0x17d4   :  { %8532 = vmatmul.mubr.msk.f32.vlgmr.msra.gmra.mxu1 %vm6575_vm5, %v8513_v27 }
0x17d5   :  { %8534 = vmatprep.mubr.msk.f32.mxu1 %vm6575_vm5, %v6826_v46 }
0x17d8   :  { %8535 = vmatmul.mubr.msk.f32.gmra.mxu1 %vm6575_vm5, %v8516_v2 }
0x17d9   :  { %8537 = vmatprep.mubr.msk.f32.mxu1 %vm6575_vm5, %v6836_v1 }
0x17dc   :  { %8538 = vmatmul.mubr.msk.f32.gmra.mxu1 %vm6575_vm5, %v8519_v35 }
0x17dd   :  { %8540 = vmatprep.mubr.msk.f32.mxu1 %vm6575_vm5, %v6846_v7 }
0x17e0   :  { %8541 = vmatmul.mubr.msk.f32.gmra.mxu1 %vm6575_vm5, %v8522_v52 }
0x17e1   :  { %8592 = shalt.err (!%p8589_p4)
}
0x17e2   :  { %7077 = dma.vmem_to_hbm [thread:$0]  %s7075_s16, 32, %s12166_s26, [#allocation5]   ;;  %v6423_v17 = vld [vmem:[%s12164_s24 + $0x8] sm:$0xff]  ;;  %v6422_v37 = vld [vmem:[%s12164_s24] sm:$0xff]  ;;  %v6425_v36 = vld [vmem:[%s12164_s24 + $0x18] sm:$0xff] }
0x17e3   :  { %v6424_v62 = vld [vmem:[%s12164_s24 + $0x10] sm:$0xff]  ;;  %v6427_v39 = vld [vmem:[%s12164_s24 + $0x28] sm:$0xff]  ;;  %v6426_v23 = vld [vmem:[%s12164_s24 + $0x20] sm:$0xff] }
0x17e4   :  { %v6429_v11 = vld [vmem:[%s12164_s24 + $0x38] sm:$0xff]  ;;  %v6428_v49 = vld [vmem:[%s12164_s24 + $0x30] sm:$0xff]  ;;  %s8628_s24 = smov [#allocation2]  }
0x17e5   :  { %s7061_s5 = sshll.u32 %s8628_s24, 4  ;;  %s7062_s5 = int_to_ptr.vmem [resolvable:$true] %s7061_s5 }
0x17e6   :  { %s8601_s27 = scalar_lea.vmem %s7062_s5, 1024  ;;  %p8606_p6 = scmp.lt.s32.totalorder %s7062_s5, %s7062_s5 }
0x17e7   :  { %p8602_p5 = scmp.ne.s32.totalorder %s7062_s5, %s8601_s27  ;;  %p8607_p7 = scmp.lt.s32.totalorder %s8601_s27, %s8601_s27 }
0x17e9   :  { %p8608_p8 = por %p8607_p7, %p8606_p6 }
0x17eb   :  { %p8609_p9 = pnand %p8608_p8, %p8602_p5 }
0x1884   :  { %v8485_v60 = vpop.f32.mrf.mxu1 }
0x1885   :  { %v6710_v21 = vadd.f32 %v8485_v60, %v6423_v17 }
0x1886   :  { %v6670_v18 = vpop.f32.mrf.mxu1 }
0x1887   :  { %v6709_v32 = vadd.f32 %v6670_v18, %v6422_v37 }
0x1888   :  { %v8488_v12 = vpop.f32.mrf.mxu1 }
0x1889   :  { %v6712_v25 = vadd.f32 %v8488_v12, %v6425_v36 }
0x188a   :  { %v6680_v10 = vpop.f32.mrf.mxu1 }
0x188b   :  { %v6711_v22 = vadd.f32 %v6680_v10, %v6424_v62 }
0x188c   :  { %v8491_v16 = vpop.f32.mrf.mxu1 }
0x188d   :  { %v6714_v47 = vadd.f32 %v8491_v16, %v6427_v39 }
0x188e   :  { %v6690_v63 = vpop.f32.mrf.mxu1 }
0x188f   :  { %v6713_v41 = vadd.f32 %v6690_v63, %v6426_v23 }
0x1890   :  { %v8494_v53 = vpop.f32.mrf.mxu1 }
0x1891   :  { %v6716_v33 = vadd.f32 %v8494_v53, %v6429_v11 }
0x1892   :  { %v6700_v55 = vpop.f32.mrf.mxu1 }
0x1893   :  { %v6715_v6 = vadd.f32 %v6700_v55, %v6428_v49 }
0x1894   :  { %v8533_v48 = vpop.f32.mrf.mxu1 }
0x1895   :  { %v6993_v58 = vadd.f32 %v8533_v48, %v6710_v21 }
0x1896   :  { %v6953_v61 = vpop.f32.mrf.mxu1 }
0x1897   :  { %v7885_v54 = vmul.f32 -1.442695, %v6993_v58  ;;  %v6992_v13 = vadd.f32 %v6953_v61, %v6709_v32 }
0x1898   :  { %v8536_v0 = vpop.f32.mrf.mxu1 }
0x1899   :  { %8549 = vpow2.f32 %v7885_v54  ;;  %v7884_v51 = vmul.f32 -1.442695, %v6992_v13  ;;  %v6995_v56 = vadd.f32 %v8536_v0, %v6712_v25 }
0x189a   :  { %v6963_v5 = vpop.f32.mrf.mxu1 }
0x189b   :  { %8551 = vpow2.f32 %v7884_v51  ;;  %v7887_v42 = vmul.f32 -1.442695, %v6995_v56  ;;  %v6994_v30 = vadd.f32 %v6963_v5, %v6711_v22 }
0x189c   :  { %v8539_v31 = vpop.f32.mrf.mxu1 }
0x189d   :  { %8553 = vpow2.f32 %v7887_v42  ;;  %v7886_v3 = vmul.f32 -1.442695, %v6994_v30  ;;  %v6997_v19 = vadd.f32 %v8539_v31, %v6714_v47 }
0x189e   :  { %v6973_v15 = vpop.f32.mrf.mxu1 }
0x189f   :  { %8555 = vpow2.f32 %v7886_v3  ;;  %v7889_v50 = vmul.f32 -1.442695, %v6997_v19  ;;  %v6996_v34 = vadd.f32 %v6973_v15, %v6713_v41 }
0x18a0   :  { %v8542_v8 = vpop.f32.mrf.mxu1 }
0x18a1   :  { %8557 = vpow2.f32 %v7889_v50  ;;  %v7888_v26 = vmul.f32 -1.442695, %v6996_v34  ;;  %v6999_v44 = vadd.f32 %v8542_v8, %v6716_v33 }
0x18a2   :  { %v6983_v20 = vpop.f32.mrf.mxu1 }
0x18a3   :  { %8559 = vpow2.f32 %v7888_v26  ;;  %v7891_v57 = vmul.f32 -1.442695, %v6999_v44  ;;  %v6998_v27 = vadd.f32 %v6983_v20, %v6715_v6 }
0x18a5   :  { %8561 = vpow2.f32 %v7891_v57  ;;  %v7890_v59 = vmul.f32 -1.442695, %v6998_v27 }
0x18a6   :  { %v8550_v43 = vpop.eup %8549 }
0x18a7   :  { %v7025_v28 = vadd.f32 1.0, %v8550_v43  ;;  %8563 = vpow2.f32 %v7890_v59 }
0x18a8   :  { %v8552_v24 = vpop.eup %8551 }
0x18a9   :  { %8565 = vrcp.f32 %v7025_v28  ;;  %v7024_v45 = vadd.f32 1.0, %v8552_v24 }
0x18aa   :  { %v8554_v40 = vpop.eup %8553 }
0x18ab   :  { %8567 = vrcp.f32 %v7024_v45  ;;  %v7027_v2 = vadd.f32 1.0, %v8554_v40 }
0x18ac   :  { %v8556_v29 = vpop.eup %8555 }
0x18ad   :  { %8569 = vrcp.f32 %v7027_v2  ;;  %v7026_v4 = vadd.f32 1.0, %v8556_v29 }
0x18ae   :  { %v8558_v38 = vpop.eup %8557 }
0x18af   :  { %8571 = vrcp.f32 %v7026_v4  ;;  %v7029_v46 = vadd.f32 1.0, %v8558_v38 }
0x18b0   :  { %v8560_v9 = vpop.eup %8559 }
0x18b1   :  { %8573 = vrcp.f32 %v7029_v46  ;;  %v7028_v14 = vadd.f32 1.0, %v8560_v9 }
0x18b2   :  { %v8562_v35 = vpop.eup %8561 }
0x18b3   :  { %8575 = vrcp.f32 %v7028_v14  ;;  %v7031_v1 = vadd.f32 1.0, %v8562_v35 }
0x18b4   :  { %v8564_v52 = vpop.eup %8563 }
0x18b5   :  { %8577 = vrcp.f32 %v7031_v1  ;;  %v7030_v7 = vadd.f32 1.0, %v8564_v52 }
0x18b6   :  { %v8566_v60 = vpop.eup %8565 }
0x18b7   :  { %7049 = vst.msk [vmem:[#allocation2 + $0x8] sm:$0xff] %vm2110_vm11, %v8566_v60  ;;  %8579 = vrcp.f32 %v7030_v7 }
0x18b8   :  { %v8568_v18 = vpop.eup %8567 }
0x18b9   :  { %7048 = vst.msk [vmem:[#allocation2] sm:$0xff] %vm2110_vm11, %v8568_v18 }
0x18ba   :  { %v8570_v12 = vpop.eup %8569 }
0x18bb   :  { %7051 = vst.msk [vmem:[#allocation2 + $0x18] sm:$0xff] %vm2110_vm11, %v8570_v12 }
0x18bc   :  { %v8572_v10 = vpop.eup %8571 }
0x18bd   :  { %7050 = vst.msk [vmem:[#allocation2 + $0x10] sm:$0xff] %vm2110_vm11, %v8572_v10 }
0x18be   :  { %v8574_v16 = vpop.eup %8573 }
0x18bf   :  { %7053 = vst.msk [vmem:[#allocation2 + $0x28] sm:$0xff] %vm2110_vm11, %v8574_v16 }
0x18c0   :  { %v8576_v63 = vpop.eup %8575 }
0x18c1   :  { %7052 = vst.msk [vmem:[#allocation2 + $0x20] sm:$0xff] %vm2110_vm11, %v8576_v63 }
0x18c2   :  { %v8578_v17 = vpop.eup %8577 }
0x18c3   :  { %7055 = vst.msk [vmem:[#allocation2 + $0x38] sm:$0xff] %vm2110_vm11, %v8578_v17 }
0x18c4   :  { %v8580_v53 = vpop.eup %8579 }
0x18c5   :  { %7054 = vst.msk [vmem:[#allocation2 + $0x30] sm:$0xff] %vm2110_vm11, %v8580_v53 }
0x18c6   :  { %8612 = shalt.err (!%p8609_p9)
}
0x18c7   :  { %s8629_s22 = smov 128   ;;  %s8630_s17 = smov 8  }
0x18c8   :  { %7067 = dma.vmem_to_hbm [thread:$0]  %s7062_s5, 1024, %s12165_s25, [#allocation3], %s8629_s22, %s8629_s22, %s8630_s17  }
0x18c9   :  { %8621 = dma.done.wait [#allocation3], 1024  }
0x18ca   :  { %8622 = vsyncadd [#allocation3], 4294966272 }
0x18cb   :  { %8623 = dma.done.wait [#allocation5], 32  }
0x18cc   :  { %8624 = vsyncadd [#allocation5], 4294967264 }
0x18cd   :  { %7084 = vsyncpa [#allocation3], 1 }
0x18ce   :  { %7085 = vsyncpa [#allocation5], 1 }

</bundles_post_ra>
